<compile_context>
chip_gen: v7x
topology: tpu7x:2x2x1
jax: 0.10.0
libtpu: 0.0.40
codegen_flags: <defaults>
</compile_context>

<pallas_src>
import functools

import jax
import jax.numpy as jnp
from jax.experimental import pallas as pl
from jax.experimental.pallas import tpu as pltpu

IMAGE_SIZE = 28
N_INPUT_CHANNELS = 1
N_PROTOTYPES = 15
N_FEATURES = 40

LANE = 128
TM_MAX = 512


def _round_up(x, m):
    return ((x + m - 1) // m) * m


# --------------------- Pallas kernel: tiled matmul + bias + act ---------------------
def _matmul_bias_act_kernel(p_ref, w_ref, b_ref, o_ref, *, act):
    # p: (TM, Kp), w: (Kp, CoutP), b: (1, CoutP) -> o: (TM, CoutP)
    acc = jnp.dot(p_ref[...], w_ref[...], preferred_element_type=jnp.float32)
    acc = acc + b_ref[...]
    if act == "relu":
        acc = jnp.maximum(acc, 0.0)
    elif act == "sigmoid":
        acc = 1.0 / (1.0 + jnp.exp(-acc))
    o_ref[...] = acc.astype(o_ref.dtype)


def matmul_bias_act(p, wmat, bias, act="none"):
    """(M, K) @ (K, Cout) + bias, then activation, as a tiled Pallas kernel."""
    M, K = p.shape
    Kw, Cout = wmat.shape
    assert K == Kw
    cp = _round_up(Cout, LANE)                   # lane-dense output columns
    kp = _round_up(K, 8)                         # sublane-aligned contraction
    n_tiles = -(-M // TM_MAX)                    # balanced row tiling
    tm = _round_up(-(-M // n_tiles), 8)
    mp = n_tiles * tm

    # NOTE: inputs kept f32; accumulation is f32 in the kernel regardless.
    p_pad = jnp.pad(p.astype(jnp.float32), ((0, mp - M), (0, kp - K)))
    w_pad = jnp.pad(wmat.astype(jnp.float32), ((0, kp - K), (0, cp - Cout)))
    b_pad = jnp.pad(bias.astype(jnp.float32), (0, cp - Cout)).reshape(1, cp)

    cost = pl.CostEstimate(
        flops=2 * mp * kp * cp,
        transcendentals=mp * cp if act == "sigmoid" else 0,
        bytes_accessed=4 * (mp * kp + kp * cp + cp + mp * cp))

    out = pl.pallas_call(
        functools.partial(_matmul_bias_act_kernel, act=act),
        out_shape=jax.ShapeDtypeStruct((mp, cp), jnp.float32),
        grid=(n_tiles,),
        in_specs=[
            pl.BlockSpec((tm, kp), lambda i: (i, 0)),   # pipelined row tiles
            pl.BlockSpec((kp, cp), lambda i: (0, 0)),   # resident weights
            pl.BlockSpec((1, cp), lambda i: (0, 0)),    # resident bias
        ],
        out_specs=pl.BlockSpec((tm, cp), lambda i: (i, 0)),
        compiler_params=pltpu.CompilerParams(
            dimension_semantics=("parallel",),
            vmem_limit_bytes=32 * 1024 * 1024),
        cost_estimate=cost,
    )(p_pad, w_pad, b_pad)
    return out[:M, :Cout]


# ------------------------------ conv wrappers (NHWC) ------------------------------
def conv2d_act(x_nhwc, w_oihw, b, stride, act):
    """VALID conv on an already-padded NHWC input via im2col + Pallas matmul.
    w is PyTorch Conv2d layout (Cout, Cin, KH, KW)."""
    N, H, W, Cin = x_nhwc.shape
    Cout, _, KH, KW = w_oihw.shape
    OH = (H - KH) // stride + 1
    OW = (W - KW) // stride + 1
    cols = []
    for i in range(KH):
        for j in range(KW):
            cols.append(x_nhwc[:, i:i + stride * (OH - 1) + 1:stride,
                                  j:j + stride * (OW - 1) + 1:stride, :])
    patches = jnp.concatenate(cols, axis=-1).reshape(N * OH * OW, KH * KW * Cin)
    # K ordering is (kh, kw, cin); reorder weights to match.
    wmat = jnp.transpose(w_oihw, (2, 3, 1, 0)).reshape(KH * KW * Cin, Cout)
    out = matmul_bias_act(patches, wmat, b, act=act)
    return out.reshape(N, OH, OW, Cout)          # stays NHWC, no transpose


def conv_transpose2d_act(x_nhwc, w_iohw, b, stride, padding, output_padding, act):
    """PyTorch ConvTranspose2d: dilate input, pad, stride-1 conv with the
    spatially-flipped / channel-swapped kernel. w is (Cin, Cout, KH, KW)."""
    N, H, W, Cin = x_nhwc.shape
    _, Cout, KH, KW = w_iohw.shape
    Hd, Wd = (H - 1) * stride + 1, (W - 1) * stride + 1
    xd = jnp.zeros((N, Hd, Wd, Cin), x_nhwc.dtype).at[:, ::stride, ::stride, :].set(x_nhwc)
    lo = KH - 1 - padding
    hi = lo + output_padding
    xp = jnp.pad(xd, ((0, 0), (lo, hi), (lo, hi), (0, 0)))
    w_oihw = jnp.flip(w_iohw, axis=(2, 3)).transpose(1, 0, 2, 3)
    return conv2d_act(xp, w_oihw, b, stride=1, act=act)


def _same_pad_amount(h, stride=2, filter_h=3):
    if h % stride == 0:
        return max(filter_h - stride, 0)
    return max(filter_h - h % stride, 0)


def pad_same_nhwc(x):
    pad = _same_pad_amount(x.shape[1])
    top = pad // 2
    return jnp.pad(x, ((0, 0), (top, pad - top), (top, pad - top), (0, 0)))


def pad_same_nchw(x):
    pad = _same_pad_amount(x.shape[2])
    top = pad // 2
    return jnp.pad(x, ((0, 0), (0, 0), (top, pad - top), (top, pad - top)))


# ------------- Pallas kernel: fused prototype distances + classifier head -------------
def _proto_head_kernel(f_ref, pt_ref, w_ref, b_ref, pd_ref, fvd_ref, lg_ref):
    f = f_ref[...]                                    # (Np, Fp)   features
    pt = pt_ref[...]                                  # (Fp, Pp)   prototypes^T
    xx = jnp.sum(f * f, axis=1, keepdims=True)        # (Np, 1)
    yy = jnp.sum(pt * pt, axis=0, keepdims=True)      # (1, Pp)
    d = xx + yy - 2.0 * jnp.dot(f, pt, preferred_element_type=jnp.float32)
    pd_ref[...] = d                                   # prototype_distances
    fvd_ref[...] = d.T                                # feature_vector_distances
    lg_ref[...] = (jnp.dot(d, w_ref[...], preferred_element_type=jnp.float32)
                   + b_ref[...])                      # last_layer logits


def prototype_head(feats, protos, wl, bl):
    """Returns (prototype_distances, feature_vector_distances, logits).

    Squared euclidean distance is symmetric, so feature_vector_distances is the
    transpose of prototype_distances; the fused kernel computes the distance
    matrix once and reuses it for both outputs and the classifier matmul."""
    N, F = feats.shape
    P, _ = protos.shape
    C = bl.shape[0]
    np_ = _round_up(N, 8)
    fp = _round_up(F, 8)
    pp = _round_up(P, LANE)
    cp = _round_up(C, LANE)

    f_pad = jnp.pad(feats.astype(jnp.float32), ((0, np_ - N), (0, fp - F)))
    pt_pad = jnp.pad(protos.astype(jnp.float32).T, ((0, fp - F), (0, pp - P)))
    w_pad = jnp.pad(wl.astype(jnp.float32).T, ((0, pp - P), (0, cp - C)))
    b_pad = jnp.pad(bl.astype(jnp.float32), (0, cp - C)).reshape(1, cp)

    pd, fvd, lg = pl.pallas_call(
        _proto_head_kernel,
        out_shape=(jax.ShapeDtypeStruct((np_, pp), jnp.float32),
                   jax.ShapeDtypeStruct((pp, np_), jnp.float32),
                   jax.ShapeDtypeStruct((np_, cp), jnp.float32)),
        in_specs=[pl.BlockSpec(memory_space=pltpu.MemorySpace.VMEM)] * 4,
        out_specs=(pl.BlockSpec(memory_space=pltpu.MemorySpace.VMEM),) * 3,
    )(f_pad, pt_pad, w_pad, b_pad)
    return pd[:N, :P], fvd[:P, :N], lg[:N, :C]


# ---------------------------------- model forward ----------------------------------
def encoder_forward(x_nchw, enc_params):
    h = jnp.transpose(x_nchw, (0, 2, 3, 1))          # NCHW -> NHWC once
    for (w, b) in enc_params:
        h = conv2d_act(pad_same_nhwc(h), w, b, stride=2, act="relu")
    return jnp.transpose(h, (0, 3, 1, 2))            # back to NCHW


def decoder_forward(enc_nchw, dec_params):
    pad_corr = 0 if IMAGE_SIZE == 28 else 1
    out_pads = (1, pad_corr, 1, 1)                   # dec_l4, dec_l3, dec_l2, dec_l1
    acts = ("relu", "relu", "relu", "sigmoid")
    h = jnp.transpose(enc_nchw, (0, 2, 3, 1))
    for (w, b), op, act in zip(dec_params, out_pads, acts):
        h = conv_transpose2d_act(h, w, b, stride=2, padding=1,
                                 output_padding=op, act=act)
    return jnp.transpose(h, (0, 3, 1, 2))


def nn_prototype_forward(x, params):
    enc_x = encoder_forward(x, params["encoder"])                  # (N, 10, 2, 2)
    dec_x = decoder_forward(enc_x, params["decoder"])              # (N, 1, 28, 28)
    n_features = enc_x.shape[1] * enc_x.shape[2] * enc_x.shape[3]
    feats = enc_x.reshape(-1, n_features)                          # (N, 40)
    protos = params["prototypes"]                                  # (15, 40)
    wl, bl = params["last_layer"]                                  # (10, 15), (10,)
    prototype_distances, feature_vector_distances, logits = prototype_head(
        feats, protos, wl, bl)
    return dec_x, logits, feature_vector_distances, prototype_distances


# ------------------------------------ reference ------------------------------------
def _list_of_distances_ref(X, Y):
    xx = jnp.sum(X * X, axis=1).reshape(-1, 1)
    yy = jnp.sum(Y * Y, axis=1).reshape(1, -1)
    return xx + yy - 2.0 * (X @ Y.T)


def nn_prototype_forward_ref(x, params):
    h = x
    for (w, b) in params["encoder"]:
        y = jax.lax.conv_general_dilated(
            pad_same_nchw(h), w, (2, 2), "VALID",
            dimension_numbers=("NCHW", "OIHW", "NCHW"))
        h = jnp.maximum(y + b.reshape(1, -1, 1, 1), 0.0)
    enc_x = h

    pad_corr = 0 if IMAGE_SIZE == 28 else 1
    out_pads = (1, pad_corr, 1, 1)
    acts = ("relu", "relu", "relu", "sigmoid")
    h = enc_x
    for (w, b), op, act in zip(params["decoder"], out_pads, acts):
        w_oihw = jnp.flip(w, axis=(2, 3)).transpose(1, 0, 2, 3)
        lo = 3 - 1 - 1
        y = jax.lax.conv_general_dilated(
            h, w_oihw, window_strides=(1, 1),
            padding=[(lo, lo + op), (lo, lo + op)], lhs_dilation=(2, 2),
            dimension_numbers=("NCHW", "OIHW", "NCHW"))
        y = y + b.reshape(1, -1, 1, 1)
        h = jnp.maximum(y, 0.0) if act == "relu" else jax.nn.sigmoid(y)
    dec_x = h

    feats = enc_x.reshape(enc_x.shape[0], -1)
    protos = params["prototypes"]
    pd = _list_of_distances_ref(feats, protos)
    fvd = _list_of_distances_ref(protos, feats)
    wl, bl = params["last_layer"]
    logits = pd @ wl.T + bl
    return dec_x, logits, fvd, pd


# -------------------------------------- params --------------------------------------
def init_params(key):
    ks = iter(jax.random.split(key, 32))

    def u(shape, bound):
        return jax.random.uniform(next(ks), shape, jnp.float32, -bound, bound)

    encoder = []
    for s in [(32, N_INPUT_CHANNELS, 3, 3), (32, 32, 3, 3),
              (32, 32, 3, 3), (10, 32, 3, 3)]:
        bound = 1.0 / (s[1] * s[2] * s[3]) ** 0.5
        encoder.append((u(s, bound), u((s[0],), bound)))

    decoder = []  # ConvTranspose2d weights: (Cin, Cout, KH, KW)
    for s in [(10, 32, 3, 3), (32, 32, 3, 3),
              (32, 32, 3, 3), (32, N_INPUT_CHANNELS, 3, 3)]:
        bound = 1.0 / (s[1] * s[2] * s[3]) ** 0.5
        decoder.append((u(s, bound), u((s[1],), bound)))

    prototypes = jax.random.uniform(next(ks), (N_PROTOTYPES, N_FEATURES), jnp.float32)
    bound = 1.0 / N_PROTOTYPES ** 0.5
    last_layer = (u((10, N_PROTOTYPES), bound), u((10,), bound))
    return {"encoder": encoder, "decoder": decoder,
            "prototypes": prototypes, "last_layer": last_layer}


if __name__ == "__main__":
    key = jax.random.PRNGKey(0)
    params = init_params(key)
    x = jax.random.uniform(jax.random.fold_in(key, 123),
                           (2, N_INPUT_CHANNELS, IMAGE_SIZE, IMAGE_SIZE), jnp.float32)

    fwd = jax.jit(nn_prototype_forward)
    dec_x, logits, fvd, pd = jax.block_until_ready(fwd(x, params))
    rdec, rlog, rfvd, rpd = jax.block_until_ready(nn_prototype_forward_ref(x, params))

    assert dec_x.shape == (2, 1, 28, 28), dec_x.shape
    assert logits.shape == (2, 10), logits.shape
    assert fvd.shape == (15, 2), fvd.shape
    assert pd.shape == (2, 15), pd.shape
    for got, ref, name in [(dec_x, rdec, "dec_x"), (logits, rlog, "logits"),
                           (fvd, rfvd, "feature_vector_distances"),
                           (pd, rpd, "prototype_distances")]:
        assert jnp.allclose(got, ref, atol=1e-2, rtol=1e-2), f"mismatch: {name}"

    print("KERNEL_OK")
</pallas_src>

<mosaic_0001>
module attributes {stable_mosaic.version = 11 : i64} {
  func.func @_matmul_bias_act_kernel(%arg0: i32, %arg1: memref<392x16xf32, #tpu.memory_space<vmem>>, %arg2: memref<16x128xf32, #tpu.memory_space<vmem>>, %arg3: memref<1x128xf32, #tpu.memory_space<vmem>>, %arg4: memref<392x128xf32, #tpu.memory_space<vmem>>) attributes {dimension_semantics = [#tpu.dimension_semantics<parallel>], iteration_bounds = array<i64: 1>, scalar_prefetch = 0 : i64, scratch_operands = 0 : i64, tpu.core_type = #tpu.core_type<tc>, window_params = [{transform_indices = @transform_0, window_bounds = array<i64: 392, 16>}, {pipeline_mode = #tpu.pipeline_mode<synchronous>, transform_indices = @transform_1, window_bounds = array<i64: 16, 128>}, {pipeline_mode = #tpu.pipeline_mode<synchronous>, transform_indices = @transform_2, window_bounds = array<i64: 1, 128>}, {transform_indices = @transform_3, window_bounds = array<i64: 392, 128>}]} {
    %c0 = arith.constant 0 : index
    %c0_0 = arith.constant 0 : index
    %0 = vector.load %arg1[%c0, %c0_0] : memref<392x16xf32, #tpu.memory_space<vmem>>, vector<392x16xf32>
    %c0_1 = arith.constant 0 : index
    %c0_2 = arith.constant 0 : index
    %1 = vector.load %arg2[%c0_1, %c0_2] : memref<16x128xf32, #tpu.memory_space<vmem>>, vector<16x128xf32>
    %cst = arith.constant dense<0.000000e+00> : vector<392x128xf32>
    %2 = tpu.matmul %0, %1, %cst {dimension_numbers = #tpu.dot_dimension_numbers<[1], [0], [0], [1], [0, 0, 1, 1], [], []>} : vector<392x16xf32>, vector<16x128xf32>, vector<392x128xf32> -> vector<392x128xf32>
    %c0_3 = arith.constant 0 : index
    %c0_4 = arith.constant 0 : index
    %3 = vector.load %arg3[%c0_3, %c0_4] : memref<1x128xf32, #tpu.memory_space<vmem>>, vector<1x128xf32>
    %4 = vector.broadcast %3 : vector<1x128xf32> to vector<392x128xf32>
    %5 = arith.addf %2, %4 : vector<392x128xf32>
    %cst_5 = arith.constant 0.000000e+00 : f32
    %6 = vector.broadcast %cst_5 : f32 to vector<392x128xf32>
    %7 = arith.maximumf %5, %6 : vector<392x128xf32>
    %c0_6 = arith.constant 0 : index
    %c0_7 = arith.constant 0 : index
    %8 = vector.load %arg4[%c0_6, %c0_7] : memref<392x128xf32, #tpu.memory_space<vmem>>, vector<392x128xf32>
    tpu.vector_store %arg4[%c0_6, %c0_7], %7 {strides = array<i32>} : memref<392x128xf32, #tpu.memory_space<vmem>>, vector<392x128xf32>,
    return
  }
  func.func @transform_0(%arg0: i32) -> (i32, i32) {
    %c0_i32 = arith.constant 0 : i32
    %c0_i32_0 = arith.constant 0 : i32
    return %arg0, %c0_i32 : i32, i32
  }
  func.func @transform_1(%arg0: i32) -> (i32, i32) {
    %c0_i32 = arith.constant 0 : i32
    %c0_i32_0 = arith.constant 0 : i32
    %c0_i32_1 = arith.constant 0 : i32
    return %c0_i32, %c0_i32_0 : i32, i32
  }
  func.func @transform_2(%arg0: i32) -> (i32, i32) {
    %c0_i32 = arith.constant 0 : i32
    %c0_i32_0 = arith.constant 0 : i32
    %c0_i32_1 = arith.constant 0 : i32
    return %c0_i32, %c0_i32_0 : i32, i32
  }
  func.func @transform_3(%arg0: i32) -> (i32, i32) {
    %c0_i32 = arith.constant 0 : i32
    %c0_i32_0 = arith.constant 0 : i32
    return %arg0, %c0_i32 : i32, i32
  }
}

module attributes {stable_mosaic.version = 11 : i64} {
  func.func @_matmul_bias_act_kernel(%arg0: i32, %arg1: memref<104x288xf32, #tpu.memory_space<vmem>>, %arg2: memref<288x128xf32, #tpu.memory_space<vmem>>, %arg3: memref<1x128xf32, #tpu.memory_space<vmem>>, %arg4: memref<104x128xf32, #tpu.memory_space<vmem>>) attributes {dimension_semantics = [#tpu.dimension_semantics<parallel>], iteration_bounds = array<i64: 1>, scalar_prefetch = 0 : i64, scratch_operands = 0 : i64, tpu.core_type = #tpu.core_type<tc>, window_params = [{transform_indices = @transform_0, window_bounds = array<i64: 104, 288>}, {pipeline_mode = #tpu.pipeline_mode<synchronous>, transform_indices = @transform_1, window_bounds = array<i64: 288, 128>}, {pipeline_mode = #tpu.pipeline_mode<synchronous>, transform_indices = @transform_2, window_bounds = array<i64: 1, 128>}, {transform_indices = @transform_3, window_bounds = array<i64: 104, 128>}]} {
    %c0 = arith.constant 0 : index
    %c0_0 = arith.constant 0 : index
    %0 = vector.load %arg1[%c0, %c0_0] : memref<104x288xf32, #tpu.memory_space<vmem>>, vector<104x288xf32>
    %c0_1 = arith.constant 0 : index
    %c0_2 = arith.constant 0 : index
    %1 = vector.load %arg2[%c0_1, %c0_2] : memref<288x128xf32, #tpu.memory_space<vmem>>, vector<288x128xf32>
    %cst = arith.constant dense<0.000000e+00> : vector<104x128xf32>
    %2 = tpu.matmul %0, %1, %cst {dimension_numbers = #tpu.dot_dimension_numbers<[1], [0], [0], [1], [0, 0, 1, 1], [], []>} : vector<104x288xf32>, vector<288x128xf32>, vector<104x128xf32> -> vector<104x128xf32>
    %c0_3 = arith.constant 0 : index
    %c0_4 = arith.constant 0 : index
    %3 = vector.load %arg3[%c0_3, %c0_4] : memref<1x128xf32, #tpu.memory_space<vmem>>, vector<1x128xf32>
    %4 = vector.broadcast %3 : vector<1x128xf32> to vector<104x128xf32>
    %5 = arith.addf %2, %4 : vector<104x128xf32>
    %cst_5 = arith.constant 0.000000e+00 : f32
    %6 = vector.broadcast %cst_5 : f32 to vector<104x128xf32>
    %7 = arith.maximumf %5, %6 : vector<104x128xf32>
    %c0_6 = arith.constant 0 : index
    %c0_7 = arith.constant 0 : index
    %8 = vector.load %arg4[%c0_6, %c0_7] : memref<104x128xf32, #tpu.memory_space<vmem>>, vector<104x128xf32>
    tpu.vector_store %arg4[%c0_6, %c0_7], %7 {strides = array<i32>} : memref<104x128xf32, #tpu.memory_space<vmem>>, vector<104x128xf32>,
    return
  }
  func.func @transform_0(%arg0: i32) -> (i32, i32) {
    %c0_i32 = arith.constant 0 : i32
    %c0_i32_0 = arith.constant 0 : i32
    return %arg0, %c0_i32 : i32, i32
  }
  func.func @transform_1(%arg0: i32) -> (i32, i32) {
    %c0_i32 = arith.constant 0 : i32
    %c0_i32_0 = arith.constant 0 : i32
    %c0_i32_1 = arith.constant 0 : i32
    return %c0_i32, %c0_i32_0 : i32, i32
  }
  func.func @transform_2(%arg0: i32) -> (i32, i32) {
    %c0_i32 = arith.constant 0 : i32
    %c0_i32_0 = arith.constant 0 : i32
    %c0_i32_1 = arith.constant 0 : i32
    return %c0_i32, %c0_i32_0 : i32, i32
  }
  func.func @transform_3(%arg0: i32) -> (i32, i32) {
    %c0_i32 = arith.constant 0 : i32
    %c0_i32_0 = arith.constant 0 : i32
    return %arg0, %c0_i32 : i32, i32
  }
}

module attributes {stable_mosaic.version = 11 : i64} {
  func.func @_matmul_bias_act_kernel(%arg0: i32, %arg1: memref<32x288xf32, #tpu.memory_space<vmem>>, %arg2: memref<288x128xf32, #tpu.memory_space<vmem>>, %arg3: memref<1x128xf32, #tpu.memory_space<vmem>>, %arg4: memref<32x128xf32, #tpu.memory_space<vmem>>) attributes {dimension_semantics = [#tpu.dimension_semantics<parallel>], iteration_bounds = array<i64: 1>, scalar_prefetch = 0 : i64, scratch_operands = 0 : i64, tpu.core_type = #tpu.core_type<tc>, window_params = [{transform_indices = @transform_0, window_bounds = array<i64: 32, 288>}, {pipeline_mode = #tpu.pipeline_mode<synchronous>, transform_indices = @transform_1, window_bounds = array<i64: 288, 128>}, {pipeline_mode = #tpu.pipeline_mode<synchronous>, transform_indices = @transform_2, window_bounds = array<i64: 1, 128>}, {transform_indices = @transform_3, window_bounds = array<i64: 32, 128>}]} {
    %c0 = arith.constant 0 : index
    %c0_0 = arith.constant 0 : index
    %0 = vector.load %arg1[%c0, %c0_0] : memref<32x288xf32, #tpu.memory_space<vmem>>, vector<32x288xf32>
    %c0_1 = arith.constant 0 : index
    %c0_2 = arith.constant 0 : index
    %1 = vector.load %arg2[%c0_1, %c0_2] : memref<288x128xf32, #tpu.memory_space<vmem>>, vector<288x128xf32>
    %cst = arith.constant dense<0.000000e+00> : vector<32x128xf32>
    %2 = tpu.matmul %0, %1, %cst {dimension_numbers = #tpu.dot_dimension_numbers<[1], [0], [0], [1], [0, 0, 1, 1], [], []>} : vector<32x288xf32>, vector<288x128xf32>, vector<32x128xf32> -> vector<32x128xf32>
    %c0_3 = arith.constant 0 : index
    %c0_4 = arith.constant 0 : index
    %3 = vector.load %arg3[%c0_3, %c0_4] : memref<1x128xf32, #tpu.memory_space<vmem>>, vector<1x128xf32>
    %4 = vector.broadcast %3 : vector<1x128xf32> to vector<32x128xf32>
    %5 = arith.addf %2, %4 : vector<32x128xf32>
    %cst_5 = arith.constant 0.000000e+00 : f32
    %6 = vector.broadcast %cst_5 : f32 to vector<32x128xf32>
    %7 = arith.maximumf %5, %6 : vector<32x128xf32>
    %c0_6 = arith.constant 0 : index
    %c0_7 = arith.constant 0 : index
    %8 = vector.load %arg4[%c0_6, %c0_7] : memref<32x128xf32, #tpu.memory_space<vmem>>, vector<32x128xf32>
    tpu.vector_store %arg4[%c0_6, %c0_7], %7 {strides = array<i32>} : memref<32x128xf32, #tpu.memory_space<vmem>>, vector<32x128xf32>,
    return
  }
  func.func @transform_0(%arg0: i32) -> (i32, i32) {
    %c0_i32 = arith.constant 0 : i32
    %c0_i32_0 = arith.constant 0 : i32
    return %arg0, %c0_i32 : i32, i32
  }
  func.func @transform_1(%arg0: i32) -> (i32, i32) {
    %c0_i32 = arith.constant 0 : i32
    %c0_i32_0 = arith.constant 0 : i32
    %c0_i32_1 = arith.constant 0 : i32
    return %c0_i32, %c0_i32_0 : i32, i32
  }
  func.func @transform_2(%arg0: i32) -> (i32, i32) {
    %c0_i32 = arith.constant 0 : i32
    %c0_i32_0 = arith.constant 0 : i32
    %c0_i32_1 = arith.constant 0 : i32
    return %c0_i32, %c0_i32_0 : i32, i32
  }
  func.func @transform_3(%arg0: i32) -> (i32, i32) {
    %c0_i32 = arith.constant 0 : i32
    %c0_i32_0 = arith.constant 0 : i32
    return %arg0, %c0_i32 : i32, i32
  }
}

module attributes {stable_mosaic.version = 11 : i64} {
  func.func @_matmul_bias_act_kernel(%arg0: i32, %arg1: memref<8x288xf32, #tpu.memory_space<vmem>>, %arg2: memref<288x128xf32, #tpu.memory_space<vmem>>, %arg3: memref<1x128xf32, #tpu.memory_space<vmem>>, %arg4: memref<8x128xf32, #tpu.memory_space<vmem>>) attributes {dimension_semantics = [#tpu.dimension_semantics<parallel>], iteration_bounds = array<i64: 1>, scalar_prefetch = 0 : i64, scratch_operands = 0 : i64, tpu.core_type = #tpu.core_type<tc>, window_params = [{transform_indices = @transform_0, window_bounds = array<i64: 8, 288>}, {pipeline_mode = #tpu.pipeline_mode<synchronous>, transform_indices = @transform_1, window_bounds = array<i64: 288, 128>}, {pipeline_mode = #tpu.pipeline_mode<synchronous>, transform_indices = @transform_2, window_bounds = array<i64: 1, 128>}, {transform_indices = @transform_3, window_bounds = array<i64: 8, 128>}]} {
    %c0 = arith.constant 0 : index
    %c0_0 = arith.constant 0 : index
    %0 = vector.load %arg1[%c0, %c0_0] : memref<8x288xf32, #tpu.memory_space<vmem>>, vector<8x288xf32>
    %c0_1 = arith.constant 0 : index
    %c0_2 = arith.constant 0 : index
    %1 = vector.load %arg2[%c0_1, %c0_2] : memref<288x128xf32, #tpu.memory_space<vmem>>, vector<288x128xf32>
    %cst = arith.constant dense<0.000000e+00> : vector<8x128xf32>
    %2 = tpu.matmul %0, %1, %cst {dimension_numbers = #tpu.dot_dimension_numbers<[1], [0], [0], [1], [0, 0, 1, 1], [], []>} : vector<8x288xf32>, vector<288x128xf32>, vector<8x128xf32> -> vector<8x128xf32>
    %c0_3 = arith.constant 0 : index
    %c0_4 = arith.constant 0 : index
    %3 = vector.load %arg3[%c0_3, %c0_4] : memref<1x128xf32, #tpu.memory_space<vmem>>, vector<1x128xf32>
    %4 = vector.broadcast %3 : vector<1x128xf32> to vector<8x128xf32>
    %5 = arith.addf %2, %4 : vector<8x128xf32>
    %cst_5 = arith.constant 0.000000e+00 : f32
    %6 = vector.broadcast %cst_5 : f32 to vector<8x128xf32>
    %7 = arith.maximumf %5, %6 : vector<8x128xf32>
    %c0_6 = arith.constant 0 : index
    %c0_7 = arith.constant 0 : index
    %8 = vector.load %arg4[%c0_6, %c0_7] : memref<8x128xf32, #tpu.memory_space<vmem>>, vector<8x128xf32>
    tpu.vector_store %arg4[%c0_6, %c0_7], %7 {strides = array<i32>} : memref<8x128xf32, #tpu.memory_space<vmem>>, vector<8x128xf32>,
    return
  }
  func.func @transform_0(%arg0: i32) -> (i32, i32) {
    %c0_i32 = arith.constant 0 : i32
    %c0_i32_0 = arith.constant 0 : i32
    return %arg0, %c0_i32 : i32, i32
  }
  func.func @transform_1(%arg0: i32) -> (i32, i32) {
    %c0_i32 = arith.constant 0 : i32
    %c0_i32_0 = arith.constant 0 : i32
    %c0_i32_1 = arith.constant 0 : i32
    return %c0_i32, %c0_i32_0 : i32, i32
  }
  func.func @transform_2(%arg0: i32) -> (i32, i32) {
    %c0_i32 = arith.constant 0 : i32
    %c0_i32_0 = arith.constant 0 : i32
    %c0_i32_1 = arith.constant 0 : i32
    return %c0_i32, %c0_i32_0 : i32, i32
  }
  func.func @transform_3(%arg0: i32) -> (i32, i32) {
    %c0_i32 = arith.constant 0 : i32
    %c0_i32_0 = arith.constant 0 : i32
    return %arg0, %c0_i32 : i32, i32
  }
}

module attributes {stable_mosaic.version = 11 : i64} {
  func.func @_matmul_bias_act_kernel(%arg0: i32, %arg1: memref<32x96xf32, #tpu.memory_space<vmem>>, %arg2: memref<96x128xf32, #tpu.memory_space<vmem>>, %arg3: memref<1x128xf32, #tpu.memory_space<vmem>>, %arg4: memref<32x128xf32, #tpu.memory_space<vmem>>) attributes {dimension_semantics = [#tpu.dimension_semantics<parallel>], iteration_bounds = array<i64: 1>, scalar_prefetch = 0 : i64, scratch_operands = 0 : i64, tpu.core_type = #tpu.core_type<tc>, window_params = [{transform_indices = @transform_0, window_bounds = array<i64: 32, 96>}, {pipeline_mode = #tpu.pipeline_mode<synchronous>, transform_indices = @transform_1, window_bounds = array<i64: 96, 128>}, {pipeline_mode = #tpu.pipeline_mode<synchronous>, transform_indices = @transform_2, window_bounds = array<i64: 1, 128>}, {transform_indices = @transform_3, window_bounds = array<i64: 32, 128>}]} {
    %c0 = arith.constant 0 : index
    %c0_0 = arith.constant 0 : index
    %0 = vector.load %arg1[%c0, %c0_0] : memref<32x96xf32, #tpu.memory_space<vmem>>, vector<32x96xf32>
    %c0_1 = arith.constant 0 : index
    %c0_2 = arith.constant 0 : index
    %1 = vector.load %arg2[%c0_1, %c0_2] : memref<96x128xf32, #tpu.memory_space<vmem>>, vector<96x128xf32>
    %cst = arith.constant dense<0.000000e+00> : vector<32x128xf32>
    %2 = tpu.matmul %0, %1, %cst {dimension_numbers = #tpu.dot_dimension_numbers<[1], [0], [0], [1], [0, 0, 1, 1], [], []>} : vector<32x96xf32>, vector<96x128xf32>, vector<32x128xf32> -> vector<32x128xf32>
    %c0_3 = arith.constant 0 : index
    %c0_4 = arith.constant 0 : index
    %3 = vector.load %arg3[%c0_3, %c0_4] : memref<1x128xf32, #tpu.memory_space<vmem>>, vector<1x128xf32>
    %4 = vector.broadcast %3 : vector<1x128xf32> to vector<32x128xf32>
    %5 = arith.addf %2, %4 : vector<32x128xf32>
    %cst_5 = arith.constant 0.000000e+00 : f32
    %6 = vector.broadcast %cst_5 : f32 to vector<32x128xf32>
    %7 = arith.maximumf %5, %6 : vector<32x128xf32>
    %c0_6 = arith.constant 0 : index
    %c0_7 = arith.constant 0 : index
    %8 = vector.load %arg4[%c0_6, %c0_7] : memref<32x128xf32, #tpu.memory_space<vmem>>, vector<32x128xf32>
    tpu.vector_store %arg4[%c0_6, %c0_7], %7 {strides = array<i32>} : memref<32x128xf32, #tpu.memory_space<vmem>>, vector<32x128xf32>,
    return
  }
  func.func @transform_0(%arg0: i32) -> (i32, i32) {
    %c0_i32 = arith.constant 0 : i32
    %c0_i32_0 = arith.constant 0 : i32
    return %arg0, %c0_i32 : i32, i32
  }
  func.func @transform_1(%arg0: i32) -> (i32, i32) {
    %c0_i32 = arith.constant 0 : i32
    %c0_i32_0 = arith.constant 0 : i32
    %c0_i32_1 = arith.constant 0 : i32
    return %c0_i32, %c0_i32_0 : i32, i32
  }
  func.func @transform_2(%arg0: i32) -> (i32, i32) {
    %c0_i32 = arith.constant 0 : i32
    %c0_i32_0 = arith.constant 0 : i32
    %c0_i32_1 = arith.constant 0 : i32
    return %c0_i32, %c0_i32_0 : i32, i32
  }
  func.func @transform_3(%arg0: i32) -> (i32, i32) {
    %c0_i32 = arith.constant 0 : i32
    %c0_i32_0 = arith.constant 0 : i32
    return %arg0, %c0_i32 : i32, i32
  }
}

module attributes {stable_mosaic.version = 11 : i64} {
  func.func @_matmul_bias_act_kernel(%arg0: i32, %arg1: memref<392x288xf32, #tpu.memory_space<vmem>>, %arg2: memref<288x128xf32, #tpu.memory_space<vmem>>, %arg3: memref<1x128xf32, #tpu.memory_space<vmem>>, %arg4: memref<392x128xf32, #tpu.memory_space<vmem>>) attributes {dimension_semantics = [#tpu.dimension_semantics<parallel>], iteration_bounds = array<i64: 1>, scalar_prefetch = 0 : i64, scratch_operands = 0 : i64, tpu.core_type = #tpu.core_type<tc>, window_params = [{transform_indices = @transform_0, window_bounds = array<i64: 392, 288>}, {pipeline_mode = #tpu.pipeline_mode<synchronous>, transform_indices = @transform_1, window_bounds = array<i64: 288, 128>}, {pipeline_mode = #tpu.pipeline_mode<synchronous>, transform_indices = @transform_2, window_bounds = array<i64: 1, 128>}, {transform_indices = @transform_3, window_bounds = array<i64: 392, 128>}]} {
    %c0 = arith.constant 0 : index
    %c0_0 = arith.constant 0 : index
    %0 = vector.load %arg1[%c0, %c0_0] : memref<392x288xf32, #tpu.memory_space<vmem>>, vector<392x288xf32>
    %c0_1 = arith.constant 0 : index
    %c0_2 = arith.constant 0 : index
    %1 = vector.load %arg2[%c0_1, %c0_2] : memref<288x128xf32, #tpu.memory_space<vmem>>, vector<288x128xf32>
    %cst = arith.constant dense<0.000000e+00> : vector<392x128xf32>
    %2 = tpu.matmul %0, %1, %cst {dimension_numbers = #tpu.dot_dimension_numbers<[1], [0], [0], [1], [0, 0, 1, 1], [], []>} : vector<392x288xf32>, vector<288x128xf32>, vector<392x128xf32> -> vector<392x128xf32>
    %c0_3 = arith.constant 0 : index
    %c0_4 = arith.constant 0 : index
    %3 = vector.load %arg3[%c0_3, %c0_4] : memref<1x128xf32, #tpu.memory_space<vmem>>, vector<1x128xf32>
    %4 = vector.broadcast %3 : vector<1x128xf32> to vector<392x128xf32>
    %5 = arith.addf %2, %4 : vector<392x128xf32>
    %cst_5 = arith.constant 0.000000e+00 : f32
    %6 = vector.broadcast %cst_5 : f32 to vector<392x128xf32>
    %7 = arith.maximumf %5, %6 : vector<392x128xf32>
    %c0_6 = arith.constant 0 : index
    %c0_7 = arith.constant 0 : index
    %8 = vector.load %arg4[%c0_6, %c0_7] : memref<392x128xf32, #tpu.memory_space<vmem>>, vector<392x128xf32>
    tpu.vector_store %arg4[%c0_6, %c0_7], %7 {strides = array<i32>} : memref<392x128xf32, #tpu.memory_space<vmem>>, vector<392x128xf32>,
    return
  }
  func.func @transform_0(%arg0: i32) -> (i32, i32) {
    %c0_i32 = arith.constant 0 : i32
    %c0_i32_0 = arith.constant 0 : i32
    return %arg0, %c0_i32 : i32, i32
  }
  func.func @transform_1(%arg0: i32) -> (i32, i32) {
    %c0_i32 = arith.constant 0 : i32
    %c0_i32_0 = arith.constant 0 : i32
    %c0_i32_1 = arith.constant 0 : i32
    return %c0_i32, %c0_i32_0 : i32, i32
  }
  func.func @transform_2(%arg0: i32) -> (i32, i32) {
    %c0_i32 = arith.constant 0 : i32
    %c0_i32_0 = arith.constant 0 : i32
    %c0_i32_1 = arith.constant 0 : i32
    return %c0_i32, %c0_i32_0 : i32, i32
  }
  func.func @transform_3(%arg0: i32) -> (i32, i32) {
    %c0_i32 = arith.constant 0 : i32
    %c0_i32_0 = arith.constant 0 : i32
    return %arg0, %c0_i32 : i32, i32
  }
}

module attributes {stable_mosaic.version = 11 : i64} {
  func.func @_matmul_bias_act_kernel(%arg0: i32, %arg1: memref<392x288xf32, #tpu.memory_space<vmem>>, %arg2: memref<288x128xf32, #tpu.memory_space<vmem>>, %arg3: memref<1x128xf32, #tpu.memory_space<vmem>>, %arg4: memref<392x128xf32, #tpu.memory_space<vmem>>) attributes {dimension_semantics = [#tpu.dimension_semantics<parallel>], iteration_bounds = array<i64: 4>, scalar_prefetch = 0 : i64, scratch_operands = 0 : i64, tpu.core_type = #tpu.core_type<tc>, window_params = [{transform_indices = @transform_0, window_bounds = array<i64: 392, 288>}, {pipeline_mode = #tpu.pipeline_mode<synchronous>, transform_indices = @transform_1, window_bounds = array<i64: 288, 128>}, {pipeline_mode = #tpu.pipeline_mode<synchronous>, transform_indices = @transform_2, window_bounds = array<i64: 1, 128>}, {transform_indices = @transform_3, window_bounds = array<i64: 392, 128>}]} {
    %c0 = arith.constant 0 : index
    %c0_0 = arith.constant 0 : index
    %0 = vector.load %arg1[%c0, %c0_0] : memref<392x288xf32, #tpu.memory_space<vmem>>, vector<392x288xf32>
    %c0_1 = arith.constant 0 : index
    %c0_2 = arith.constant 0 : index
    %1 = vector.load %arg2[%c0_1, %c0_2] : memref<288x128xf32, #tpu.memory_space<vmem>>, vector<288x128xf32>
    %cst = arith.constant dense<0.000000e+00> : vector<392x128xf32>
    %2 = tpu.matmul %0, %1, %cst {dimension_numbers = #tpu.dot_dimension_numbers<[1], [0], [0], [1], [0, 0, 1, 1], [], []>} : vector<392x288xf32>, vector<288x128xf32>, vector<392x128xf32> -> vector<392x128xf32>
    %c0_3 = arith.constant 0 : index
    %c0_4 = arith.constant 0 : index
    %3 = vector.load %arg3[%c0_3, %c0_4] : memref<1x128xf32, #tpu.memory_space<vmem>>, vector<1x128xf32>
    %4 = vector.broadcast %3 : vector<1x128xf32> to vector<392x128xf32>
    %5 = arith.addf %2, %4 : vector<392x128xf32>
    %cst_5 = arith.constant 0.000000e+00 : f32
    %6 = vector.broadcast %cst_5 : f32 to vector<392x128xf32>
    %7 = arith.subf %6, %5 : vector<392x128xf32>
    %8 = math.exp %7 : vector<392x128xf32>
    %cst_6 = arith.constant 1.000000e+00 : f32
    %9 = vector.broadcast %cst_6 : f32 to vector<392x128xf32>
    %10 = arith.addf %9, %8 : vector<392x128xf32>
    %cst_7 = arith.constant 1.000000e+00 : f32
    %11 = vector.broadcast %cst_7 : f32 to vector<392x128xf32>
    %12 = arith.divf %11, %10 : vector<392x128xf32>
    %c0_8 = arith.constant 0 : index
    %c0_9 = arith.constant 0 : index
    %13 = vector.load %arg4[%c0_8, %c0_9] : memref<392x128xf32, #tpu.memory_space<vmem>>, vector<392x128xf32>
    tpu.vector_store %arg4[%c0_8, %c0_9], %12 {strides = array<i32>} : memref<392x128xf32, #tpu.memory_space<vmem>>, vector<392x128xf32>,
    return
  }
  func.func @transform_0(%arg0: i32) -> (i32, i32) {
    %c0_i32 = arith.constant 0 : i32
    %c0_i32_0 = arith.constant 0 : i32
    return %arg0, %c0_i32 : i32, i32
  }
  func.func @transform_1(%arg0: i32) -> (i32, i32) {
    %c0_i32 = arith.constant 0 : i32
    %c0_i32_0 = arith.constant 0 : i32
    %c0_i32_1 = arith.constant 0 : i32
    return %c0_i32, %c0_i32_0 : i32, i32
  }
  func.func @transform_2(%arg0: i32) -> (i32, i32) {
    %c0_i32 = arith.constant 0 : i32
    %c0_i32_0 = arith.constant 0 : i32
    %c0_i32_1 = arith.constant 0 : i32
    return %c0_i32, %c0_i32_0 : i32, i32
  }
  func.func @transform_3(%arg0: i32) -> (i32, i32) {
    %c0_i32 = arith.constant 0 : i32
    %c0_i32_0 = arith.constant 0 : i32
    return %arg0, %c0_i32 : i32, i32
  }
}

module attributes {stable_mosaic.version = 11 : i64} {
  func.func @_proto_head_kernel(%arg0: memref<8x40xf32, #tpu.memory_space<vmem>>, %arg1: memref<40x128xf32, #tpu.memory_space<vmem>>, %arg2: memref<128x128xf32, #tpu.memory_space<vmem>>, %arg3: memref<1x128xf32, #tpu.memory_space<vmem>>, %arg4: memref<8x128xf32, #tpu.memory_space<vmem>>, %arg5: memref<128x8xf32, #tpu.memory_space<vmem>>, %arg6: memref<8x128xf32, #tpu.memory_space<vmem>>) attributes {dimension_semantics = [], scalar_prefetch = 0 : i64, scratch_operands = 0 : i64, tpu.core_type = #tpu.core_type<tc>} {
    %c0 = arith.constant 0 : index
    %c0_0 = arith.constant 0 : index
    %0 = vector.load %arg0[%c0, %c0_0] : memref<8x40xf32, #tpu.memory_space<vmem>>, vector<8x40xf32>
    %c0_1 = arith.constant 0 : index
    %c0_2 = arith.constant 0 : index
    %1 = vector.load %arg1[%c0_1, %c0_2] : memref<40x128xf32, #tpu.memory_space<vmem>>, vector<40x128xf32>
    %2 = arith.mulf %0, %0 : vector<8x40xf32>
    %cst = arith.constant dense<0.000000e+00> : vector<8xf32>
    %3 = vector.multi_reduction <add>, %2, %cst [1] : vector<8x40xf32> to vector<8xf32>
    %4 = vector.shape_cast %3 : vector<8xf32> to vector<8x1xf32>
    %5 = arith.mulf %1, %1 : vector<40x128xf32>
    %cst_3 = arith.constant dense<0.000000e+00> : vector<128xf32>
    %6 = vector.multi_reduction <add>, %5, %cst_3 [0] : vector<40x128xf32> to vector<128xf32>
    %7 = vector.shape_cast %6 : vector<128xf32> to vector<1x128xf32>
    %8 = vector.broadcast %4 : vector<8x1xf32> to vector<8x128xf32>
    %9 = vector.broadcast %7 : vector<1x128xf32> to vector<8x128xf32>
    %10 = arith.addf %8, %9 : vector<8x128xf32>
    %cst_4 = arith.constant dense<0.000000e+00> : vector<8x128xf32>
    %11 = tpu.matmul %0, %1, %cst_4 {dimension_numbers = #tpu.dot_dimension_numbers<[1], [0], [0], [1], [0, 0, 1, 1], [], []>} : vector<8x40xf32>, vector<40x128xf32>, vector<8x128xf32> -> vector<8x128xf32>
    %cst_5 = arith.constant 2.000000e+00 : f32
    %12 = vector.broadcast %cst_5 : f32 to vector<8x128xf32>
    %13 = arith.mulf %12, %11 : vector<8x128xf32>
    %14 = arith.subf %10, %13 : vector<8x128xf32>
    %c0_6 = arith.constant 0 : index
    %c0_7 = arith.constant 0 : index
    %15 = vector.load %arg4[%c0_6, %c0_7] : memref<8x128xf32, #tpu.memory_space<vmem>>, vector<8x128xf32>
    tpu.vector_store %arg4[%c0_6, %c0_7], %14 {strides = array<i32>} : memref<8x128xf32, #tpu.memory_space<vmem>>, vector<8x128xf32>,
    %16 = tpu.transpose %14, [1, 0] : vector<8x128xf32> -> vector<128x8xf32>
    %c0_8 = arith.constant 0 : index
    %c0_9 = arith.constant 0 : index
    %17 = vector.load %arg5[%c0_8, %c0_9] : memref<128x8xf32, #tpu.memory_space<vmem>>, vector<128x8xf32>
    tpu.vector_store %arg5[%c0_8, %c0_9], %16 {strides = array<i32>} : memref<128x8xf32, #tpu.memory_space<vmem>>, vector<128x8xf32>,
    %c0_10 = arith.constant 0 : index
    %c0_11 = arith.constant 0 : index
    %18 = vector.load %arg2[%c0_10, %c0_11] : memref<128x128xf32, #tpu.memory_space<vmem>>, vector<128x128xf32>
    %cst_12 = arith.constant dense<0.000000e+00> : vector<8x128xf32>
    %19 = tpu.matmul %14, %18, %cst_12 {dimension_numbers = #tpu.dot_dimension_numbers<[1], [0], [0], [1], [0, 0, 1, 1], [], []>} : vector<8x128xf32>, vector<128x128xf32>, vector<8x128xf32> -> vector<8x128xf32>
    %c0_13 = arith.constant 0 : index
    %c0_14 = arith.constant 0 : index
    %20 = vector.load %arg3[%c0_13, %c0_14] : memref<1x128xf32, #tpu.memory_space<vmem>>, vector<1x128xf32>
    %21 = vector.broadcast %20 : vector<1x128xf32> to vector<8x128xf32>
    %22 = arith.addf %19, %21 : vector<8x128xf32>
    %c0_15 = arith.constant 0 : index
    %c0_16 = arith.constant 0 : index
    %23 = vector.load %arg6[%c0_15, %c0_16] : memref<8x128xf32, #tpu.memory_space<vmem>>, vector<8x128xf32>
    tpu.vector_store %arg6[%c0_15, %c0_16], %22 {strides = array<i32>} : memref<8x128xf32, #tpu.memory_space<vmem>>, vector<8x128xf32>,
    return
  }
}

</mosaic_0001>

<bundles_post_ra>
// kernel: nn_prototype_forward.10
= control target key start
LH: loop header
LB: loop body
LE: loop exit
PB: predicated region body
PF: predicated region fallthrough
CT: control target
= control target key end

     0   :  { %v616_v3 = vmov 0.0|0.0   ;;  %vm617_vm0 = vmmov 0   ;;  %v618_v4 = vmov 0.0   ;;  %vm96_vm1 = vcmask 261120   ;;  %s960_s1 = inlined_call_operand.vmem [shape: f32[288,128], index: 1, kind: input, shape index: {}]   ;;  %s961_s0 = inlined_call_operand.vmem [shape: f32[104,288], index: 0, kind: input, shape index: {}]   ;;  %s962_s2 = inlined_call_operand.vmem [shape: f32[1,128], index: 2, kind: input, shape index: {}]   ;;  %s963_s3 = inlined_call_operand.vmem [shape: f32[104,128], index: 3, kind: output, shape index: {}]  }
   0x1   :  { %v69_v0 = vld [vmem:[%s960_s1 + $0x80] sm:$0xff]  ;;  %v70_v1 = vld [vmem:[%s960_s1 + $0x88] sm:$0xff]  ;;  %607 = vmatprep.subr.bf16.mxu1 %v616_v3  ;;  %536 = vmatprep.mubr.msk.f32.mxu1 %vm617_vm0, %v618_v4  ;;  %v71_v7 = vld [vmem:[%s960_s1 + $0x90] sm:$0xff] }
   0x2   :  { %v53_v2 = vld [vmem:[%s960_s1] sm:$0xff]  ;;  %v575_v5 = vpack.c.bf16 %v70_v1, %v69_v0  ;;  %v54_v6 = vld [vmem:[%s960_s1 + $0x8] sm:$0xff]  ;;  %v72_v8 = vld [vmem:[%s960_s1 + $0x98] sm:$0xff] }
   0x3   :  { %v577_v9 = vpack.c.bf16 %v54_v6, %v53_v2  ;;  %v579_v10 = vpack.c.bf16 %v72_v8, %v71_v7  ;;  %v55_v11 = vld [vmem:[%s960_s1 + $0x10] sm:$0xff]  ;;  %v56_v12 = vld [vmem:[%s960_s1 + $0x18] sm:$0xff]  ;;  %v73_v13 = vld [vmem:[%s960_s1 + $0xa0] sm:$0xff] }
   0x4   :  { %576 = vmatprep.subr.bf16.mxu0 %v575_v5  ;;  %v74_v14 = vld [vmem:[%s960_s1 + $0xa8] sm:$0xff]  ;;  %v581_v15 = vpack.c.bf16 %v56_v12, %v55_v11  ;;  %v57_v17 = vld [vmem:[%s960_s1 + $0x20] sm:$0xff]  ;;  %v75_v19 = vld [vmem:[%s960_s1 + $0xb0] sm:$0xff] }
   0x5   :  { %578 = vmatpush3.bf16.msra.mxu0 %v577_v9  ;;  %v583_v16 = vpack.c.bf16 %v74_v14, %v73_v13  ;;  %v58_v18 = vld [vmem:[%s960_s1 + $0x28] sm:$0xff]  ;;  %v76_v20 = vld [vmem:[%s960_s1 + $0xb8] sm:$0xff]  ;;  %v59_v23 = vld [vmem:[%s960_s1 + $0x30] sm:$0xff] }
   0x6   :  { %580 = vmatprep.subr.bf16.mxu0 %v579_v10  ;;  %v585_v21 = vpack.c.bf16 %v58_v18, %v57_v17  ;;  %v587_v22 = vpack.c.bf16 %v76_v20, %v75_v19  ;;  %v60_v24 = vld [vmem:[%s960_s1 + $0x38] sm:$0xff]  ;;  %v77_v25 = vld [vmem:[%s960_s1 + $0xc0] sm:$0xff]  ;;  %v78_v26 = vld [vmem:[%s960_s1 + $0xc8] sm:$0xff] }
   0x7   :  { %v85_v27 = vld [vmem:[%s960_s1 + $0x100] sm:$0xff]  ;;  %v86_v28 = vld [vmem:[%s960_s1 + $0x108] sm:$0xff]  ;;  %v589_v30 = vpack.c.bf16 %v60_v24, %v59_v23  ;;  %v87_v32 = vld [vmem:[%s960_s1 + $0x110] sm:$0xff]  ;;  %v591_v34 = vpack.c.bf16 %v78_v26, %v77_v25 }
   0x8   :  { %v15_v29 = vld [vmem:[%s961_s0 + $0x8] sm:$0xff]  ;;  %v608_v31 = vpack.c.bf16 %v86_v28, %v85_v27  ;;  %v88_v33 = vld [vmem:[%s960_s1 + $0x118] sm:$0xff]  ;;  %v61_v35 = vld [vmem:[%s960_s1 + $0x40] sm:$0xff] }
   0x9   :  { %582 = vmatpush3.bf16.msra.mxu0 %v581_v15  ;;  %200 = vmatprep.mubr.f32.mxu0 %v15_v29  ;;  %v62_v36 = vld [vmem:[%s960_s1 + $0x48] sm:$0xff]  ;;  %v79_v37 = vld [vmem:[%s960_s1 + $0xd0] sm:$0xff]  ;;  %v80_v38 = vld [vmem:[%s960_s1 + $0xd8] sm:$0xff]  ;;  %v611_v39 = vpack.c.bf16 %v88_v33, %v87_v32 }
   0xa   :  { %584 = vmatprep.subr.bf16.mxu0 %v583_v16  ;;  %609 = vmatpush3.bf16.msra.mxu1 %v608_v31  ;;  %v593_v40 = vpack.c.bf16 %v62_v36, %v61_v35  ;;  %v595_v41 = vpack.c.bf16 %v80_v38, %v79_v37  ;;  %v63_v42 = vld [vmem:[%s960_s1 + $0x50] sm:$0xff]  ;;  %v64_v43 = vld [vmem:[%s960_s1 + $0x58] sm:$0xff]  ;;  %v81_v44 = vld [vmem:[%s960_s1 + $0xe0] sm:$0xff] }
   0xb   :  { %610 = vmatprep.subr.bf16.mxu1 %v616_v3  ;;  %v82_v45 = vld [vmem:[%s960_s1 + $0xe8] sm:$0xff]  ;;  %v16_v46 = vld [vmem:[%s961_s0 + $0x10] sm:$0xff]  ;;  %v597_v47 = vpack.c.bf16 %v64_v43, %v63_v42  ;;  %v65_v49 = vld [vmem:[%s960_s1 + $0x60] sm:$0xff] }
   0xc   :  { %v599_v48 = vpack.c.bf16 %v82_v45, %v81_v44  ;;  %v66_v50 = vld [vmem:[%s960_s1 + $0x68] sm:$0xff]  ;;  %v83_v51 = vld [vmem:[%s960_s1 + $0xf0] sm:$0xff]  ;;  %v84_v52 = vld [vmem:[%s960_s1 + $0xf8] sm:$0xff] }
   0xd   :  { %586 = vmatpush3.bf16.msra.mxu0 %v585_v21  ;;  %v19_v53 = vld [vmem:[%s961_s0 + $0x28] sm:$0xff]  ;;  %v601_v54 = vpack.c.bf16 %v66_v50, %v65_v49  ;;  %v603_v55 = vpack.c.bf16 %v84_v52, %v83_v51  ;;  %v67_v56 = vld [vmem:[%s960_s1 + $0x70] sm:$0xff]  ;;  %v68_v57 = vld [vmem:[%s960_s1 + $0x78] sm:$0xff] }
   0xe   :  { %588 = vmatprep.subr.bf16.mxu0 %v587_v22  ;;  %612 = vmatpush3.bf16.msra.mxu1 %v611_v39  ;;  %v22_v58 = vld [vmem:[%s961_s0 + $0x40] sm:$0xff]  ;;  %v605_v59 = vpack.c.bf16 %v68_v57, %v67_v56  ;;  %v25_v60 = vld [vmem:[%s961_s0 + $0x58] sm:$0xff]  ;;  %v28_v63 = vld [vmem:[%s961_s0 + $0x70] sm:$0xff] }
   0xf   :  { %v14_v61 = vld [vmem:[%s961_s0] sm:$0xff]  ;;  %v17_v0 = vld [vmem:[%s961_s0 + $0x18] sm:$0xff]  ;;  %v31_v2 = vld [vmem:[%s961_s0 + $0x88] sm:$0xff] }
  0x10   :  { %v18_v62 = vld [vmem:[%s961_s0 + $0x20] sm:$0xff]  ;;  %v21_v1 = vld [vmem:[%s961_s0 + $0x38] sm:$0xff]  ;;  %v20_v3 = vld [vmem:[%s961_s0 + $0x30] sm:$0xff] }
  0x11   :  { %590 = vmatpush3.bf16.msra.mxu0 %v589_v30  ;;  %537 = vmatmul.mubr.msk.f32.vlgmr.msra.gmra.mrb[0].mxu1 %vm96_vm1, %v16_v46  ;;  %v24_v5 = vld [vmem:[%s961_s0 + $0x50] sm:$0xff]  ;;  %v34_v6 = vld [vmem:[%s961_s0 + $0xa0] sm:$0xff]  ;;  %v23_v7 = vld [vmem:[%s961_s0 + $0x48] sm:$0xff] }
  0x12   :  { %592 = vmatprep.subr.bf16.mxu0 %v591_v34  ;;  %539 = vmatprep.mubr.msk.f32.mxu1 %vm617_vm0, %v618_v4  ;;  %v27_v8 = vld [vmem:[%s961_s0 + $0x68] sm:$0xff]  ;;  %v37_v9 = vld [vmem:[%s961_s0 + $0xb8] sm:$0xff]  ;;  %v26_v10 = vld [vmem:[%s961_s0 + $0x60] sm:$0xff] }
  0x13   :  { %v30_v11 = vld [vmem:[%s961_s0 + $0x80] sm:$0xff]  ;;  %v40_v12 = vld [vmem:[%s961_s0 + $0xd0] sm:$0xff]  ;;  %v29_v13 = vld [vmem:[%s961_s0 + $0x78] sm:$0xff] }
  0x14   :  { %v33_v14 = vld [vmem:[%s961_s0 + $0x98] sm:$0xff]  ;;  %v43_v15 = vld [vmem:[%s961_s0 + $0xe8] sm:$0xff]  ;;  %v32_v16 = vld [vmem:[%s961_s0 + $0x90] sm:$0xff] }
  0x15   :  { %594 = vmatpush3.bf16.msra.mxu0 %v593_v40  ;;  %540 = vmatmul.mubr.msk.f32.gmra.mrb[2].mxu1 %vm96_vm1, %v19_v53  ;;  %v36_v17 = vld [vmem:[%s961_s0 + $0xb0] sm:$0xff]  ;;  %v46_v18 = vld [vmem:[%s961_s0 + $0x100] sm:$0xff]  ;;  %v35_v19 = vld [vmem:[%s961_s0 + $0xa8] sm:$0xff] }
  0x16   :  { %596 = vmatprep.subr.bf16.mxu0 %v595_v41  ;;  %542 = vmatprep.mubr.msk.f32.mxu1 %vm617_vm0, %v618_v4  ;;  %v39_v20 = vld [vmem:[%s961_s0 + $0xc8] sm:$0xff]  ;;  %v49_v21 = vld [vmem:[%s961_s0 + $0x118] sm:$0xff]  ;;  %v38_v22 = vld [vmem:[%s961_s0 + $0xc0] sm:$0xff] }
  0x17   :  { %v42_v23 = vld [vmem:[%s961_s0 + $0xe0] sm:$0xff]  ;;  %v52_v24 = vld [vmem:[%s961_s0 + $0x130] sm:$0xff]  ;;  %v41_v25 = vld [vmem:[%s961_s0 + $0xd8] sm:$0xff] }
  0x18   :  { %v45_v26 = vld [vmem:[%s961_s0 + $0xf8] sm:$0xff]  ;;  %v48_v27 = vld [vmem:[%s961_s0 + $0x110] sm:$0xff]  ;;  %v47_v28 = vld [vmem:[%s961_s0 + $0x108] sm:$0xff] }
  0x19   :  { %598 = vmatpush3.bf16.msra.mxu0 %v597_v47  ;;  %543 = vmatmul.mubr.msk.f32.gmra.mrb[4].mxu1 %vm96_vm1, %v22_v58  ;;  %v51_v29 = vld [vmem:[%s961_s0 + $0x128] sm:$0xff]  ;;  %v50_v30 = vld [vmem:[%s961_s0 + $0x120] sm:$0xff] }
  0x1a   :  { %600 = vmatprep.subr.bf16.mxu0 %v599_v48  ;;  %545 = vmatprep.mubr.msk.f32.mxu1 %vm617_vm0, %v618_v4  ;;  %v906_v41 = vld [vmem:[%s962_s2] ss:$0 sm:$0xff] }
  0x1d   :  { %602 = vmatpush3.bf16.msra.mxu0 %v601_v54  ;;  %546 = vmatmul.mubr.msk.f32.gmra.mrb[6].mxu1 %vm96_vm1, %v25_v60 }
  0x1e   :  { %604 = vmatprep.subr.bf16.mxu0 %v603_v55  ;;  %548 = vmatprep.mubr.msk.f32.mxu1 %vm617_vm0, %v618_v4 }
  0x21   :  { %606 = vmatpush3.bf16.msra.mxu0 %v605_v59  ;;  %549 = vmatmul.mubr.msk.f32.gmra.mrb[8].mxu1 %vm96_vm1, %v28_v63 }
  0x22   :  { %551 = vmatprep.mubr.msk.f32.mxu1 %vm617_vm0, %v618_v4 }
  0x24   :  { %201 = vmatmul.mubr.f32.vlgmr.msra.gmra.mrb[0].mxu0 %v14_v61 }
  0x25   :  { %205 = vmatprep.mubr.f32.mxu0 %v18_v62  ;;  %552 = vmatmul.mubr.msk.f32.gmra.mrb[10].mxu1 %vm96_vm1, %v31_v2 }
  0x26   :  { %554 = vmatprep.mubr.msk.f32.mxu1 %vm617_vm0, %v618_v4 }
  0x28   :  { %206 = vmatmul.mubr.f32.gmra.mrb[2].mxu0 %v17_v0 }
  0x29   :  { %210 = vmatprep.mubr.f32.mxu0 %v21_v1  ;;  %555 = vmatmul.mubr.msk.f32.gmra.mrb[12].mxu1 %vm96_vm1, %v34_v6 }
  0x2a   :  { %557 = vmatprep.mubr.msk.f32.mxu1 %vm617_vm0, %v618_v4 }
  0x2c   :  { %211 = vmatmul.mubr.f32.gmra.mrb[4].mxu0 %v20_v3 }
  0x2d   :  { %215 = vmatprep.mubr.f32.mxu0 %v24_v5  ;;  %558 = vmatmul.mubr.msk.f32.gmra.mrb[14].mxu1 %vm96_vm1, %v37_v9 }
  0x2e   :  { %560 = vmatprep.mubr.msk.f32.mxu1 %vm617_vm0, %v618_v4 }
  0x30   :  { %216 = vmatmul.mubr.f32.gmra.mrb[6].mxu0 %v23_v7 }
  0x31   :  { %220 = vmatprep.mubr.f32.mxu0 %v27_v8  ;;  %561 = vmatmul.mubr.msk.f32.gmra.mrb[16].mxu1 %vm96_vm1, %v40_v12 }
  0x32   :  { %563 = vmatprep.mubr.msk.f32.mxu1 %vm617_vm0, %v618_v4 }
  0x34   :  { %221 = vmatmul.mubr.f32.gmra.mrb[8].mxu0 %v26_v10 }
  0x35   :  { %225 = vmatprep.mubr.f32.mxu0 %v30_v11  ;;  %564 = vmatmul.mubr.msk.f32.gmra.mrb[18].mxu1 %vm96_vm1, %v43_v15 }
  0x36   :  { %566 = vmatprep.mubr.msk.f32.mxu1 %vm617_vm0, %v618_v4 }
  0x38   :  { %226 = vmatmul.mubr.f32.gmra.mrb[10].mxu0 %v29_v13 }
  0x39   :  { %230 = vmatprep.mubr.f32.mxu0 %v33_v14  ;;  %567 = vmatmul.mubr.msk.f32.gmra.mrb[20].mxu1 %vm96_vm1, %v46_v18 }
  0x3a   :  { %569 = vmatprep.mubr.msk.f32.mxu1 %vm617_vm0, %v618_v4 }
  0x3c   :  { %231 = vmatmul.mubr.f32.gmra.mrb[12].mxu0 %v32_v16 }
  0x3d   :  { %235 = vmatprep.mubr.f32.mxu0 %v36_v17  ;;  %570 = vmatmul.mubr.msk.f32.gmra.mrb[22].mxu1 %vm96_vm1, %v49_v21 }
  0x3e   :  { %572 = vmatprep.mubr.msk.f32.mxu1 %vm617_vm0, %v618_v4  ;;  %v44_v4 = vld [vmem:[%s961_s0 + $0xf0] sm:$0xff] }
  0x40   :  { %236 = vmatmul.mubr.f32.gmra.mrb[14].mxu0 %v35_v19 }
  0x41   :  { %240 = vmatprep.mubr.f32.mxu0 %v39_v20  ;;  %573 = vmatmul.mubr.msk.f32.gmra.mrb[24].mxu1 %vm96_vm1, %v52_v24 }
  0x44   :  { %241 = vmatmul.mubr.f32.gmra.mrb[16].mxu0 %v38_v22 }
  0x45   :  { %245 = vmatprep.mubr.f32.mxu0 %v42_v23 }
  0x48   :  { %246 = vmatmul.mubr.f32.gmra.mrb[18].mxu0 %v41_v25 }
  0x49   :  { %250 = vmatprep.mubr.f32.mxu0 %v45_v26 }
  0x4c   :  { %251 = vmatmul.mubr.f32.gmra.mrb[20].mxu0 %v44_v4 }
  0x4d   :  { %255 = vmatprep.mubr.f32.mxu0 %v48_v27 }
  0x50   :  { %256 = vmatmul.mubr.f32.gmra.mrb[22].mxu0 %v47_v28 }
  0x51   :  { %260 = vmatprep.mubr.f32.mxu0 %v51_v29 }
  0x54   :  { %261 = vmatmul.mubr.f32.gmra.mrb[24].mxu0 %v50_v30 }
  0xe4   :  { %v332_v31 = vpop.f32.mrb[0].mxu1 }
  0xe5   :  { %v538_v32 = vpop.f32.mrb[1].mxu1 }
  0xe8   :  { %v337_v33 = vpop.f32.mrb[2].mxu1 }
  0xe9   :  { %v541_v34 = vpop.f32.mrb[3].mxu1 }
  0xec   :  { %v342_v35 = vpop.f32.mrb[4].mxu1 }
  0xed   :  { %v544_v36 = vpop.f32.mrb[5].mxu1 }
  0xf0   :  { %v347_v37 = vpop.f32.mrb[6].mxu1 }
  0xf1   :  { %v547_v38 = vpop.f32.mrb[7].mxu1 }
  0xf4   :  { %v352_v43 = vpop.f32.mrb[8].mxu1 }
  0xf5   :  { %v550_v44 = vpop.f32.mrb[9].mxu1 }
  0xf7   :  { %v472_v39 = vpop.f32.mrb[0].mxu0 }
  0xf8   :  { %v473_v40 = vpop.f32.mrb[1].mxu0  ;;  %v357_v50 = vpop.f32.mrb[10].mxu1 }
  0xf9   :  { %v474_v42 = vadd.f32 %v473_v40, %v472_v39  ;;  %v553_v51 = vpop.f32.mrb[11].mxu1 }
  0xfb   :  { %v475_v45 = vpop.f32.mrb[2].mxu0  ;;  %v203_v46 = vadd.f32 %v474_v42, %v906_v41 }
  0xfc   :  { %v476_v47 = vpop.f32.mrb[3].mxu0  ;;  %v362_v58 = vpop.f32.mrb[12].mxu1 }
  0xfd   :  { %v333_v48 = vadd.f32 %v332_v31, %v203_v46  ;;  %v477_v49 = vadd.f32 %v476_v47, %v475_v45  ;;  %v556_v59 = vpop.f32.mrb[13].mxu1 }
  0xff   :  { %v396_v52 = vmax.f32 %v333_v48, 0.0  ;;  %v478_v53 = vpop.f32.mrb[4].mxu0  ;;  %v208_v54 = vadd.f32 %v477_v49, %v906_v41 }
 0x100   :  { %v479_v55 = vpop.f32.mrb[5].mxu0  ;;  %v367_v2 = vpop.f32.mrb[14].mxu1 }
 0x101   :  { %409 = vst [vmem:[%s963_s3] sm:$0xff] %v396_v52  ;;  %v338_v56 = vadd.f32 %v337_v33, %v208_v54  ;;  %v480_v57 = vadd.f32 %v479_v55, %v478_v53  ;;  %v559_v3 = vpop.f32.mrb[15].mxu1 }
 0x103   :  { %v397_v60 = vmax.f32 %v338_v56, 0.0  ;;  %v481_v61 = vpop.f32.mrb[6].mxu0  ;;  %v213_v62 = vadd.f32 %v480_v57, %v906_v41 }
 0x104   :  { %v482_v63 = vpop.f32.mrb[7].mxu0  ;;  %v372_v11 = vpop.f32.mrb[16].mxu1 }
 0x105   :  { %410 = vst [vmem:[%s963_s3 + $0x8] sm:$0xff] %v397_v60  ;;  %v343_v0 = vadd.f32 %v342_v35, %v213_v62  ;;  %v483_v1 = vadd.f32 %v482_v63, %v481_v61  ;;  %v562_v12 = vpop.f32.mrb[17].mxu1 }
 0x107   :  { %v398_v5 = vmax.f32 %v343_v0, 0.0  ;;  %v484_v6 = vpop.f32.mrb[8].mxu0  ;;  %v218_v7 = vadd.f32 %v483_v1, %v906_v41 }
 0x108   :  { %v485_v8 = vpop.f32.mrb[9].mxu0  ;;  %v377_v19 = vpop.f32.mrb[18].mxu1 }
 0x109   :  { %411 = vst [vmem:[%s963_s3 + $0x10] sm:$0xff] %v398_v5  ;;  %v348_v9 = vadd.f32 %v347_v37, %v218_v7  ;;  %v486_v10 = vadd.f32 %v485_v8, %v484_v6  ;;  %v565_v20 = vpop.f32.mrb[19].mxu1 }
 0x10b   :  { %v399_v13 = vmax.f32 %v348_v9, 0.0  ;;  %v487_v14 = vpop.f32.mrb[10].mxu0  ;;  %v223_v15 = vadd.f32 %v486_v10, %v906_v41 }
 0x10c   :  { %v488_v16 = vpop.f32.mrb[11].mxu0  ;;  %v382_v4 = vpop.f32.mrb[20].mxu1 }
 0x10d   :  { %412 = vst [vmem:[%s963_s3 + $0x18] sm:$0xff] %v399_v13  ;;  %v353_v17 = vadd.f32 %v352_v43, %v223_v15  ;;  %v489_v18 = vadd.f32 %v488_v16, %v487_v14  ;;  %v568_v27 = vpop.f32.mrb[21].mxu1 }
 0x10f   :  { %v400_v21 = vmax.f32 %v353_v17, 0.0  ;;  %v490_v22 = vpop.f32.mrb[12].mxu0  ;;  %v228_v23 = vadd.f32 %v489_v18, %v906_v41 }
 0x110   :  { %v491_v24 = vpop.f32.mrb[13].mxu0  ;;  %v387_v34 = vpop.f32.mrb[22].mxu1 }
 0x111   :  { %413 = vst [vmem:[%s963_s3 + $0x20] sm:$0xff] %v400_v21  ;;  %v358_v25 = vadd.f32 %v357_v50, %v228_v23  ;;  %v492_v26 = vadd.f32 %v491_v24, %v490_v22  ;;  %v571_v35 = vpop.f32.mrb[23].mxu1 }
 0x113   :  { %v401_v28 = vmax.f32 %v358_v25, 0.0  ;;  %v493_v29 = vpop.f32.mrb[14].mxu0  ;;  %v233_v30 = vadd.f32 %v492_v26, %v906_v41 }
 0x114   :  { %v494_v31 = vpop.f32.mrb[15].mxu0  ;;  %v392_v43 = vpop.f32.mrb[24].mxu1 }
 0x115   :  { %414 = vst [vmem:[%s963_s3 + $0x28] sm:$0xff] %v401_v28  ;;  %v363_v32 = vadd.f32 %v362_v58, %v233_v30  ;;  %v495_v33 = vadd.f32 %v494_v31, %v493_v29  ;;  %v574_v44 = vpop.f32.mrb[25].mxu1 }
 0x117   :  { %v402_v36 = vmax.f32 %v363_v32, 0.0  ;;  %v496_v37 = vpop.f32.mrb[16].mxu0  ;;  %v238_v38 = vadd.f32 %v495_v33, %v906_v41 }
 0x118   :  { %v497_v39 = vpop.f32.mrb[17].mxu0 }
 0x119   :  { %415 = vst [vmem:[%s963_s3 + $0x30] sm:$0xff] %v402_v36  ;;  %v368_v40 = vadd.f32 %v367_v2, %v238_v38  ;;  %v498_v42 = vadd.f32 %v497_v39, %v496_v37 }
 0x11b   :  { %v403_v45 = vmax.f32 %v368_v40, 0.0  ;;  %v499_v46 = vpop.f32.mrb[18].mxu0  ;;  %v243_v47 = vadd.f32 %v498_v42, %v906_v41 }
 0x11c   :  { %v500_v48 = vpop.f32.mrb[19].mxu0 }
 0x11d   :  { %416 = vst [vmem:[%s963_s3 + $0x38] sm:$0xff] %v403_v45  ;;  %v373_v49 = vadd.f32 %v372_v11, %v243_v47  ;;  %v501_v50 = vadd.f32 %v500_v48, %v499_v46 }
 0x11f   :  { %v404_v51 = vmax.f32 %v373_v49, 0.0  ;;  %v502_v52 = vpop.f32.mrb[20].mxu0  ;;  %v248_v53 = vadd.f32 %v501_v50, %v906_v41 }
 0x120   :  { %v503_v54 = vpop.f32.mrb[21].mxu0 }
 0x121   :  { %417 = vst [vmem:[%s963_s3 + $0x40] sm:$0xff] %v404_v51  ;;  %v378_v55 = vadd.f32 %v377_v19, %v248_v53  ;;  %v504_v56 = vadd.f32 %v503_v54, %v502_v52 }
 0x123   :  { %v405_v57 = vmax.f32 %v378_v55, 0.0  ;;  %v505_v58 = vpop.f32.mrb[22].mxu0  ;;  %v253_v59 = vadd.f32 %v504_v56, %v906_v41 }
 0x124   :  { %v506_v60 = vpop.f32.mrb[23].mxu0 }
 0x125   :  { %418 = vst [vmem:[%s963_s3 + $0x48] sm:$0xff] %v405_v57  ;;  %v383_v61 = vadd.f32 %v382_v4, %v253_v59  ;;  %v507_v62 = vadd.f32 %v506_v60, %v505_v58 }
 0x127   :  { %v406_v63 = vmax.f32 %v383_v61, 0.0  ;;  %v508_v0 = vpop.f32.mrb[24].mxu0  ;;  %v258_v1 = vadd.f32 %v507_v62, %v906_v41 }
 0x128   :  { %v509_v2 = vpop.f32.mrb[25].mxu0 }
 0x129   :  { %419 = vst [vmem:[%s963_s3 + $0x50] sm:$0xff] %v406_v63  ;;  %v388_v3 = vadd.f32 %v387_v34, %v258_v1  ;;  %v510_v5 = vadd.f32 %v509_v2, %v508_v0 }
 0x12b   :  { %v407_v6 = vmax.f32 %v388_v3, 0.0  ;;  %v263_v7 = vadd.f32 %v510_v5, %v906_v41 }
 0x12d   :  { %420 = vst [vmem:[%s963_s3 + $0x58] sm:$0xff] %v407_v6  ;;  %v393_v8 = vadd.f32 %v392_v43, %v263_v7 }
 0x12f   :  { %v408_v9 = vmax.f32 %v393_v8, 0.0 }
 0x131   :  { %421 = vst [vmem:[%s963_s3 + $0x60] sm:$0xff] %v408_v9 }

// kernel: nn_prototype_forward.9
= control target key start
LH: loop header
LB: loop body
LE: loop exit
PB: predicated region body
PF: predicated region fallthrough
CT: control target
= control target key end

     0   :  { %v892_v0 = vmov 0.0|0.0   ;;  %vm893_vm0 = vmmov 0   ;;  %v894_v4 = vmov 0.0   ;;  %vm72_vm1 = vcmask 130048   ;;  %s1416_s1 = inlined_call_operand.vmem [shape: f32[16,128], index: 1, kind: input, shape index: {}]   ;;  %s1417_s0 = inlined_call_operand.vmem [shape: f32[392,16], index: 0, kind: input, shape index: {}]   ;;  %s1418_s2 = inlined_call_operand.vmem [shape: f32[1,128], index: 2, kind: input, shape index: {}]   ;;  %s1419_s3 = inlined_call_operand.vmem [shape: f32[392,128], index: 3, kind: output, shape index: {}]  }
   0x1   :  { %884 = vmatprep.subr.bf16.mxu0 %v892_v0  ;;  %v63_v1 = vld [vmem:[%s1416_s1] sm:$0xff]  ;;  %v64_v2 = vld [vmem:[%s1416_s1 + $0x8] sm:$0xff]  ;;  %887 = vmatprep.subr.bf16.mxu1 %v892_v0  ;;  %v40_v8 = vld [vmem:[%s1417_s0 + $0xd0] sm:$0xff] }
   0x2   :  { %v885_v3 = vpack.c.bf16 %v64_v2, %v63_v1  ;;  %737 = vmatprep.mubr.msk.f32.mxu0 %vm893_vm0, %v894_v4  ;;  %812 = vmatprep.mubr.msk.f32.mxu1 %vm893_vm0, %v894_v4  ;;  %v14_v5 = vld [vmem:[%s1417_s0] sm:$0xff]  ;;  %v39_v6 = vld [vmem:[%s1417_s0 + $0xc8] sm:$0xff]  ;;  %v16_v9 = vld [vmem:[%s1417_s0 + $0x10] sm:$0xff] }
   0x3   :  { %v15_v7 = vld [vmem:[%s1417_s0 + $0x8] sm:$0xff]  ;;  %v41_v10 = vld [vmem:[%s1417_s0 + $0xd8] sm:$0xff]  ;;  %v42_v12 = vld [vmem:[%s1417_s0 + $0xe0] sm:$0xff] }
   0x4   :  { %886 = vmatpush3.bf16.msra.mxu0 %v885_v3  ;;  %888 = vmatpush3.bf16.msra.mxu1 %v885_v3  ;;  %v17_v11 = vld [vmem:[%s1417_s0 + $0x18] sm:$0xff]  ;;  %v18_v13 = vld [vmem:[%s1417_s0 + $0x20] sm:$0xff]  ;;  %v43_v14 = vld [vmem:[%s1417_s0 + $0xe8] sm:$0xff] }
   0x5   :  { %v19_v15 = vld [vmem:[%s1417_s0 + $0x28] sm:$0xff]  ;;  %v44_v16 = vld [vmem:[%s1417_s0 + $0xf0] sm:$0xff]  ;;  %v45_v18 = vld [vmem:[%s1417_s0 + $0xf8] sm:$0xff] }
   0x6   :  { %v20_v17 = vld [vmem:[%s1417_s0 + $0x30] sm:$0xff]  ;;  %v21_v19 = vld [vmem:[%s1417_s0 + $0x38] sm:$0xff]  ;;  %v46_v20 = vld [vmem:[%s1417_s0 + $0x100] sm:$0xff] }
   0x7   :  { %738 = vmatmul.mubr.msk.f32.vlgmr.msra.gmra.mrb[0].mxu0 %vm72_vm1, %v14_v5  ;;  %813 = vmatmul.mubr.msk.f32.vlgmr.msra.gmra.mrb[0].mxu1 %vm72_vm1, %v39_v6  ;;  %v22_v21 = vld [vmem:[%s1417_s0 + $0x40] sm:$0xff]  ;;  %v47_v22 = vld [vmem:[%s1417_s0 + $0x108] sm:$0xff]  ;;  %v48_v24 = vld [vmem:[%s1417_s0 + $0x110] sm:$0xff] }
   0x8   :  { %740 = vmatprep.mubr.msk.f32.mxu0 %vm893_vm0, %v894_v4  ;;  %815 = vmatprep.mubr.msk.f32.mxu1 %vm893_vm0, %v894_v4  ;;  %v23_v23 = vld [vmem:[%s1417_s0 + $0x48] sm:$0xff]  ;;  %v24_v25 = vld [vmem:[%s1417_s0 + $0x50] sm:$0xff]  ;;  %v49_v26 = vld [vmem:[%s1417_s0 + $0x118] sm:$0xff] }
   0x9   :  { %v25_v27 = vld [vmem:[%s1417_s0 + $0x58] sm:$0xff]  ;;  %v50_v28 = vld [vmem:[%s1417_s0 + $0x120] sm:$0xff]  ;;  %v51_v30 = vld [vmem:[%s1417_s0 + $0x128] sm:$0xff] }
   0xa   :  { %v26_v29 = vld [vmem:[%s1417_s0 + $0x60] sm:$0xff]  ;;  %v27_v31 = vld [vmem:[%s1417_s0 + $0x68] sm:$0xff]  ;;  %v52_v32 = vld [vmem:[%s1417_s0 + $0x130] sm:$0xff] }
   0xb   :  { %741 = vmatmul.mubr.msk.f32.gmra.mrb[2].mxu0 %vm72_vm1, %v15_v7  ;;  %816 = vmatmul.mubr.msk.f32.gmra.mrb[2].mxu1 %vm72_vm1, %v40_v8  ;;  %v28_v33 = vld [vmem:[%s1417_s0 + $0x70] sm:$0xff]  ;;  %v53_v34 = vld [vmem:[%s1417_s0 + $0x138] sm:$0xff]  ;;  %v54_v36 = vld [vmem:[%s1417_s0 + $0x140] sm:$0xff] }
   0xc   :  { %743 = vmatprep.mubr.msk.f32.mxu0 %vm893_vm0, %v894_v4  ;;  %818 = vmatprep.mubr.msk.f32.mxu1 %vm893_vm0, %v894_v4  ;;  %v29_v35 = vld [vmem:[%s1417_s0 + $0x78] sm:$0xff]  ;;  %v30_v37 = vld [vmem:[%s1417_s0 + $0x80] sm:$0xff]  ;;  %v55_v38 = vld [vmem:[%s1417_s0 + $0x148] sm:$0xff] }
   0xd   :  { %v31_v39 = vld [vmem:[%s1417_s0 + $0x88] sm:$0xff]  ;;  %v56_v40 = vld [vmem:[%s1417_s0 + $0x150] sm:$0xff]  ;;  %v57_v42 = vld [vmem:[%s1417_s0 + $0x158] sm:$0xff] }
   0xe   :  { %v32_v41 = vld [vmem:[%s1417_s0 + $0x90] sm:$0xff]  ;;  %v33_v43 = vld [vmem:[%s1417_s0 + $0x98] sm:$0xff]  ;;  %v58_v44 = vld [vmem:[%s1417_s0 + $0x160] sm:$0xff] }
   0xf   :  { %744 = vmatmul.mubr.msk.f32.gmra.mrb[4].mxu0 %vm72_vm1, %v16_v9  ;;  %819 = vmatmul.mubr.msk.f32.gmra.mrb[4].mxu1 %vm72_vm1, %v41_v10  ;;  %v34_v45 = vld [vmem:[%s1417_s0 + $0xa0] sm:$0xff]  ;;  %v59_v46 = vld [vmem:[%s1417_s0 + $0x168] sm:$0xff]  ;;  %v60_v48 = vld [vmem:[%s1417_s0 + $0x170] sm:$0xff] }
  0x10   :  { %746 = vmatprep.mubr.msk.f32.mxu0 %vm893_vm0, %v894_v4  ;;  %821 = vmatprep.mubr.msk.f32.mxu1 %vm893_vm0, %v894_v4  ;;  %v35_v47 = vld [vmem:[%s1417_s0 + $0xa8] sm:$0xff]  ;;  %v36_v49 = vld [vmem:[%s1417_s0 + $0xb0] sm:$0xff]  ;;  %v61_v50 = vld [vmem:[%s1417_s0 + $0x178] sm:$0xff] }
  0x11   :  { %v37_v51 = vld [vmem:[%s1417_s0 + $0xb8] sm:$0xff]  ;;  %v62_v52 = vld [vmem:[%s1417_s0 + $0x180] sm:$0xff] }
  0x12   :  { %v38_v53 = vld [vmem:[%s1417_s0 + $0xc0] sm:$0xff] }
  0x13   :  { %747 = vmatmul.mubr.msk.f32.gmra.mrb[6].mxu0 %vm72_vm1, %v17_v11  ;;  %822 = vmatmul.mubr.msk.f32.gmra.mrb[6].mxu1 %vm72_vm1, %v42_v12  ;;  %v1218_v54 = vld [vmem:[%s1418_s2] ss:$0 sm:$0xff] }
  0x14   :  { %749 = vmatprep.mubr.msk.f32.mxu0 %vm893_vm0, %v894_v4  ;;  %824 = vmatprep.mubr.msk.f32.mxu1 %vm893_vm0, %v894_v4 }
  0x17   :  { %750 = vmatmul.mubr.msk.f32.gmra.mrb[8].mxu0 %vm72_vm1, %v18_v13  ;;  %825 = vmatmul.mubr.msk.f32.gmra.mrb[8].mxu1 %vm72_vm1, %v43_v14 }
  0x18   :  { %752 = vmatprep.mubr.msk.f32.mxu0 %vm893_vm0, %v894_v4  ;;  %827 = vmatprep.mubr.msk.f32.mxu1 %vm893_vm0, %v894_v4 }
  0x1b   :  { %753 = vmatmul.mubr.msk.f32.gmra.mrb[10].mxu0 %vm72_vm1, %v19_v15  ;;  %828 = vmatmul.mubr.msk.f32.gmra.mrb[10].mxu1 %vm72_vm1, %v44_v16 }
  0x1c   :  { %755 = vmatprep.mubr.msk.f32.mxu0 %vm893_vm0, %v894_v4  ;;  %830 = vmatprep.mubr.msk.f32.mxu1 %vm893_vm0, %v894_v4 }
  0x1f   :  { %756 = vmatmul.mubr.msk.f32.gmra.mrb[12].mxu0 %vm72_vm1, %v20_v17  ;;  %831 = vmatmul.mubr.msk.f32.gmra.mrb[12].mxu1 %vm72_vm1, %v45_v18 }
  0x20   :  { %758 = vmatprep.mubr.msk.f32.mxu0 %vm893_vm0, %v894_v4  ;;  %833 = vmatprep.mubr.msk.f32.mxu1 %vm893_vm0, %v894_v4 }
  0x23   :  { %759 = vmatmul.mubr.msk.f32.gmra.mrb[14].mxu0 %vm72_vm1, %v21_v19  ;;  %834 = vmatmul.mubr.msk.f32.gmra.mrb[14].mxu1 %vm72_vm1, %v46_v20 }
  0x24   :  { %761 = vmatprep.mubr.msk.f32.mxu0 %vm893_vm0, %v894_v4  ;;  %836 = vmatprep.mubr.msk.f32.mxu1 %vm893_vm0, %v894_v4 }
  0x27   :  { %762 = vmatmul.mubr.msk.f32.gmra.mrb[16].mxu0 %vm72_vm1, %v22_v21  ;;  %837 = vmatmul.mubr.msk.f32.gmra.mrb[16].mxu1 %vm72_vm1, %v47_v22 }
  0x28   :  { %764 = vmatprep.mubr.msk.f32.mxu0 %vm893_vm0, %v894_v4  ;;  %839 = vmatprep.mubr.msk.f32.mxu1 %vm893_vm0, %v894_v4 }
  0x2b   :  { %765 = vmatmul.mubr.msk.f32.gmra.mrb[18].mxu0 %vm72_vm1, %v23_v23  ;;  %840 = vmatmul.mubr.msk.f32.gmra.mrb[18].mxu1 %vm72_vm1, %v48_v24 }
  0x2c   :  { %767 = vmatprep.mubr.msk.f32.mxu0 %vm893_vm0, %v894_v4  ;;  %842 = vmatprep.mubr.msk.f32.mxu1 %vm893_vm0, %v894_v4 }
  0x2f   :  { %768 = vmatmul.mubr.msk.f32.gmra.mrb[20].mxu0 %vm72_vm1, %v24_v25  ;;  %843 = vmatmul.mubr.msk.f32.gmra.mrb[20].mxu1 %vm72_vm1, %v49_v26 }
  0x30   :  { %770 = vmatprep.mubr.msk.f32.mxu0 %vm893_vm0, %v894_v4  ;;  %845 = vmatprep.mubr.msk.f32.mxu1 %vm893_vm0, %v894_v4 }
  0x33   :  { %771 = vmatmul.mubr.msk.f32.gmra.mrb[22].mxu0 %vm72_vm1, %v25_v27  ;;  %846 = vmatmul.mubr.msk.f32.gmra.mrb[22].mxu1 %vm72_vm1, %v50_v28 }
  0x34   :  { %773 = vmatprep.mubr.msk.f32.mxu0 %vm893_vm0, %v894_v4  ;;  %848 = vmatprep.mubr.msk.f32.mxu1 %vm893_vm0, %v894_v4 }
  0x37   :  { %774 = vmatmul.mubr.msk.f32.gmra.mrb[24].mxu0 %vm72_vm1, %v26_v29  ;;  %849 = vmatmul.mubr.msk.f32.gmra.mrb[24].mxu1 %vm72_vm1, %v51_v30 }
  0x38   :  { %776 = vmatprep.mubr.msk.f32.mxu0 %vm893_vm0, %v894_v4  ;;  %851 = vmatprep.mubr.msk.f32.mxu1 %vm893_vm0, %v894_v4 }
  0x3b   :  { %777 = vmatmul.mubr.msk.f32.gmra.mrb[26].mxu0 %vm72_vm1, %v27_v31  ;;  %852 = vmatmul.mubr.msk.f32.gmra.mrb[26].mxu1 %vm72_vm1, %v52_v32 }
  0x3c   :  { %779 = vmatprep.mubr.msk.f32.mxu0 %vm893_vm0, %v894_v4  ;;  %854 = vmatprep.mubr.msk.f32.mxu1 %vm893_vm0, %v894_v4 }
  0x3f   :  { %780 = vmatmul.mubr.msk.f32.gmra.mrb[28].mxu0 %vm72_vm1, %v28_v33  ;;  %855 = vmatmul.mubr.msk.f32.gmra.mrb[28].mxu1 %vm72_vm1, %v53_v34 }
  0x40   :  { %782 = vmatprep.mubr.msk.f32.mxu0 %vm893_vm0, %v894_v4  ;;  %857 = vmatprep.mubr.msk.f32.mxu1 %vm893_vm0, %v894_v4 }
  0x43   :  { %783 = vmatmul.mubr.msk.f32.gmra.mrb[30].mxu0 %vm72_vm1, %v29_v35  ;;  %858 = vmatmul.mubr.msk.f32.gmra.mrb[30].mxu1 %vm72_vm1, %v54_v36 }
  0x44   :  { %785 = vmatprep.mubr.msk.f32.mxu0 %vm893_vm0, %v894_v4  ;;  %860 = vmatprep.mubr.msk.f32.mxu1 %vm893_vm0, %v894_v4 }
  0x47   :  { %786 = vmatmul.mubr.msk.f32.gmra.mrb[32].mxu0 %vm72_vm1, %v30_v37  ;;  %861 = vmatmul.mubr.msk.f32.gmra.mrb[32].mxu1 %vm72_vm1, %v55_v38 }
  0x48   :  { %788 = vmatprep.mubr.msk.f32.mxu0 %vm893_vm0, %v894_v4  ;;  %863 = vmatprep.mubr.msk.f32.mxu1 %vm893_vm0, %v894_v4 }
  0x4b   :  { %789 = vmatmul.mubr.msk.f32.gmra.mrb[34].mxu0 %vm72_vm1, %v31_v39  ;;  %864 = vmatmul.mubr.msk.f32.gmra.mrb[34].mxu1 %vm72_vm1, %v56_v40 }
  0x4c   :  { %791 = vmatprep.mubr.msk.f32.mxu0 %vm893_vm0, %v894_v4  ;;  %866 = vmatprep.mubr.msk.f32.mxu1 %vm893_vm0, %v894_v4 }
  0x4f   :  { %792 = vmatmul.mubr.msk.f32.gmra.mrb[36].mxu0 %vm72_vm1, %v32_v41  ;;  %867 = vmatmul.mubr.msk.f32.gmra.mrb[36].mxu1 %vm72_vm1, %v57_v42 }
  0x50   :  { %794 = vmatprep.mubr.msk.f32.mxu0 %vm893_vm0, %v894_v4  ;;  %869 = vmatprep.mubr.msk.f32.mxu1 %vm893_vm0, %v894_v4 }
  0x53   :  { %795 = vmatmul.mubr.msk.f32.gmra.mrb[38].mxu0 %vm72_vm1, %v33_v43  ;;  %870 = vmatmul.mubr.msk.f32.gmra.mrb[38].mxu1 %vm72_vm1, %v58_v44 }
  0x54   :  { %797 = vmatprep.mubr.msk.f32.mxu0 %vm893_vm0, %v894_v4  ;;  %872 = vmatprep.mubr.msk.f32.mxu1 %vm893_vm0, %v894_v4 }
  0x57   :  { %798 = vmatmul.mubr.msk.f32.gmra.mrb[40].mxu0 %vm72_vm1, %v34_v45  ;;  %873 = vmatmul.mubr.msk.f32.gmra.mrb[40].mxu1 %vm72_vm1, %v59_v46 }
  0x58   :  { %800 = vmatprep.mubr.msk.f32.mxu0 %vm893_vm0, %v894_v4  ;;  %875 = vmatprep.mubr.msk.f32.mxu1 %vm893_vm0, %v894_v4 }
  0x5b   :  { %801 = vmatmul.mubr.msk.f32.gmra.mrb[42].mxu0 %vm72_vm1, %v35_v47  ;;  %876 = vmatmul.mubr.msk.f32.gmra.mrb[42].mxu1 %vm72_vm1, %v60_v48 }
  0x5c   :  { %803 = vmatprep.mubr.msk.f32.mxu0 %vm893_vm0, %v894_v4  ;;  %878 = vmatprep.mubr.msk.f32.mxu1 %vm893_vm0, %v894_v4 }
  0x5f   :  { %804 = vmatmul.mubr.msk.f32.gmra.mrb[44].mxu0 %vm72_vm1, %v36_v49  ;;  %879 = vmatmul.mubr.msk.f32.gmra.mrb[44].mxu1 %vm72_vm1, %v61_v50 }
  0x60   :  { %806 = vmatprep.mubr.msk.f32.mxu0 %vm893_vm0, %v894_v4  ;;  %881 = vmatprep.mubr.msk.f32.mxu1 %vm893_vm0, %v894_v4 }
  0x63   :  { %807 = vmatmul.mubr.msk.f32.gmra.mrb[46].mxu0 %vm72_vm1, %v37_v51  ;;  %882 = vmatmul.mubr.msk.f32.gmra.mrb[46].mxu1 %vm72_vm1, %v62_v52 }
  0x64   :  { %809 = vmatprep.mubr.msk.f32.mxu0 %vm893_vm0, %v894_v4 }
  0x67   :  { %810 = vmatmul.mubr.msk.f32.gmra.mrb[48].mxu0 %vm72_vm1, %v38_v53 }
  0xda   :  { %v286_v55 = vpop.f32.mrb[0].mxu0  ;;  %v411_v56 = vpop.f32.mrb[0].mxu1 }
  0xdb   :  { %v287_v57 = vadd.f32 %v1218_v54, %v286_v55  ;;  %v739_v58 = vpop.f32.mrb[1].mxu0  ;;  %v412_v59 = vadd.f32 %v1218_v54, %v411_v56  ;;  %v814_v60 = vpop.f32.mrb[1].mxu1 }
  0xdd   :  { %v530_v61 = vmax.f32 %v287_v57, 0.0  ;;  %v555_v62 = vmax.f32 %v412_v59, 0.0 }
  0xde   :  { %v291_v63 = vpop.f32.mrb[2].mxu0  ;;  %v416_v0 = vpop.f32.mrb[2].mxu1 }
  0xdf   :  { %579 = vst [vmem:[%s1419_s3] sm:$0xff] %v530_v61  ;;  %604 = vst [vmem:[%s1419_s3 + $0xc8] sm:$0xff] %v555_v62  ;;  %v292_v1 = vadd.f32 %v1218_v54, %v291_v63  ;;  %v742_v2 = vpop.f32.mrb[3].mxu0  ;;  %v417_v3 = vadd.f32 %v1218_v54, %v416_v0  ;;  %v817_v4 = vpop.f32.mrb[3].mxu1 }
  0xe1   :  { %v531_v5 = vmax.f32 %v292_v1, 0.0  ;;  %v556_v6 = vmax.f32 %v417_v3, 0.0 }
  0xe2   :  { %v296_v7 = vpop.f32.mrb[4].mxu0  ;;  %v421_v8 = vpop.f32.mrb[4].mxu1 }
  0xe3   :  { %580 = vst [vmem:[%s1419_s3 + $0x8] sm:$0xff] %v531_v5  ;;  %605 = vst [vmem:[%s1419_s3 + $0xd0] sm:$0xff] %v556_v6  ;;  %v297_v9 = vadd.f32 %v1218_v54, %v296_v7  ;;  %v745_v10 = vpop.f32.mrb[5].mxu0  ;;  %v422_v11 = vadd.f32 %v1218_v54, %v421_v8  ;;  %v820_v12 = vpop.f32.mrb[5].mxu1 }
  0xe5   :  { %v532_v13 = vmax.f32 %v297_v9, 0.0  ;;  %v557_v14 = vmax.f32 %v422_v11, 0.0 }
  0xe6   :  { %v301_v15 = vpop.f32.mrb[6].mxu0  ;;  %v426_v16 = vpop.f32.mrb[6].mxu1 }
  0xe7   :  { %581 = vst [vmem:[%s1419_s3 + $0x10] sm:$0xff] %v532_v13  ;;  %606 = vst [vmem:[%s1419_s3 + $0xd8] sm:$0xff] %v557_v14  ;;  %v302_v17 = vadd.f32 %v1218_v54, %v301_v15  ;;  %v748_v18 = vpop.f32.mrb[7].mxu0  ;;  %v427_v19 = vadd.f32 %v1218_v54, %v426_v16  ;;  %v823_v20 = vpop.f32.mrb[7].mxu1 }
  0xe9   :  { %v533_v21 = vmax.f32 %v302_v17, 0.0  ;;  %v558_v22 = vmax.f32 %v427_v19, 0.0 }
  0xea   :  { %v306_v23 = vpop.f32.mrb[8].mxu0  ;;  %v431_v24 = vpop.f32.mrb[8].mxu1 }
  0xeb   :  { %582 = vst [vmem:[%s1419_s3 + $0x18] sm:$0xff] %v533_v21  ;;  %607 = vst [vmem:[%s1419_s3 + $0xe0] sm:$0xff] %v558_v22  ;;  %v307_v25 = vadd.f32 %v1218_v54, %v306_v23  ;;  %v751_v26 = vpop.f32.mrb[9].mxu0  ;;  %v432_v27 = vadd.f32 %v1218_v54, %v431_v24  ;;  %v826_v28 = vpop.f32.mrb[9].mxu1 }
  0xed   :  { %v534_v29 = vmax.f32 %v307_v25, 0.0  ;;  %v559_v30 = vmax.f32 %v432_v27, 0.0 }
  0xee   :  { %v311_v31 = vpop.f32.mrb[10].mxu0  ;;  %v436_v32 = vpop.f32.mrb[10].mxu1 }
  0xef   :  { %583 = vst [vmem:[%s1419_s3 + $0x20] sm:$0xff] %v534_v29  ;;  %608 = vst [vmem:[%s1419_s3 + $0xe8] sm:$0xff] %v559_v30  ;;  %v312_v33 = vadd.f32 %v1218_v54, %v311_v31  ;;  %v754_v34 = vpop.f32.mrb[11].mxu0  ;;  %v437_v35 = vadd.f32 %v1218_v54, %v436_v32  ;;  %v829_v36 = vpop.f32.mrb[11].mxu1 }
  0xf1   :  { %v535_v37 = vmax.f32 %v312_v33, 0.0  ;;  %v560_v38 = vmax.f32 %v437_v35, 0.0 }
  0xf2   :  { %v316_v39 = vpop.f32.mrb[12].mxu0  ;;  %v441_v40 = vpop.f32.mrb[12].mxu1 }
  0xf3   :  { %584 = vst [vmem:[%s1419_s3 + $0x28] sm:$0xff] %v535_v37  ;;  %609 = vst [vmem:[%s1419_s3 + $0xf0] sm:$0xff] %v560_v38  ;;  %v317_v41 = vadd.f32 %v1218_v54, %v316_v39  ;;  %v757_v42 = vpop.f32.mrb[13].mxu0  ;;  %v442_v43 = vadd.f32 %v1218_v54, %v441_v40  ;;  %v832_v44 = vpop.f32.mrb[13].mxu1 }
  0xf5   :  { %v536_v45 = vmax.f32 %v317_v41, 0.0  ;;  %v561_v46 = vmax.f32 %v442_v43, 0.0 }
  0xf6   :  { %v321_v47 = vpop.f32.mrb[14].mxu0  ;;  %v446_v48 = vpop.f32.mrb[14].mxu1 }
  0xf7   :  { %585 = vst [vmem:[%s1419_s3 + $0x30] sm:$0xff] %v536_v45  ;;  %610 = vst [vmem:[%s1419_s3 + $0xf8] sm:$0xff] %v561_v46  ;;  %v322_v49 = vadd.f32 %v1218_v54, %v321_v47  ;;  %v760_v50 = vpop.f32.mrb[15].mxu0  ;;  %v447_v51 = vadd.f32 %v1218_v54, %v446_v48  ;;  %v835_v52 = vpop.f32.mrb[15].mxu1 }
  0xf9   :  { %v537_v53 = vmax.f32 %v322_v49, 0.0  ;;  %v562_v55 = vmax.f32 %v447_v51, 0.0 }
  0xfa   :  { %v326_v56 = vpop.f32.mrb[16].mxu0  ;;  %v451_v57 = vpop.f32.mrb[16].mxu1 }
  0xfb   :  { %586 = vst [vmem:[%s1419_s3 + $0x38] sm:$0xff] %v537_v53  ;;  %611 = vst [vmem:[%s1419_s3 + $0x100] sm:$0xff] %v562_v55  ;;  %v327_v58 = vadd.f32 %v1218_v54, %v326_v56  ;;  %v763_v59 = vpop.f32.mrb[17].mxu0  ;;  %v452_v60 = vadd.f32 %v1218_v54, %v451_v57  ;;  %v838_v61 = vpop.f32.mrb[17].mxu1 }
  0xfd   :  { %v538_v62 = vmax.f32 %v327_v58, 0.0  ;;  %v563_v63 = vmax.f32 %v452_v60, 0.0 }
  0xfe   :  { %v331_v0 = vpop.f32.mrb[18].mxu0  ;;  %v456_v1 = vpop.f32.mrb[18].mxu1 }
  0xff   :  { %587 = vst [vmem:[%s1419_s3 + $0x40] sm:$0xff] %v538_v62  ;;  %612 = vst [vmem:[%s1419_s3 + $0x108] sm:$0xff] %v563_v63  ;;  %v332_v2 = vadd.f32 %v1218_v54, %v331_v0  ;;  %v766_v3 = vpop.f32.mrb[19].mxu0  ;;  %v457_v4 = vadd.f32 %v1218_v54, %v456_v1  ;;  %v841_v5 = vpop.f32.mrb[19].mxu1 }
 0x101   :  { %v539_v6 = vmax.f32 %v332_v2, 0.0  ;;  %v564_v7 = vmax.f32 %v457_v4, 0.0 }
 0x102   :  { %v336_v8 = vpop.f32.mrb[20].mxu0  ;;  %v461_v9 = vpop.f32.mrb[20].mxu1 }
 0x103   :  { %588 = vst [vmem:[%s1419_s3 + $0x48] sm:$0xff] %v539_v6  ;;  %613 = vst [vmem:[%s1419_s3 + $0x110] sm:$0xff] %v564_v7  ;;  %v337_v10 = vadd.f32 %v1218_v54, %v336_v8  ;;  %v769_v11 = vpop.f32.mrb[21].mxu0  ;;  %v462_v12 = vadd.f32 %v1218_v54, %v461_v9  ;;  %v844_v13 = vpop.f32.mrb[21].mxu1 }
 0x105   :  { %v540_v14 = vmax.f32 %v337_v10, 0.0  ;;  %v565_v15 = vmax.f32 %v462_v12, 0.0 }
 0x106   :  { %v341_v16 = vpop.f32.mrb[22].mxu0  ;;  %v466_v17 = vpop.f32.mrb[22].mxu1 }
 0x107   :  { %589 = vst [vmem:[%s1419_s3 + $0x50] sm:$0xff] %v540_v14  ;;  %614 = vst [vmem:[%s1419_s3 + $0x118] sm:$0xff] %v565_v15  ;;  %v342_v18 = vadd.f32 %v1218_v54, %v341_v16  ;;  %v772_v19 = vpop.f32.mrb[23].mxu0  ;;  %v467_v20 = vadd.f32 %v1218_v54, %v466_v17  ;;  %v847_v21 = vpop.f32.mrb[23].mxu1 }
 0x109   :  { %v541_v22 = vmax.f32 %v342_v18, 0.0  ;;  %v566_v23 = vmax.f32 %v467_v20, 0.0 }
 0x10a   :  { %v346_v24 = vpop.f32.mrb[24].mxu0  ;;  %v471_v25 = vpop.f32.mrb[24].mxu1 }
 0x10b   :  { %590 = vst [vmem:[%s1419_s3 + $0x58] sm:$0xff] %v541_v22  ;;  %615 = vst [vmem:[%s1419_s3 + $0x120] sm:$0xff] %v566_v23  ;;  %v347_v26 = vadd.f32 %v1218_v54, %v346_v24  ;;  %v775_v27 = vpop.f32.mrb[25].mxu0  ;;  %v472_v28 = vadd.f32 %v1218_v54, %v471_v25  ;;  %v850_v29 = vpop.f32.mrb[25].mxu1 }
 0x10d   :  { %v542_v30 = vmax.f32 %v347_v26, 0.0  ;;  %v567_v31 = vmax.f32 %v472_v28, 0.0 }
 0x10e   :  { %v351_v32 = vpop.f32.mrb[26].mxu0  ;;  %v476_v33 = vpop.f32.mrb[26].mxu1 }
 0x10f   :  { %591 = vst [vmem:[%s1419_s3 + $0x60] sm:$0xff] %v542_v30  ;;  %616 = vst [vmem:[%s1419_s3 + $0x128] sm:$0xff] %v567_v31  ;;  %v352_v34 = vadd.f32 %v1218_v54, %v351_v32  ;;  %v778_v35 = vpop.f32.mrb[27].mxu0  ;;  %v477_v36 = vadd.f32 %v1218_v54, %v476_v33  ;;  %v853_v37 = vpop.f32.mrb[27].mxu1 }
 0x111   :  { %v543_v38 = vmax.f32 %v352_v34, 0.0  ;;  %v568_v39 = vmax.f32 %v477_v36, 0.0 }
 0x112   :  { %v356_v40 = vpop.f32.mrb[28].mxu0  ;;  %v481_v41 = vpop.f32.mrb[28].mxu1 }
 0x113   :  { %592 = vst [vmem:[%s1419_s3 + $0x68] sm:$0xff] %v543_v38  ;;  %617 = vst [vmem:[%s1419_s3 + $0x130] sm:$0xff] %v568_v39  ;;  %v357_v42 = vadd.f32 %v1218_v54, %v356_v40  ;;  %v781_v43 = vpop.f32.mrb[29].mxu0  ;;  %v482_v44 = vadd.f32 %v1218_v54, %v481_v41  ;;  %v856_v45 = vpop.f32.mrb[29].mxu1 }
 0x115   :  { %v544_v46 = vmax.f32 %v357_v42, 0.0  ;;  %v569_v47 = vmax.f32 %v482_v44, 0.0 }
 0x116   :  { %v361_v48 = vpop.f32.mrb[30].mxu0  ;;  %v486_v49 = vpop.f32.mrb[30].mxu1 }
 0x117   :  { %593 = vst [vmem:[%s1419_s3 + $0x70] sm:$0xff] %v544_v46  ;;  %618 = vst [vmem:[%s1419_s3 + $0x138] sm:$0xff] %v569_v47  ;;  %v362_v50 = vadd.f32 %v1218_v54, %v361_v48  ;;  %v784_v51 = vpop.f32.mrb[31].mxu0  ;;  %v487_v52 = vadd.f32 %v1218_v54, %v486_v49  ;;  %v859_v53 = vpop.f32.mrb[31].mxu1 }
 0x119   :  { %v545_v55 = vmax.f32 %v362_v50, 0.0  ;;  %v570_v56 = vmax.f32 %v487_v52, 0.0 }
 0x11a   :  { %v366_v57 = vpop.f32.mrb[32].mxu0  ;;  %v491_v58 = vpop.f32.mrb[32].mxu1 }
 0x11b   :  { %594 = vst [vmem:[%s1419_s3 + $0x78] sm:$0xff] %v545_v55  ;;  %619 = vst [vmem:[%s1419_s3 + $0x140] sm:$0xff] %v570_v56  ;;  %v367_v59 = vadd.f32 %v1218_v54, %v366_v57  ;;  %v787_v60 = vpop.f32.mrb[33].mxu0  ;;  %v492_v61 = vadd.f32 %v1218_v54, %v491_v58  ;;  %v862_v62 = vpop.f32.mrb[33].mxu1 }
 0x11d   :  { %v546_v63 = vmax.f32 %v367_v59, 0.0  ;;  %v571_v0 = vmax.f32 %v492_v61, 0.0 }
 0x11e   :  { %v371_v1 = vpop.f32.mrb[34].mxu0  ;;  %v496_v2 = vpop.f32.mrb[34].mxu1 }
 0x11f   :  { %595 = vst [vmem:[%s1419_s3 + $0x80] sm:$0xff] %v546_v63  ;;  %620 = vst [vmem:[%s1419_s3 + $0x148] sm:$0xff] %v571_v0  ;;  %v372_v3 = vadd.f32 %v1218_v54, %v371_v1  ;;  %v790_v4 = vpop.f32.mrb[35].mxu0  ;;  %v497_v5 = vadd.f32 %v1218_v54, %v496_v2  ;;  %v865_v6 = vpop.f32.mrb[35].mxu1 }
 0x121   :  { %v547_v7 = vmax.f32 %v372_v3, 0.0  ;;  %v572_v8 = vmax.f32 %v497_v5, 0.0 }
 0x122   :  { %v376_v9 = vpop.f32.mrb[36].mxu0  ;;  %v501_v10 = vpop.f32.mrb[36].mxu1 }
 0x123   :  { %596 = vst [vmem:[%s1419_s3 + $0x88] sm:$0xff] %v547_v7  ;;  %621 = vst [vmem:[%s1419_s3 + $0x150] sm:$0xff] %v572_v8  ;;  %v377_v11 = vadd.f32 %v1218_v54, %v376_v9  ;;  %v793_v12 = vpop.f32.mrb[37].mxu0  ;;  %v502_v13 = vadd.f32 %v1218_v54, %v501_v10  ;;  %v868_v14 = vpop.f32.mrb[37].mxu1 }
 0x125   :  { %v548_v15 = vmax.f32 %v377_v11, 0.0  ;;  %v573_v16 = vmax.f32 %v502_v13, 0.0 }
 0x126   :  { %v381_v17 = vpop.f32.mrb[38].mxu0  ;;  %v506_v18 = vpop.f32.mrb[38].mxu1 }
 0x127   :  { %597 = vst [vmem:[%s1419_s3 + $0x90] sm:$0xff] %v548_v15  ;;  %622 = vst [vmem:[%s1419_s3 + $0x158] sm:$0xff] %v573_v16  ;;  %v382_v19 = vadd.f32 %v1218_v54, %v381_v17  ;;  %v796_v20 = vpop.f32.mrb[39].mxu0  ;;  %v507_v21 = vadd.f32 %v1218_v54, %v506_v18  ;;  %v871_v22 = vpop.f32.mrb[39].mxu1 }
 0x129   :  { %v549_v23 = vmax.f32 %v382_v19, 0.0  ;;  %v574_v24 = vmax.f32 %v507_v21, 0.0 }
 0x12a   :  { %v386_v25 = vpop.f32.mrb[40].mxu0  ;;  %v511_v26 = vpop.f32.mrb[40].mxu1 }
 0x12b   :  { %598 = vst [vmem:[%s1419_s3 + $0x98] sm:$0xff] %v549_v23  ;;  %623 = vst [vmem:[%s1419_s3 + $0x160] sm:$0xff] %v574_v24  ;;  %v387_v27 = vadd.f32 %v1218_v54, %v386_v25  ;;  %v799_v28 = vpop.f32.mrb[41].mxu0  ;;  %v512_v29 = vadd.f32 %v1218_v54, %v511_v26  ;;  %v874_v30 = vpop.f32.mrb[41].mxu1 }
 0x12d   :  { %v550_v31 = vmax.f32 %v387_v27, 0.0  ;;  %v575_v32 = vmax.f32 %v512_v29, 0.0 }
 0x12e   :  { %v391_v33 = vpop.f32.mrb[42].mxu0  ;;  %v516_v34 = vpop.f32.mrb[42].mxu1 }
 0x12f   :  { %599 = vst [vmem:[%s1419_s3 + $0xa0] sm:$0xff] %v550_v31  ;;  %624 = vst [vmem:[%s1419_s3 + $0x168] sm:$0xff] %v575_v32  ;;  %v392_v35 = vadd.f32 %v1218_v54, %v391_v33  ;;  %v802_v36 = vpop.f32.mrb[43].mxu0  ;;  %v517_v37 = vadd.f32 %v1218_v54, %v516_v34  ;;  %v877_v38 = vpop.f32.mrb[43].mxu1 }
 0x131   :  { %v551_v39 = vmax.f32 %v392_v35, 0.0  ;;  %v576_v40 = vmax.f32 %v517_v37, 0.0 }
 0x132   :  { %v396_v41 = vpop.f32.mrb[44].mxu0  ;;  %v521_v42 = vpop.f32.mrb[44].mxu1 }
 0x133   :  { %600 = vst [vmem:[%s1419_s3 + $0xa8] sm:$0xff] %v551_v39  ;;  %625 = vst [vmem:[%s1419_s3 + $0x170] sm:$0xff] %v576_v40  ;;  %v397_v43 = vadd.f32 %v1218_v54, %v396_v41  ;;  %v805_v44 = vpop.f32.mrb[45].mxu0  ;;  %v522_v45 = vadd.f32 %v1218_v54, %v521_v42  ;;  %v880_v46 = vpop.f32.mrb[45].mxu1 }
 0x135   :  { %v552_v47 = vmax.f32 %v397_v43, 0.0  ;;  %v577_v48 = vmax.f32 %v522_v45, 0.0 }
 0x136   :  { %v401_v49 = vpop.f32.mrb[46].mxu0  ;;  %v526_v50 = vpop.f32.mrb[46].mxu1 }
 0x137   :  { %601 = vst [vmem:[%s1419_s3 + $0xb0] sm:$0xff] %v552_v47  ;;  %626 = vst [vmem:[%s1419_s3 + $0x178] sm:$0xff] %v577_v48  ;;  %v402_v51 = vadd.f32 %v1218_v54, %v401_v49  ;;  %v808_v52 = vpop.f32.mrb[47].mxu0  ;;  %v527_v53 = vadd.f32 %v1218_v54, %v526_v50  ;;  %v883_v55 = vpop.f32.mrb[47].mxu1 }
 0x139   :  { %v553_v56 = vmax.f32 %v402_v51, 0.0  ;;  %v578_v57 = vmax.f32 %v527_v53, 0.0 }
 0x13a   :  { %v406_v58 = vpop.f32.mrb[48].mxu0 }
 0x13b   :  { %602 = vst [vmem:[%s1419_s3 + $0xb8] sm:$0xff] %v553_v56  ;;  %627 = vst [vmem:[%s1419_s3 + $0x180] sm:$0xff] %v578_v57  ;;  %v407_v59 = vadd.f32 %v1218_v54, %v406_v58  ;;  %v811_v60 = vpop.f32.mrb[49].mxu0 }
 0x13d   :  { %v554_v61 = vmax.f32 %v407_v59, 0.0 }
 0x13f   :  { %603 = vst [vmem:[%s1419_s3 + $0xc0] sm:$0xff] %v554_v61 }

// kernel: nn_prototype_forward.11
= control target key start
LH: loop header
LB: loop body
LE: loop exit
PB: predicated region body
PF: predicated region fallthrough
CT: control target
= control target key end

     0   :  { %vm69_vm0 = vcmask 261120   ;;  %s558_s1 = inlined_call_operand.vmem [shape: f32[288,128], index: 1, kind: input, shape index: {}]   ;;  %s559_s0 = inlined_call_operand.vmem [shape: f32[32,288], index: 0, kind: input, shape index: {}]   ;;  %s560_s2 = inlined_call_operand.vmem [shape: f32[1,128], index: 2, kind: input, shape index: {}]   ;;  %s561_s3 = inlined_call_operand.vmem [shape: f32[32,128], index: 3, kind: output, shape index: {}]  }
   0x1   :  { %v42_v0 = vld [vmem:[%s558_s1 + $0x80] sm:$0xff]  ;;  %v43_v1 = vld [vmem:[%s558_s1 + $0x88] sm:$0xff]  ;;  %v44_v5 = vld [vmem:[%s558_s1 + $0x90] sm:$0xff] }
   0x2   :  { %v26_v2 = vld [vmem:[%s558_s1] sm:$0xff]  ;;  %v335_v3 = vpack.c.bf16 %v43_v1, %v42_v0  ;;  %v27_v4 = vld [vmem:[%s558_s1 + $0x8] sm:$0xff]  ;;  %v45_v6 = vld [vmem:[%s558_s1 + $0x98] sm:$0xff] }
   0x3   :  { %v337_v7 = vpack.c.bf16 %v27_v4, %v26_v2  ;;  %v339_v8 = vpack.c.bf16 %v45_v6, %v44_v5  ;;  %v28_v9 = vld [vmem:[%s558_s1 + $0x10] sm:$0xff]  ;;  %v29_v10 = vld [vmem:[%s558_s1 + $0x18] sm:$0xff]  ;;  %v46_v11 = vld [vmem:[%s558_s1 + $0xa0] sm:$0xff] }
   0x4   :  { %336 = vmatprep.subr.bf16.mxu0 %v335_v3  ;;  %v47_v12 = vld [vmem:[%s558_s1 + $0xa8] sm:$0xff]  ;;  %v341_v13 = vpack.c.bf16 %v29_v10, %v28_v9  ;;  %v30_v15 = vld [vmem:[%s558_s1 + $0x20] sm:$0xff]  ;;  %v48_v17 = vld [vmem:[%s558_s1 + $0xb0] sm:$0xff] }
   0x5   :  { %338 = vmatpush3.bf16.msra.mxu0 %v337_v7  ;;  %v343_v14 = vpack.c.bf16 %v47_v12, %v46_v11  ;;  %v31_v16 = vld [vmem:[%s558_s1 + $0x28] sm:$0xff]  ;;  %v49_v18 = vld [vmem:[%s558_s1 + $0xb8] sm:$0xff]  ;;  %v32_v21 = vld [vmem:[%s558_s1 + $0x30] sm:$0xff] }
   0x6   :  { %340 = vmatprep.subr.bf16.mxu0 %v339_v8  ;;  %v345_v19 = vpack.c.bf16 %v31_v16, %v30_v15  ;;  %v347_v20 = vpack.c.bf16 %v49_v18, %v48_v17  ;;  %v33_v22 = vld [vmem:[%s558_s1 + $0x38] sm:$0xff]  ;;  %v50_v23 = vld [vmem:[%s558_s1 + $0xc0] sm:$0xff]  ;;  %v51_v24 = vld [vmem:[%s558_s1 + $0xc8] sm:$0xff] }
   0x7   :  { %v58_v25 = vld [vmem:[%s558_s1 + $0x100] sm:$0xff]  ;;  %v59_v26 = vld [vmem:[%s558_s1 + $0x108] sm:$0xff]  ;;  %v349_v29 = vpack.c.bf16 %v33_v22, %v32_v21  ;;  %v60_v30 = vld [vmem:[%s558_s1 + $0x110] sm:$0xff]  ;;  %v351_v32 = vpack.c.bf16 %v51_v24, %v50_v23 }
   0x8   :  { %v367_v27 = vpack.c.bf16 %v59_v26, %v58_v25  ;;  %v15_v28 = vld [vmem:[%s559_s0 + $0x8] sm:$0xff]  ;;  %v61_v31 = vld [vmem:[%s558_s1 + $0x118] sm:$0xff]  ;;  %v34_v33 = vld [vmem:[%s558_s1 + $0x40] sm:$0xff] }
   0x9   :  { %342 = vmatpush3.bf16.msra.mxu0 %v341_v13  ;;  %146 = vmatprep.mubr.f32.mxu0 %v15_v28  ;;  %v35_v34 = vld [vmem:[%s558_s1 + $0x48] sm:$0xff]  ;;  %v371_v35 = vpack.c.bf16 %v61_v31, %v60_v30  ;;  %v16_v36 = vld [vmem:[%s559_s0 + $0x10] sm:$0xff]  ;;  %v53_v38 = vld [vmem:[%s558_s1 + $0xd8] sm:$0xff] }
   0xa   :  { %344 = vmatprep.subr.bf16.mxu0 %v343_v14  ;;  %368 = vmatprep.subr.bf16.mxu1 %v367_v27  ;;  %v52_v37 = vld [vmem:[%s558_s1 + $0xd0] sm:$0xff]  ;;  %v353_v39 = vpack.c.bf16 %v35_v34, %v34_v33  ;;  %v37_v42 = vld [vmem:[%s558_s1 + $0x58] sm:$0xff]  ;;  %v54_v43 = vld [vmem:[%s558_s1 + $0xe0] sm:$0xff] }
   0xb   :  { %370 = vmatpush3.bf16.msra.mxu1 %v367_v27  ;;  %329 = vmatprep.mubr.msk.f32.mxu1 %vm69_vm0, %v16_v36  ;;  %v355_v40 = vpack.c.bf16 %v53_v38, %v52_v37  ;;  %v36_v41 = vld [vmem:[%s558_s1 + $0x50] sm:$0xff]  ;;  %v55_v44 = vld [vmem:[%s558_s1 + $0xe8] sm:$0xff]  ;;  %v22_v46 = vld [vmem:[%s559_s0 + $0x40] sm:$0xff] }
   0xc   :  { %372 = vmatprep.subr.bf16.mxu1 %v371_v35  ;;  %v19_v45 = vld [vmem:[%s559_s0 + $0x28] sm:$0xff]  ;;  %v357_v47 = vpack.c.bf16 %v37_v42, %v36_v41  ;;  %v359_v48 = vpack.c.bf16 %v55_v44, %v54_v43  ;;  %v38_v49 = vld [vmem:[%s558_s1 + $0x60] sm:$0xff]  ;;  %v56_v51 = vld [vmem:[%s558_s1 + $0xf0] sm:$0xff] }
   0xd   :  { %346 = vmatpush3.bf16.msra.mxu0 %v345_v19  ;;  %v39_v50 = vld [vmem:[%s558_s1 + $0x68] sm:$0xff]  ;;  %v57_v52 = vld [vmem:[%s558_s1 + $0xf8] sm:$0xff]  ;;  %v40_v56 = vld [vmem:[%s558_s1 + $0x70] sm:$0xff] }
   0xe   :  { %348 = vmatprep.subr.bf16.mxu0 %v347_v20  ;;  %v25_v53 = vld [vmem:[%s559_s0 + $0x58] sm:$0xff]  ;;  %v361_v54 = vpack.c.bf16 %v39_v50, %v38_v49  ;;  %v363_v55 = vpack.c.bf16 %v57_v52, %v56_v51  ;;  %v14_v59 = vld [vmem:[%s559_s0] sm:$0xff]  ;;  %v20_v63 = vld [vmem:[%s559_s0 + $0x30] sm:$0xff] }
   0xf   :  { %374 = vmatpush3.bf16.msra.mxu1 %v371_v35  ;;  %v41_v57 = vld [vmem:[%s558_s1 + $0x78] sm:$0xff]  ;;  %v18_v60 = vld [vmem:[%s559_s0 + $0x20] sm:$0xff]  ;;  %v24_v0 = vld [vmem:[%s559_s0 + $0x50] sm:$0xff] }
  0x10   :  { %v365_v58 = vpack.c.bf16 %v41_v57, %v40_v56  ;;  %v17_v61 = vld [vmem:[%s559_s0 + $0x18] sm:$0xff]  ;;  %v23_v1 = vld [vmem:[%s559_s0 + $0x48] sm:$0xff]  ;;  %v264_v8 = vld [vmem:[%s560_s2] ss:$0 sm:$0xff] }
  0x11   :  { %350 = vmatpush3.bf16.msra.mxu0 %v349_v29  ;;  %v21_v62 = vld [vmem:[%s559_s0 + $0x38] sm:$0xff] }
  0x12   :  { %352 = vmatprep.subr.bf16.mxu0 %v351_v32  ;;  %330 = vmatmul.mubr.msk.f32.vlgmr.msra.gmra.mrb[0].mxu1 %vm69_vm0, %v19_v45 }
  0x13   :  { %332 = vmatprep.mubr.msk.f32.mxu1 %vm69_vm0, %v22_v46 }
  0x15   :  { %354 = vmatpush3.bf16.msra.mxu0 %v353_v39 }
  0x16   :  { %356 = vmatprep.subr.bf16.mxu0 %v355_v40  ;;  %333 = vmatmul.mubr.msk.f32.gmra.mrb[2].mxu1 %vm69_vm0, %v25_v53 }
  0x19   :  { %358 = vmatpush3.bf16.msra.mxu0 %v357_v47 }
  0x1a   :  { %360 = vmatprep.subr.bf16.mxu0 %v359_v48 }
  0x1d   :  { %362 = vmatpush3.bf16.msra.mxu0 %v361_v54 }
  0x1e   :  { %364 = vmatprep.subr.bf16.mxu0 %v363_v55 }
  0x21   :  { %366 = vmatpush3.bf16.msra.mxu0 %v365_v58 }
  0x24   :  { %147 = vmatmul.mubr.f32.vlgmr.msra.gmra.mrb[0].mxu0 %v14_v59 }
  0x25   :  { %151 = vmatprep.mubr.f32.mxu0 %v18_v60 }
  0x28   :  { %152 = vmatmul.mubr.f32.gmra.mrb[2].mxu0 %v17_v61 }
  0x29   :  { %156 = vmatprep.mubr.f32.mxu0 %v21_v62 }
  0x2c   :  { %157 = vmatmul.mubr.f32.gmra.mrb[4].mxu0 %v20_v63 }
  0x2d   :  { %161 = vmatprep.mubr.f32.mxu0 %v24_v0 }
  0x30   :  { %162 = vmatmul.mubr.f32.gmra.mrb[6].mxu0 %v23_v1 }
  0xe5   :  { %v331_v2 = vpop.f32.mrb[0].mxu1 }
  0xe6   :  { %v233_v3 = vpop.f32.mrb[1].mxu1 }
  0xe9   :  { %v334_v4 = vpop.f32.mrb[2].mxu1 }
  0xea   :  { %v243_v5 = vpop.f32.mrb[3].mxu1 }
  0xf7   :  { %v301_v6 = vpop.f32.mrb[0].mxu0 }
  0xf8   :  { %v302_v7 = vpop.f32.mrb[1].mxu0 }
  0xf9   :  { %v303_v9 = vadd.f32 %v302_v7, %v301_v6 }
  0xfb   :  { %v304_v10 = vpop.f32.mrb[2].mxu0  ;;  %v149_v11 = vadd.f32 %v303_v9, %v264_v8 }
  0xfc   :  { %v305_v12 = vpop.f32.mrb[3].mxu0 }
  0xfd   :  { %v306_v13 = vadd.f32 %v305_v12, %v304_v10  ;;  %v234_v14 = vadd.f32 %v233_v3, %v149_v11 }
  0xff   :  { %v154_v15 = vadd.f32 %v306_v13, %v264_v8  ;;  %v252_v16 = vmax.f32 %v234_v14, 0.0  ;;  %v307_v17 = vpop.f32.mrb[4].mxu0 }
 0x100   :  { %v308_v18 = vpop.f32.mrb[5].mxu0 }
 0x101   :  { %v239_v19 = vadd.f32 %v331_v2, %v154_v15  ;;  %256 = vst [vmem:[%s561_s3] sm:$0xff] %v252_v16  ;;  %v309_v20 = vadd.f32 %v308_v18, %v307_v17 }
 0x103   :  { %v253_v21 = vmax.f32 %v239_v19, 0.0  ;;  %v310_v22 = vpop.f32.mrb[6].mxu0  ;;  %v159_v23 = vadd.f32 %v309_v20, %v264_v8 }
 0x104   :  { %v311_v24 = vpop.f32.mrb[7].mxu0 }
 0x105   :  { %257 = vst [vmem:[%s561_s3 + $0x8] sm:$0xff] %v253_v21  ;;  %v312_v25 = vadd.f32 %v311_v24, %v310_v22  ;;  %v244_v26 = vadd.f32 %v243_v5, %v159_v23 }
 0x107   :  { %v164_v27 = vadd.f32 %v312_v25, %v264_v8  ;;  %v254_v28 = vmax.f32 %v244_v26, 0.0 }
 0x109   :  { %v249_v29 = vadd.f32 %v334_v4, %v164_v27  ;;  %258 = vst [vmem:[%s561_s3 + $0x10] sm:$0xff] %v254_v28 }
 0x10b   :  { %v255_v30 = vmax.f32 %v249_v29, 0.0 }
 0x10d   :  { %259 = vst [vmem:[%s561_s3 + $0x18] sm:$0xff] %v255_v30 }

// kernel: nn_prototype_forward.12
= control target key start
LH: loop header
LB: loop body
LE: loop exit
PB: predicated region body
PF: predicated region fallthrough
CT: control target
= control target key end

     0   :  { %v304_v3 = vmov 0.0|0.0   ;;  %vm305_vm0 = vmmov 0   ;;  %v306_v4 = vmov 0.0   ;;  %vm60_vm1 = vcmask 261120   ;;  %s450_s1 = inlined_call_operand.vmem [shape: f32[288,128], index: 1, kind: input, shape index: {}]   ;;  %s451_s0 = inlined_call_operand.vmem [shape: f32[8,288], index: 0, kind: input, shape index: {}]   ;;  %s452_s2 = inlined_call_operand.vmem [shape: f32[1,128], index: 2, kind: input, shape index: {}]   ;;  %s453_s3 = inlined_call_operand.vmem [shape: f32[8,128], index: 3, kind: output, shape index: {}]  }
   0x1   :  { %v33_v0 = vld [vmem:[%s450_s1 + $0x80] sm:$0xff]  ;;  %v34_v1 = vld [vmem:[%s450_s1 + $0x88] sm:$0xff]  ;;  %295 = vmatprep.subr.bf16.mxu1 %v304_v3  ;;  %260 = vmatprep.mubr.msk.f32.mxu1 %vm305_vm0, %v306_v4  ;;  %v35_v7 = vld [vmem:[%s450_s1 + $0x90] sm:$0xff] }
   0x2   :  { %v17_v2 = vld [vmem:[%s450_s1] sm:$0xff]  ;;  %v263_v5 = vpack.c.bf16 %v34_v1, %v33_v0  ;;  %v18_v6 = vld [vmem:[%s450_s1 + $0x8] sm:$0xff]  ;;  %v36_v8 = vld [vmem:[%s450_s1 + $0x98] sm:$0xff] }
   0x3   :  { %v265_v9 = vpack.c.bf16 %v18_v6, %v17_v2  ;;  %v267_v10 = vpack.c.bf16 %v36_v8, %v35_v7  ;;  %v19_v11 = vld [vmem:[%s450_s1 + $0x10] sm:$0xff]  ;;  %v20_v12 = vld [vmem:[%s450_s1 + $0x18] sm:$0xff]  ;;  %v37_v13 = vld [vmem:[%s450_s1 + $0xa0] sm:$0xff] }
   0x4   :  { %264 = vmatprep.subr.bf16.mxu0 %v263_v5  ;;  %v38_v14 = vld [vmem:[%s450_s1 + $0xa8] sm:$0xff]  ;;  %v269_v15 = vpack.c.bf16 %v20_v12, %v19_v11  ;;  %v21_v17 = vld [vmem:[%s450_s1 + $0x20] sm:$0xff]  ;;  %v39_v19 = vld [vmem:[%s450_s1 + $0xb0] sm:$0xff] }
   0x5   :  { %266 = vmatpush3.bf16.msra.mxu0 %v265_v9  ;;  %v271_v16 = vpack.c.bf16 %v38_v14, %v37_v13  ;;  %v22_v18 = vld [vmem:[%s450_s1 + $0x28] sm:$0xff]  ;;  %v40_v20 = vld [vmem:[%s450_s1 + $0xb8] sm:$0xff]  ;;  %v23_v23 = vld [vmem:[%s450_s1 + $0x30] sm:$0xff] }
   0x6   :  { %268 = vmatprep.subr.bf16.mxu0 %v267_v10  ;;  %v273_v21 = vpack.c.bf16 %v22_v18, %v21_v17  ;;  %v275_v22 = vpack.c.bf16 %v40_v20, %v39_v19  ;;  %v24_v24 = vld [vmem:[%s450_s1 + $0x38] sm:$0xff]  ;;  %v41_v25 = vld [vmem:[%s450_s1 + $0xc0] sm:$0xff]  ;;  %v42_v26 = vld [vmem:[%s450_s1 + $0xc8] sm:$0xff] }
   0x7   :  { %v49_v27 = vld [vmem:[%s450_s1 + $0x100] sm:$0xff]  ;;  %v50_v28 = vld [vmem:[%s450_s1 + $0x108] sm:$0xff]  ;;  %v277_v30 = vpack.c.bf16 %v24_v24, %v23_v23  ;;  %v51_v32 = vld [vmem:[%s450_s1 + $0x110] sm:$0xff]  ;;  %v279_v34 = vpack.c.bf16 %v42_v26, %v41_v25 }
   0x8   :  { %v15_v29 = vld [vmem:[%s451_s0 + $0x8] sm:$0xff]  ;;  %v296_v31 = vpack.c.bf16 %v50_v28, %v49_v27  ;;  %v52_v33 = vld [vmem:[%s450_s1 + $0x118] sm:$0xff]  ;;  %v25_v35 = vld [vmem:[%s450_s1 + $0x40] sm:$0xff] }
   0x9   :  { %270 = vmatpush3.bf16.msra.mxu0 %v269_v15  ;;  %128 = vmatprep.mubr.f32.mxu0 %v15_v29  ;;  %v26_v36 = vld [vmem:[%s450_s1 + $0x48] sm:$0xff]  ;;  %v43_v37 = vld [vmem:[%s450_s1 + $0xd0] sm:$0xff]  ;;  %v44_v38 = vld [vmem:[%s450_s1 + $0xd8] sm:$0xff]  ;;  %v299_v39 = vpack.c.bf16 %v52_v33, %v51_v32 }
   0xa   :  { %272 = vmatprep.subr.bf16.mxu0 %v271_v16  ;;  %297 = vmatpush3.bf16.msra.mxu1 %v296_v31  ;;  %v281_v40 = vpack.c.bf16 %v26_v36, %v25_v35  ;;  %v283_v41 = vpack.c.bf16 %v44_v38, %v43_v37  ;;  %v27_v42 = vld [vmem:[%s450_s1 + $0x50] sm:$0xff]  ;;  %v28_v43 = vld [vmem:[%s450_s1 + $0x58] sm:$0xff]  ;;  %v45_v44 = vld [vmem:[%s450_s1 + $0xe0] sm:$0xff] }
   0xb   :  { %298 = vmatprep.subr.bf16.mxu1 %v304_v3  ;;  %v46_v45 = vld [vmem:[%s450_s1 + $0xe8] sm:$0xff]  ;;  %v16_v46 = vld [vmem:[%s451_s0 + $0x10] sm:$0xff]  ;;  %v285_v47 = vpack.c.bf16 %v28_v43, %v27_v42  ;;  %v29_v49 = vld [vmem:[%s450_s1 + $0x60] sm:$0xff] }
   0xc   :  { %v287_v48 = vpack.c.bf16 %v46_v45, %v45_v44  ;;  %v30_v50 = vld [vmem:[%s450_s1 + $0x68] sm:$0xff]  ;;  %v47_v51 = vld [vmem:[%s450_s1 + $0xf0] sm:$0xff]  ;;  %v48_v52 = vld [vmem:[%s450_s1 + $0xf8] sm:$0xff] }
   0xd   :  { %274 = vmatpush3.bf16.msra.mxu0 %v273_v21  ;;  %v289_v53 = vpack.c.bf16 %v30_v50, %v29_v49  ;;  %v291_v54 = vpack.c.bf16 %v48_v52, %v47_v51  ;;  %v31_v55 = vld [vmem:[%s450_s1 + $0x70] sm:$0xff]  ;;  %v32_v56 = vld [vmem:[%s450_s1 + $0x78] sm:$0xff]  ;;  %v14_v58 = vld [vmem:[%s451_s0] sm:$0xff] }
   0xe   :  { %276 = vmatprep.subr.bf16.mxu0 %v275_v22  ;;  %300 = vmatpush3.bf16.msra.mxu1 %v299_v39  ;;  %v293_v57 = vpack.c.bf16 %v32_v56, %v31_v55  ;;  %v210_v63 = vld [vmem:[%s452_s2] ss:$0 sm:$0xff] }
  0x11   :  { %278 = vmatpush3.bf16.msra.mxu0 %v277_v30  ;;  %261 = vmatmul.mubr.msk.f32.vlgmr.msra.gmra.mrb[0].mxu1 %vm60_vm1, %v16_v46 }
  0x12   :  { %280 = vmatprep.subr.bf16.mxu0 %v279_v34 }
  0x15   :  { %282 = vmatpush3.bf16.msra.mxu0 %v281_v40 }
  0x16   :  { %284 = vmatprep.subr.bf16.mxu0 %v283_v41 }
  0x19   :  { %286 = vmatpush3.bf16.msra.mxu0 %v285_v47 }
  0x1a   :  { %288 = vmatprep.subr.bf16.mxu0 %v287_v48 }
  0x1d   :  { %290 = vmatpush3.bf16.msra.mxu0 %v289_v53 }
  0x1e   :  { %292 = vmatprep.subr.bf16.mxu0 %v291_v54 }
  0x21   :  { %294 = vmatpush3.bf16.msra.mxu0 %v293_v57 }
  0x24   :  { %129 = vmatmul.mubr.f32.vlgmr.msra.gmra.mrb[0].mxu0 %v14_v58 }
  0xe4   :  { %v200_v59 = vpop.f32.mrb[0].mxu1 }
  0xe5   :  { %v262_v60 = vpop.f32.mrb[1].mxu1 }
  0xf7   :  { %v244_v61 = vpop.f32.mrb[0].mxu0 }
  0xf8   :  { %v245_v62 = vpop.f32.mrb[1].mxu0 }
  0xf9   :  { %v246_v0 = vadd.f32 %v245_v62, %v244_v61 }
  0xfb   :  { %v131_v1 = vadd.f32 %v246_v0, %v210_v63 }
  0xfd   :  { %v201_v2 = vadd.f32 %v200_v59, %v131_v1 }
  0xff   :  { %v204_v3 = vmax.f32 %v201_v2, 0.0 }
 0x101   :  { %205 = vst [vmem:[%s453_s3] sm:$0xff] %v204_v3 }

// kernel: nn_prototype_forward.13
= control target key start
LH: loop header
LB: loop body
LE: loop exit
PB: predicated region body
PF: predicated region fallthrough
CT: control target
= control target key end

     0   :  { %vm37_vm0 = vcmask 785408   ;;  %s321_s1 = inlined_call_operand.vmem [shape: f32[96,128], index: 1, kind: input, shape index: {}]   ;;  %s322_s0 = inlined_call_operand.vmem [shape: f32[32,96], index: 0, kind: input, shape index: {}]   ;;  %s323_s2 = inlined_call_operand.vmem [shape: f32[1,128], index: 2, kind: input, shape index: {}]   ;;  %s324_s3 = inlined_call_operand.vmem [shape: f32[32,128], index: 3, kind: output, shape index: {}]  }
   0x1   :  { %v18_v0 = vld [vmem:[%s321_s1] sm:$0xff]  ;;  %v19_v1 = vld [vmem:[%s321_s1 + $0x8] sm:$0xff]  ;;  %v20_v2 = vld [vmem:[%s321_s1 + $0x10] sm:$0xff] }
   0x2   :  { %v198_v3 = vpack.c.bf16 %v19_v1, %v18_v0  ;;  %v21_v4 = vld [vmem:[%s321_s1 + $0x18] sm:$0xff]  ;;  %v22_v6 = vld [vmem:[%s321_s1 + $0x20] sm:$0xff]  ;;  %v23_v7 = vld [vmem:[%s321_s1 + $0x28] sm:$0xff] }
   0x3   :  { %v202_v5 = vpack.c.bf16 %v21_v4, %v20_v2  ;;  %v14_v8 = vld [vmem:[%s322_s0] sm:$0xff]  ;;  %v16_v9 = vld [vmem:[%s322_s0 + $0x10] sm:$0xff]  ;;  %v206_v10 = vpack.c.bf16 %v23_v7, %v22_v6  ;;  %v25_v12 = vld [vmem:[%s321_s1 + $0x38] sm:$0xff] }
   0x4   :  { %199 = vmatprep.subr.bf16.mxu0 %v198_v3  ;;  %222 = vmatprep.subr.bf16.mxu1 %v198_v3  ;;  %v24_v11 = vld [vmem:[%s321_s1 + $0x30] sm:$0xff]  ;;  %v26_v14 = vld [vmem:[%s321_s1 + $0x40] sm:$0xff]  ;;  %v27_v15 = vld [vmem:[%s321_s1 + $0x48] sm:$0xff] }
   0x5   :  { %201 = vmatpush3.bf16.msra.mxu0 %v198_v3  ;;  %228 = vmatpush3.bf16.msra.mxu1 %v198_v3  ;;  %v210_v13 = vpack.c.bf16 %v25_v12, %v24_v11  ;;  %v214_v16 = vpack.c.bf16 %v27_v15, %v26_v14  ;;  %v28_v17 = vld [vmem:[%s321_s1 + $0x50] sm:$0xff]  ;;  %v29_v18 = vld [vmem:[%s321_s1 + $0x58] sm:$0xff]  ;;  %v15_v20 = vld [vmem:[%s322_s0 + $0x8] sm:$0xff] }
   0x6   :  { %203 = vmatprep.subr.bf16.mxu0 %v202_v5  ;;  %223 = vmatprep.subr.bf16.mxu1 %v202_v5  ;;  %v218_v19 = vpack.c.bf16 %v29_v18, %v28_v17  ;;  %v17_v21 = vld [vmem:[%s322_s0 + $0x18] sm:$0xff]  ;;  %v147_v22 = vld [vmem:[%s323_s2] ss:$0 sm:$0xff] }
   0x7   :  { %192 = vmatprep.mubr.msk.f32.mxu0 %vm37_vm0, %v14_v8  ;;  %195 = vmatprep.mubr.msk.f32.mxu1 %vm37_vm0, %v16_v9 }
   0x9   :  { %205 = vmatpush3.bf16.msra.mxu0 %v202_v5  ;;  %229 = vmatpush3.bf16.msra.mxu1 %v202_v5 }
   0xa   :  { %207 = vmatprep.subr.bf16.mxu0 %v206_v10  ;;  %224 = vmatprep.subr.bf16.mxu1 %v206_v10 }
   0xd   :  { %209 = vmatpush3.bf16.msra.mxu0 %v206_v10  ;;  %230 = vmatpush3.bf16.msra.mxu1 %v206_v10 }
   0xe   :  { %211 = vmatprep.subr.bf16.mxu0 %v210_v13  ;;  %225 = vmatprep.subr.bf16.mxu1 %v210_v13 }
  0x11   :  { %213 = vmatpush3.bf16.msra.mxu0 %v210_v13  ;;  %231 = vmatpush3.bf16.msra.mxu1 %v210_v13 }
  0x12   :  { %215 = vmatprep.subr.bf16.mxu0 %v214_v16  ;;  %226 = vmatprep.subr.bf16.mxu1 %v214_v16 }
  0x15   :  { %217 = vmatpush3.bf16.msra.mxu0 %v214_v16  ;;  %232 = vmatpush3.bf16.msra.mxu1 %v214_v16 }
  0x16   :  { %219 = vmatprep.subr.bf16.mxu0 %v218_v19  ;;  %227 = vmatprep.subr.bf16.mxu1 %v218_v19 }
  0x19   :  { %221 = vmatpush3.bf16.msra.mxu0 %v218_v19  ;;  %233 = vmatpush3.bf16.msra.mxu1 %v218_v19 }
  0x1c   :  { %193 = vmatmul.mubr.msk.f32.vlgmr.msra.gmra.mrb[0].mxu0 %vm37_vm0, %v15_v20  ;;  %196 = vmatmul.mubr.msk.f32.vlgmr.msra.gmra.mrb[0].mxu1 %vm37_vm0, %v17_v21 }
  0xef   :  { %v194_v23 = vpop.f32.mrb[0].mxu0  ;;  %v197_v24 = vpop.f32.mrb[0].mxu1 }
  0xf0   :  { %v122_v25 = vadd.f32 %v194_v23, %v147_v22  ;;  %v132_v26 = vadd.f32 %v197_v24, %v147_v22  ;;  %v116_v27 = vpop.f32.mrb[1].mxu0  ;;  %v126_v28 = vpop.f32.mrb[1].mxu1 }
  0xf1   :  { %v117_v29 = vadd.f32 %v147_v22, %v116_v27  ;;  %v127_v30 = vadd.f32 %v147_v22, %v126_v28 }
  0xf2   :  { %v136_v31 = vmax.f32 %v122_v25, 0.0  ;;  %v138_v32 = vmax.f32 %v132_v26, 0.0 }
  0xf3   :  { %v135_v33 = vmax.f32 %v117_v29, 0.0  ;;  %v137_v34 = vmax.f32 %v127_v30, 0.0 }
  0xf4   :  { %140 = vst [vmem:[%s324_s3 + $0x8] sm:$0xff] %v136_v31  ;;  %142 = vst [vmem:[%s324_s3 + $0x18] sm:$0xff] %v138_v32 }
  0xf5   :  { %139 = vst [vmem:[%s324_s3] sm:$0xff] %v135_v33  ;;  %141 = vst [vmem:[%s324_s3 + $0x10] sm:$0xff] %v137_v34 }

// kernel: nn_prototype_forward.15
= control target key start
LH: loop header
LB: loop body
LE: loop exit
PB: predicated region body
PF: predicated region fallthrough
CT: control target
= control target key end

     0   :  { %v1487_v0 = vmov 0.0|0.0   ;;  %vm1488_vm0 = vmmov 0   ;;  %v1489_v6 = vmov 0.0   ;;  %vm204_vm1 = vcmask 261120   ;;  %s2560_s1 = inlined_call_operand.vmem [shape: f32[288,128], index: 1, kind: input, shape index: {}]   ;;  %s2561_s0 = inlined_call_operand.vmem [shape: f32[392,288], index: 0, kind: input, shape index: {}]   ;;  %s2562_s2 = inlined_call_operand.vmem [shape: f32[1,128], index: 2, kind: input, shape index: {}]   ;;  %s2563_s3 = inlined_call_operand.vmem [shape: f32[392,128], index: 3, kind: output, shape index: {}]  }
   0x1   :  { %1332 = vmatprep.subr.bf16.mxu1 %v1487_v0  ;;  %v161_v1 = vld [vmem:[%s2560_s1] sm:$0xff]  ;;  %v162_v2 = vld [vmem:[%s2560_s1 + $0x8] sm:$0xff]  ;;  %v163_v3 = vld [vmem:[%s2560_s1 + $0x10] sm:$0xff]  ;;  %1380 = vmatprep.subr.bf16.mxu0 %v1487_v0 }
   0x2   :  { %v1333_v4 = vpack.c.bf16 %v162_v2, %v161_v1  ;;  %v164_v5 = vld [vmem:[%s2560_s1 + $0x18] sm:$0xff]  ;;  %1185 = vmatprep.mubr.msk.f32.mxu0 %vm1488_vm0, %v1489_v6  ;;  %v165_v8 = vld [vmem:[%s2560_s1 + $0x20] sm:$0xff]  ;;  %v166_v9 = vld [vmem:[%s2560_s1 + $0x28] sm:$0xff] }
   0x3   :  { %v1336_v7 = vpack.c.bf16 %v164_v5, %v163_v3  ;;  %v1339_v10 = vpack.c.bf16 %v166_v9, %v165_v8  ;;  %v167_v11 = vld [vmem:[%s2560_s1 + $0x30] sm:$0xff]  ;;  %v168_v12 = vld [vmem:[%s2560_s1 + $0x38] sm:$0xff]  ;;  %v193_v13 = vld [vmem:[%s2560_s1 + $0x100] sm:$0xff] }
   0x4   :  { %1334 = vmatpush1.bf16.msra.mxu1 %v1333_v4  ;;  %v194_v14 = vld [vmem:[%s2560_s1 + $0x108] sm:$0xff]  ;;  %v1342_v15 = vpack.c.bf16 %v168_v12, %v167_v11  ;;  %v195_v17 = vld [vmem:[%s2560_s1 + $0x110] sm:$0xff]  ;;  %v196_v18 = vld [vmem:[%s2560_s1 + $0x118] sm:$0xff] }
   0x5   :  { %1335 = vmatprep.subr.bf16.mxu1 %v1487_v0  ;;  %v1381_v16 = vpack.c.bf16 %v194_v14, %v193_v13  ;;  %v169_v19 = vld [vmem:[%s2560_s1 + $0x40] sm:$0xff]  ;;  %v170_v20 = vld [vmem:[%s2560_s1 + $0x48] sm:$0xff]  ;;  %v1384_v22 = vpack.c.bf16 %v196_v18, %v195_v17  ;;  %v171_v24 = vld [vmem:[%s2560_s1 + $0x50] sm:$0xff] }
   0x6   :  { %v15_v21 = vld [vmem:[%s2561_s0 + $0x8] sm:$0xff]  ;;  %v1345_v23 = vpack.c.bf16 %v170_v20, %v169_v19  ;;  %v172_v25 = vld [vmem:[%s2560_s1 + $0x58] sm:$0xff]  ;;  %v16_v26 = vld [vmem:[%s2561_s0 + $0x10] sm:$0xff] }
   0x7   :  { %1382 = vmatpush3.bf16.msra.mxu0 %v1381_v16  ;;  %416 = vmatprep.mubr.f32.mxu1 %v15_v21  ;;  %v1348_v27 = vpack.c.bf16 %v172_v25, %v171_v24  ;;  %v173_v28 = vld [vmem:[%s2560_s1 + $0x60] sm:$0xff]  ;;  %v174_v29 = vld [vmem:[%s2560_s1 + $0x68] sm:$0xff]  ;;  %v175_v32 = vld [vmem:[%s2560_s1 + $0x70] sm:$0xff] }
   0x8   :  { %1337 = vmatpush1.bf16.msra.mxu1 %v1336_v7  ;;  %1383 = vmatprep.subr.bf16.mxu0 %v1487_v0  ;;  %v19_v30 = vld [vmem:[%s2561_s0 + $0x28] sm:$0xff]  ;;  %v1351_v31 = vpack.c.bf16 %v174_v29, %v173_v28  ;;  %v176_v33 = vld [vmem:[%s2560_s1 + $0x78] sm:$0xff]  ;;  %v22_v34 = vld [vmem:[%s2561_s0 + $0x40] sm:$0xff] }
   0x9   :  { %1338 = vmatprep.subr.bf16.mxu1 %v1487_v0  ;;  %v1354_v35 = vpack.c.bf16 %v176_v33, %v175_v32  ;;  %v177_v36 = vld [vmem:[%s2560_s1 + $0x80] sm:$0xff]  ;;  %v178_v37 = vld [vmem:[%s2560_s1 + $0x88] sm:$0xff]  ;;  %v25_v38 = vld [vmem:[%s2561_s0 + $0x58] sm:$0xff] }
   0xa   :  { %v1357_v39 = vpack.c.bf16 %v178_v37, %v177_v36  ;;  %v179_v40 = vld [vmem:[%s2560_s1 + $0x90] sm:$0xff]  ;;  %v180_v41 = vld [vmem:[%s2560_s1 + $0x98] sm:$0xff]  ;;  %v181_v44 = vld [vmem:[%s2560_s1 + $0xa0] sm:$0xff] }
   0xb   :  { %1385 = vmatpush3.bf16.msra.mxu0 %v1384_v22  ;;  %v28_v42 = vld [vmem:[%s2561_s0 + $0x70] sm:$0xff]  ;;  %v1360_v43 = vpack.c.bf16 %v180_v41, %v179_v40  ;;  %v182_v45 = vld [vmem:[%s2560_s1 + $0xa8] sm:$0xff]  ;;  %v184_v49 = vld [vmem:[%s2560_s1 + $0xb8] sm:$0xff] }
   0xc   :  { %1340 = vmatpush1.bf16.msra.mxu1 %v1339_v10  ;;  %v31_v46 = vld [vmem:[%s2561_s0 + $0x88] sm:$0xff]  ;;  %v1363_v47 = vpack.c.bf16 %v182_v45, %v181_v44  ;;  %v183_v48 = vld [vmem:[%s2560_s1 + $0xb0] sm:$0xff]  ;;  %v34_v50 = vld [vmem:[%s2561_s0 + $0xa0] sm:$0xff] }
   0xd   :  { %1341 = vmatprep.subr.bf16.mxu1 %v1487_v0  ;;  %v1366_v51 = vpack.c.bf16 %v184_v49, %v183_v48  ;;  %v185_v52 = vld [vmem:[%s2560_s1 + $0xc0] sm:$0xff]  ;;  %v186_v53 = vld [vmem:[%s2560_s1 + $0xc8] sm:$0xff]  ;;  %v37_v54 = vld [vmem:[%s2561_s0 + $0xb8] sm:$0xff] }
   0xe   :  { %1186 = vmatmul.mubr.msk.f32.vlgmr.msra.gmra.mrb[0].mxu0 %vm204_vm1, %v16_v26  ;;  %v1369_v55 = vpack.c.bf16 %v186_v53, %v185_v52  ;;  %v187_v56 = vld [vmem:[%s2560_s1 + $0xd0] sm:$0xff]  ;;  %v188_v57 = vld [vmem:[%s2560_s1 + $0xd8] sm:$0xff]  ;;  %v189_v60 = vld [vmem:[%s2560_s1 + $0xe0] sm:$0xff] }
   0xf   :  { %1188 = vmatprep.mubr.msk.f32.mxu0 %vm1488_vm0, %v1489_v6  ;;  %v40_v58 = vld [vmem:[%s2561_s0 + $0xd0] sm:$0xff]  ;;  %v1372_v59 = vpack.c.bf16 %v188_v57, %v187_v56  ;;  %v190_v61 = vld [vmem:[%s2560_s1 + $0xe8] sm:$0xff]  ;;  %v192_v2 = vld [vmem:[%s2560_s1 + $0xf8] sm:$0xff] }
  0x10   :  { %1343 = vmatpush1.bf16.msra.mxu1 %v1342_v15  ;;  %v43_v62 = vld [vmem:[%s2561_s0 + $0xe8] sm:$0xff]  ;;  %v1375_v63 = vpack.c.bf16 %v190_v61, %v189_v60  ;;  %v191_v1 = vld [vmem:[%s2560_s1 + $0xf0] sm:$0xff]  ;;  %v46_v3 = vld [vmem:[%s2561_s0 + $0x100] sm:$0xff] }
  0x11   :  { %1344 = vmatprep.subr.bf16.mxu1 %v1487_v0  ;;  %v1378_v4 = vpack.c.bf16 %v192_v2, %v191_v1  ;;  %v49_v5 = vld [vmem:[%s2561_s0 + $0x118] sm:$0xff]  ;;  %v14_v7 = vld [vmem:[%s2561_s0] sm:$0xff]  ;;  %v55_v11 = vld [vmem:[%s2561_s0 + $0x148] sm:$0xff] }
  0x12   :  { %1189 = vmatmul.mubr.msk.f32.gmra.mrb[2].mxu0 %vm204_vm1, %v19_v30  ;;  %v18_v8 = vld [vmem:[%s2561_s0 + $0x20] sm:$0xff]  ;;  %v17_v9 = vld [vmem:[%s2561_s0 + $0x18] sm:$0xff]  ;;  %v20_v12 = vld [vmem:[%s2561_s0 + $0x30] sm:$0xff] }
  0x13   :  { %1191 = vmatprep.mubr.msk.f32.mxu0 %vm1488_vm0, %v1489_v6  ;;  %v21_v10 = vld [vmem:[%s2561_s0 + $0x38] sm:$0xff]  ;;  %v24_v13 = vld [vmem:[%s2561_s0 + $0x50] sm:$0xff]  ;;  %v58_v14 = vld [vmem:[%s2561_s0 + $0x160] sm:$0xff] }
  0x14   :  { %1346 = vmatpush1.bf16.msra.mxu1 %v1345_v23  ;;  %v23_v15 = vld [vmem:[%s2561_s0 + $0x48] sm:$0xff]  ;;  %v61_v17 = vld [vmem:[%s2561_s0 + $0x178] sm:$0xff]  ;;  %v26_v18 = vld [vmem:[%s2561_s0 + $0x60] sm:$0xff] }
  0x15   :  { %1347 = vmatprep.subr.bf16.mxu1 %v1487_v0  ;;  %v27_v16 = vld [vmem:[%s2561_s0 + $0x68] sm:$0xff]  ;;  %v30_v19 = vld [vmem:[%s2561_s0 + $0x80] sm:$0xff]  ;;  %v64_v20 = vld [vmem:[%s2561_s0 + $0x190] sm:$0xff] }
  0x16   :  { %1192 = vmatmul.mubr.msk.f32.gmra.mrb[4].mxu0 %vm204_vm1, %v22_v34  ;;  %v29_v21 = vld [vmem:[%s2561_s0 + $0x78] sm:$0xff]  ;;  %v67_v23 = vld [vmem:[%s2561_s0 + $0x1a8] sm:$0xff]  ;;  %v32_v24 = vld [vmem:[%s2561_s0 + $0x90] sm:$0xff] }
  0x17   :  { %1194 = vmatprep.mubr.msk.f32.mxu0 %vm1488_vm0, %v1489_v6  ;;  %v33_v22 = vld [vmem:[%s2561_s0 + $0x98] sm:$0xff]  ;;  %v36_v25 = vld [vmem:[%s2561_s0 + $0xb0] sm:$0xff]  ;;  %v70_v26 = vld [vmem:[%s2561_s0 + $0x1c0] sm:$0xff] }
  0x18   :  { %1349 = vmatpush1.bf16.msra.mxu1 %v1348_v27  ;;  %v35_v27 = vld [vmem:[%s2561_s0 + $0xa8] sm:$0xff]  ;;  %v73_v29 = vld [vmem:[%s2561_s0 + $0x1d8] sm:$0xff]  ;;  %v38_v30 = vld [vmem:[%s2561_s0 + $0xc0] sm:$0xff] }
  0x19   :  { %1350 = vmatprep.subr.bf16.mxu1 %v1487_v0  ;;  %v39_v28 = vld [vmem:[%s2561_s0 + $0xc8] sm:$0xff]  ;;  %v76_v32 = vld [vmem:[%s2561_s0 + $0x1f0] sm:$0xff]  ;;  %v41_v33 = vld [vmem:[%s2561_s0 + $0xd8] sm:$0xff] }
  0x1a   :  { %1195 = vmatmul.mubr.msk.f32.gmra.mrb[6].mxu0 %vm204_vm1, %v25_v38  ;;  %v45_v34 = vld [vmem:[%s2561_s0 + $0xf8] sm:$0xff]  ;;  %v44_v36 = vld [vmem:[%s2561_s0 + $0xf0] sm:$0xff]  ;;  %v82_v38 = vld [vmem:[%s2561_s0 + $0x220] sm:$0xff] }
  0x1b   :  { %1197 = vmatprep.mubr.msk.f32.mxu0 %vm1488_vm0, %v1489_v6  ;;  %v48_v37 = vld [vmem:[%s2561_s0 + $0x110] sm:$0xff]  ;;  %v51_v40 = vld [vmem:[%s2561_s0 + $0x128] sm:$0xff]  ;;  %v85_v41 = vld [vmem:[%s2561_s0 + $0x238] sm:$0xff] }
  0x1c   :  { %1352 = vmatpush1.bf16.msra.mxu1 %v1351_v31  ;;  %v42_v31 = vld [vmem:[%s2561_s0 + $0xe0] sm:$0xff]  ;;  %v88_v44 = vld [vmem:[%s2561_s0 + $0x250] sm:$0xff]  ;;  %v53_v45 = vld [vmem:[%s2561_s0 + $0x138] sm:$0xff] }
  0x1d   :  { %1353 = vmatprep.subr.bf16.mxu1 %v1487_v0  ;;  %v56_v48 = vld [vmem:[%s2561_s0 + $0x150] sm:$0xff]  ;;  %v63_v52 = vld [vmem:[%s2561_s0 + $0x188] sm:$0xff]  ;;  %v97_v53 = vld [vmem:[%s2561_s0 + $0x298] sm:$0xff] }
  0x1e   :  { %1198 = vmatmul.mubr.msk.f32.gmra.mrb[8].mxu0 %vm204_vm1, %v28_v42  ;;  %v50_v42 = vld [vmem:[%s2561_s0 + $0x120] sm:$0xff]  ;;  %v60_v49 = vld [vmem:[%s2561_s0 + $0x170] sm:$0xff]  ;;  %v65_v57 = vld [vmem:[%s2561_s0 + $0x198] sm:$0xff] }
  0x1f   :  { %1200 = vmatprep.mubr.msk.f32.mxu0 %vm1488_vm0, %v1489_v6  ;;  %v100_v56 = vld [vmem:[%s2561_s0 + $0x2b0] sm:$0xff]  ;;  %v75_v1 = vld [vmem:[%s2561_s0 + $0x1e8] sm:$0xff]  ;;  %v109_v2 = vld [vmem:[%s2561_s0 + $0x2f8] sm:$0xff] }
  0x20   :  { %1355 = vmatpush1.bf16.msra.mxu1 %v1354_v35  ;;  %v79_v35 = vld [vmem:[%s2561_s0 + $0x208] sm:$0xff]  ;;  %v68_v60 = vld [vmem:[%s2561_s0 + $0x1b0] sm:$0xff] }
  0x21   :  { %1356 = vmatprep.subr.bf16.mxu1 %v1487_v0  ;;  %v72_v61 = vld [vmem:[%s2561_s0 + $0x1d0] sm:$0xff] }
  0x22   :  { %1201 = vmatmul.mubr.msk.f32.gmra.mrb[10].mxu0 %vm204_vm1, %v31_v46  ;;  %v57_v46 = vld [vmem:[%s2561_s0 + $0x158] sm:$0xff] }
  0x23   :  { %1203 = vmatprep.mubr.msk.f32.mxu0 %vm1488_vm0, %v1489_v6 }
  0x24   :  { %1358 = vmatpush1.bf16.msra.mxu1 %v1357_v39  ;;  %v47_v39 = vld [vmem:[%s2561_s0 + $0x108] sm:$0xff] }
  0x25   :  { %1359 = vmatprep.subr.bf16.mxu1 %v1487_v0 }
  0x26   :  { %1204 = vmatmul.mubr.msk.f32.gmra.mrb[12].mxu0 %vm204_vm1, %v34_v50  ;;  %v94_v50 = vld [vmem:[%s2561_s0 + $0x280] sm:$0xff] }
  0x27   :  { %1206 = vmatprep.mubr.msk.f32.mxu0 %vm1488_vm0, %v1489_v6 }
  0x28   :  { %1361 = vmatpush1.bf16.msra.mxu1 %v1360_v43  ;;  %v54_v43 = vld [vmem:[%s2561_s0 + $0x140] sm:$0xff] }
  0x29   :  { %1362 = vmatprep.subr.bf16.mxu1 %v1487_v0 }
  0x2a   :  { %1207 = vmatmul.mubr.msk.f32.gmra.mrb[14].mxu0 %vm204_vm1, %v37_v54  ;;  %v62_v54 = vld [vmem:[%s2561_s0 + $0x180] sm:$0xff] }
  0x2b   :  { %1209 = vmatprep.mubr.msk.f32.mxu0 %vm1488_vm0, %v1489_v6 }
  0x2c   :  { %1364 = vmatpush1.bf16.msra.mxu1 %v1363_v47  ;;  %v91_v47 = vld [vmem:[%s2561_s0 + $0x268] sm:$0xff] }
  0x2d   :  { %1365 = vmatprep.subr.bf16.mxu1 %v1487_v0 }
  0x2e   :  { %1210 = vmatmul.mubr.msk.f32.gmra.mrb[16].mxu0 %vm204_vm1, %v40_v58  ;;  %v69_v58 = vld [vmem:[%s2561_s0 + $0x1b8] sm:$0xff] }
  0x2f   :  { %1212 = vmatprep.mubr.msk.f32.mxu0 %vm1488_vm0, %v1489_v6 }
  0x30   :  { %1367 = vmatpush1.bf16.msra.mxu1 %v1366_v51  ;;  %v59_v51 = vld [vmem:[%s2561_s0 + $0x168] sm:$0xff] }
  0x31   :  { %1368 = vmatprep.subr.bf16.mxu1 %v1487_v0 }
  0x32   :  { %1213 = vmatmul.mubr.msk.f32.gmra.mrb[18].mxu0 %vm204_vm1, %v43_v62  ;;  %v106_v62 = vld [vmem:[%s2561_s0 + $0x2e0] sm:$0xff] }
  0x33   :  { %1215 = vmatprep.mubr.msk.f32.mxu0 %vm1488_vm0, %v1489_v6 }
  0x34   :  { %1370 = vmatpush1.bf16.msra.mxu1 %v1369_v55  ;;  %v66_v55 = vld [vmem:[%s2561_s0 + $0x1a0] sm:$0xff] }
  0x35   :  { %1371 = vmatprep.subr.bf16.mxu1 %v1487_v0 }
  0x36   :  { %1216 = vmatmul.mubr.msk.f32.gmra.mrb[20].mxu0 %vm204_vm1, %v46_v3  ;;  %v74_v3 = vld [vmem:[%s2561_s0 + $0x1e0] sm:$0xff] }
  0x37   :  { %1218 = vmatprep.mubr.msk.f32.mxu0 %vm1488_vm0, %v1489_v6 }
  0x38   :  { %1373 = vmatpush1.bf16.msra.mxu1 %v1372_v59  ;;  %v103_v59 = vld [vmem:[%s2561_s0 + $0x2c8] sm:$0xff] }
  0x39   :  { %1374 = vmatprep.subr.bf16.mxu1 %v1487_v0 }
  0x3a   :  { %1219 = vmatmul.mubr.msk.f32.gmra.mrb[22].mxu0 %vm204_vm1, %v49_v5  ;;  %v112_v5 = vld [vmem:[%s2561_s0 + $0x310] sm:$0xff] }
  0x3b   :  { %1221 = vmatprep.mubr.msk.f32.mxu0 %vm1488_vm0, %v1489_v6 }
  0x3c   :  { %1376 = vmatpush1.bf16.msra.mxu1 %v1375_v63  ;;  %v71_v63 = vld [vmem:[%s2561_s0 + $0x1c8] sm:$0xff] }
  0x3d   :  { %1377 = vmatprep.subr.bf16.mxu1 %v1487_v0  ;;  %v52_v0 = vld [vmem:[%s2561_s0 + $0x130] sm:$0xff] }
  0x3e   :  { %1222 = vmatmul.mubr.msk.f32.gmra.mrb[24].mxu0 %vm204_vm1, %v52_v0  ;;  %v115_v0 = vld [vmem:[%s2561_s0 + $0x328] sm:$0xff] }
  0x3f   :  { %1224 = vmatprep.mubr.msk.f32.mxu0 %vm1488_vm0, %v1489_v6 }
  0x40   :  { %1379 = vmatpush1.bf16.msra.mxu1 %v1378_v4  ;;  %v78_v4 = vld [vmem:[%s2561_s0 + $0x200] sm:$0xff] }
  0x42   :  { %1225 = vmatmul.mubr.msk.f32.gmra.mrb[26].mxu0 %vm204_vm1, %v55_v11  ;;  %v118_v11 = vld [vmem:[%s2561_s0 + $0x340] sm:$0xff] }
  0x43   :  { %417 = vmatmul.mubr.f32.vlgmr.msra.gmra.mrb[0].mxu1 %v14_v7  ;;  %1227 = vmatprep.mubr.msk.f32.mxu0 %vm1488_vm0, %v1489_v6  ;;  %v77_v7 = vld [vmem:[%s2561_s0 + $0x1f8] sm:$0xff] }
  0x44   :  { %421 = vmatprep.mubr.f32.mxu1 %v18_v8  ;;  %v81_v8 = vld [vmem:[%s2561_s0 + $0x218] sm:$0xff] }
  0x46   :  { %1228 = vmatmul.mubr.msk.f32.gmra.mrb[28].mxu0 %vm204_vm1, %v58_v14  ;;  %v121_v14 = vld [vmem:[%s2561_s0 + $0x358] sm:$0xff] }
  0x47   :  { %422 = vmatmul.mubr.f32.gmra.mrb[2].mxu1 %v17_v9  ;;  %1230 = vmatprep.mubr.msk.f32.mxu0 %vm1488_vm0, %v1489_v6  ;;  %v80_v9 = vld [vmem:[%s2561_s0 + $0x210] sm:$0xff] }
  0x48   :  { %426 = vmatprep.mubr.f32.mxu1 %v21_v10  ;;  %v84_v10 = vld [vmem:[%s2561_s0 + $0x230] sm:$0xff] }
  0x4a   :  { %1231 = vmatmul.mubr.msk.f32.gmra.mrb[30].mxu0 %vm204_vm1, %v61_v17  ;;  %v124_v17 = vld [vmem:[%s2561_s0 + $0x370] sm:$0xff] }
  0x4b   :  { %427 = vmatmul.mubr.f32.gmra.mrb[4].mxu1 %v20_v12  ;;  %1233 = vmatprep.mubr.msk.f32.mxu0 %vm1488_vm0, %v1489_v6  ;;  %v83_v12 = vld [vmem:[%s2561_s0 + $0x228] sm:$0xff] }
  0x4c   :  { %431 = vmatprep.mubr.f32.mxu1 %v24_v13  ;;  %v87_v13 = vld [vmem:[%s2561_s0 + $0x248] sm:$0xff] }
  0x4e   :  { %1234 = vmatmul.mubr.msk.f32.gmra.mrb[32].mxu0 %vm204_vm1, %v64_v20  ;;  %v127_v20 = vld [vmem:[%s2561_s0 + $0x388] sm:$0xff] }
  0x4f   :  { %432 = vmatmul.mubr.f32.gmra.mrb[6].mxu1 %v23_v15  ;;  %1236 = vmatprep.mubr.msk.f32.mxu0 %vm1488_vm0, %v1489_v6  ;;  %v86_v15 = vld [vmem:[%s2561_s0 + $0x240] sm:$0xff] }
  0x50   :  { %436 = vmatprep.mubr.f32.mxu1 %v27_v16  ;;  %v90_v16 = vld [vmem:[%s2561_s0 + $0x260] sm:$0xff] }
  0x52   :  { %1237 = vmatmul.mubr.msk.f32.gmra.mrb[34].mxu0 %vm204_vm1, %v67_v23  ;;  %v130_v23 = vld [vmem:[%s2561_s0 + $0x3a0] sm:$0xff] }
  0x53   :  { %437 = vmatmul.mubr.f32.gmra.mrb[8].mxu1 %v26_v18  ;;  %1239 = vmatprep.mubr.msk.f32.mxu0 %vm1488_vm0, %v1489_v6  ;;  %v89_v18 = vld [vmem:[%s2561_s0 + $0x258] sm:$0xff] }
  0x54   :  { %441 = vmatprep.mubr.f32.mxu1 %v30_v19  ;;  %v93_v19 = vld [vmem:[%s2561_s0 + $0x278] sm:$0xff] }
  0x56   :  { %1240 = vmatmul.mubr.msk.f32.gmra.mrb[36].mxu0 %vm204_vm1, %v70_v26  ;;  %v133_v26 = vld [vmem:[%s2561_s0 + $0x3b8] sm:$0xff] }
  0x57   :  { %442 = vmatmul.mubr.f32.gmra.mrb[10].mxu1 %v29_v21  ;;  %1242 = vmatprep.mubr.msk.f32.mxu0 %vm1488_vm0, %v1489_v6  ;;  %v92_v21 = vld [vmem:[%s2561_s0 + $0x270] sm:$0xff] }
  0x58   :  { %446 = vmatprep.mubr.f32.mxu1 %v33_v22  ;;  %v96_v22 = vld [vmem:[%s2561_s0 + $0x290] sm:$0xff] }
  0x5a   :  { %1243 = vmatmul.mubr.msk.f32.gmra.mrb[38].mxu0 %vm204_vm1, %v73_v29  ;;  %v136_v29 = vld [vmem:[%s2561_s0 + $0x3d0] sm:$0xff] }
  0x5b   :  { %447 = vmatmul.mubr.f32.gmra.mrb[12].mxu1 %v32_v24  ;;  %1245 = vmatprep.mubr.msk.f32.mxu0 %vm1488_vm0, %v1489_v6  ;;  %v95_v24 = vld [vmem:[%s2561_s0 + $0x288] sm:$0xff] }
  0x5c   :  { %451 = vmatprep.mubr.f32.mxu1 %v36_v25  ;;  %v99_v25 = vld [vmem:[%s2561_s0 + $0x2a8] sm:$0xff] }
  0x5e   :  { %1246 = vmatmul.mubr.msk.f32.gmra.mrb[40].mxu0 %vm204_vm1, %v76_v32  ;;  %v139_v32 = vld [vmem:[%s2561_s0 + $0x3e8] sm:$0xff] }
  0x5f   :  { %452 = vmatmul.mubr.f32.gmra.mrb[14].mxu1 %v35_v27  ;;  %1248 = vmatprep.mubr.msk.f32.mxu0 %vm1488_vm0, %v1489_v6  ;;  %v98_v27 = vld [vmem:[%s2561_s0 + $0x2a0] sm:$0xff] }
  0x60   :  { %456 = vmatprep.mubr.f32.mxu1 %v39_v28  ;;  %v102_v28 = vld [vmem:[%s2561_s0 + $0x2c0] sm:$0xff] }
  0x62   :  { %1249 = vmatmul.mubr.msk.f32.gmra.mrb[42].mxu0 %vm204_vm1, %v79_v35  ;;  %v142_v35 = vld [vmem:[%s2561_s0 + $0x400] sm:$0xff] }
  0x63   :  { %457 = vmatmul.mubr.f32.gmra.mrb[16].mxu1 %v38_v30  ;;  %1251 = vmatprep.mubr.msk.f32.mxu0 %vm1488_vm0, %v1489_v6  ;;  %v101_v30 = vld [vmem:[%s2561_s0 + $0x2b8] sm:$0xff] }
  0x64   :  { %461 = vmatprep.mubr.f32.mxu1 %v42_v31  ;;  %v105_v31 = vld [vmem:[%s2561_s0 + $0x2d8] sm:$0xff] }
  0x66   :  { %1252 = vmatmul.mubr.msk.f32.gmra.mrb[44].mxu0 %vm204_vm1, %v82_v38  ;;  %v145_v38 = vld [vmem:[%s2561_s0 + $0x418] sm:$0xff] }
  0x67   :  { %462 = vmatmul.mubr.f32.gmra.mrb[18].mxu1 %v41_v33  ;;  %1254 = vmatprep.mubr.msk.f32.mxu0 %vm1488_vm0, %v1489_v6  ;;  %v104_v33 = vld [vmem:[%s2561_s0 + $0x2d0] sm:$0xff] }
  0x68   :  { %466 = vmatprep.mubr.f32.mxu1 %v45_v34  ;;  %v108_v34 = vld [vmem:[%s2561_s0 + $0x2f0] sm:$0xff] }
  0x6a   :  { %1255 = vmatmul.mubr.msk.f32.gmra.mrb[46].mxu0 %vm204_vm1, %v85_v41  ;;  %v148_v41 = vld [vmem:[%s2561_s0 + $0x430] sm:$0xff] }
  0x6b   :  { %467 = vmatmul.mubr.f32.gmra.mrb[20].mxu1 %v44_v36  ;;  %1257 = vmatprep.mubr.msk.f32.mxu0 %vm1488_vm0, %v1489_v6  ;;  %v107_v36 = vld [vmem:[%s2561_s0 + $0x2e8] sm:$0xff] }
  0x6c   :  { %471 = vmatprep.mubr.f32.mxu1 %v48_v37  ;;  %v111_v37 = vld [vmem:[%s2561_s0 + $0x308] sm:$0xff] }
  0x6e   :  { %1258 = vmatmul.mubr.msk.f32.gmra.mrb[48].mxu0 %vm204_vm1, %v88_v44  ;;  %v151_v44 = vld [vmem:[%s2561_s0 + $0x448] sm:$0xff] }
  0x6f   :  { %472 = vmatmul.mubr.f32.gmra.mrb[22].mxu1 %v47_v39  ;;  %1260 = vmatprep.mubr.msk.f32.mxu0 %vm1488_vm0, %v1489_v6  ;;  %v110_v39 = vld [vmem:[%s2561_s0 + $0x300] sm:$0xff] }
  0x70   :  { %476 = vmatprep.mubr.f32.mxu1 %v51_v40  ;;  %v114_v40 = vld [vmem:[%s2561_s0 + $0x320] sm:$0xff] }
  0x72   :  { %1261 = vmatmul.mubr.msk.f32.gmra.mrb[50].mxu0 %vm204_vm1, %v91_v47  ;;  %v154_v47 = vld [vmem:[%s2561_s0 + $0x460] sm:$0xff] }
  0x73   :  { %477 = vmatmul.mubr.f32.gmra.mrb[24].mxu1 %v50_v42  ;;  %1263 = vmatprep.mubr.msk.f32.mxu0 %vm1488_vm0, %v1489_v6  ;;  %v113_v42 = vld [vmem:[%s2561_s0 + $0x318] sm:$0xff] }
  0x74   :  { %481 = vmatprep.mubr.f32.mxu1 %v54_v43  ;;  %v117_v43 = vld [vmem:[%s2561_s0 + $0x338] sm:$0xff] }
  0x76   :  { %1264 = vmatmul.mubr.msk.f32.gmra.mrb[52].mxu0 %vm204_vm1, %v94_v50  ;;  %v157_v50 = vld [vmem:[%s2561_s0 + $0x478] sm:$0xff] }
  0x77   :  { %482 = vmatmul.mubr.f32.gmra.mrb[26].mxu1 %v53_v45  ;;  %1266 = vmatprep.mubr.msk.f32.mxu0 %vm1488_vm0, %v1489_v6  ;;  %v116_v45 = vld [vmem:[%s2561_s0 + $0x330] sm:$0xff] }
  0x78   :  { %486 = vmatprep.mubr.f32.mxu1 %v57_v46  ;;  %v120_v46 = vld [vmem:[%s2561_s0 + $0x350] sm:$0xff] }
  0x7a   :  { %1267 = vmatmul.mubr.msk.f32.gmra.mrb[54].mxu0 %vm204_vm1, %v97_v53  ;;  %v160_v53 = vld [vmem:[%s2561_s0 + $0x490] sm:$0xff] }
  0x7b   :  { %487 = vmatmul.mubr.f32.gmra.mrb[28].mxu1 %v56_v48  ;;  %1269 = vmatprep.mubr.msk.f32.mxu0 %vm1488_vm0, %v1489_v6  ;;  %v119_v48 = vld [vmem:[%s2561_s0 + $0x348] sm:$0xff] }
  0x7c   :  { %491 = vmatprep.mubr.f32.mxu1 %v60_v49  ;;  %v123_v49 = vld [vmem:[%s2561_s0 + $0x368] sm:$0xff] }
  0x7e   :  { %1270 = vmatmul.mubr.msk.f32.gmra.mrb[56].mxu0 %vm204_vm1, %v100_v56  ;;  %v132_v56 = vld [vmem:[%s2561_s0 + $0x3b0] sm:$0xff] }
  0x7f   :  { %492 = vmatmul.mubr.f32.gmra.mrb[30].mxu1 %v59_v51  ;;  %1272 = vmatprep.mubr.msk.f32.mxu0 %vm1488_vm0, %v1489_v6  ;;  %v122_v51 = vld [vmem:[%s2561_s0 + $0x360] sm:$0xff] }
  0x80   :  { %496 = vmatprep.mubr.f32.mxu1 %v63_v52  ;;  %v126_v52 = vld [vmem:[%s2561_s0 + $0x380] sm:$0xff] }
  0x82   :  { %1273 = vmatmul.mubr.msk.f32.gmra.mrb[58].mxu0 %vm204_vm1, %v103_v59  ;;  %v134_v59 = vld [vmem:[%s2561_s0 + $0x3c0] sm:$0xff] }
  0x83   :  { %497 = vmatmul.mubr.f32.gmra.mrb[32].mxu1 %v62_v54  ;;  %1275 = vmatprep.mubr.msk.f32.mxu0 %vm1488_vm0, %v1489_v6  ;;  %v125_v54 = vld [vmem:[%s2561_s0 + $0x378] sm:$0xff] }
  0x84   :  { %501 = vmatprep.mubr.f32.mxu1 %v66_v55  ;;  %v129_v55 = vld [vmem:[%s2561_s0 + $0x398] sm:$0xff] }
  0x86   :  { %1276 = vmatmul.mubr.msk.f32.gmra.mrb[60].mxu0 %vm204_vm1, %v106_v62  ;;  %v141_v62 = vld [vmem:[%s2561_s0 + $0x3f8] sm:$0xff] }
  0x87   :  { %502 = vmatmul.mubr.f32.gmra.mrb[34].mxu1 %v65_v57  ;;  %1278 = vmatprep.mubr.msk.f32.mxu0 %vm1488_vm0, %v1489_v6  ;;  %v131_v57 = vld [vmem:[%s2561_s0 + $0x3a8] sm:$0xff] }
  0x88   :  { %506 = vmatprep.mubr.f32.mxu1 %v69_v58  ;;  %v135_v58 = vld [vmem:[%s2561_s0 + $0x3c8] sm:$0xff] }
  0x8a   :  { %1279 = vmatmul.mubr.msk.f32.gmra.mrb[62].mxu0 %vm204_vm1, %v109_v2  ;;  %v144_v2 = vld [vmem:[%s2561_s0 + $0x410] sm:$0xff] }
  0x8b   :  { %507 = vmatmul.mubr.f32.gmra.mrb[36].mxu1 %v68_v60  ;;  %1281 = vmatprep.mubr.msk.f32.mxu0 %vm1488_vm0, %v1489_v6  ;;  %v138_v60 = vld [vmem:[%s2561_s0 + $0x3e0] sm:$0xff] }
  0x8c   :  { %511 = vmatprep.mubr.f32.mxu1 %v72_v61  ;;  %v137_v61 = vld [vmem:[%s2561_s0 + $0x3d8] sm:$0xff] }
  0x8e   :  { %1282 = vmatmul.mubr.msk.f32.gmra.mrb[64].mxu0 %vm204_vm1, %v112_v5 }
  0x8f   :  { %512 = vmatmul.mubr.f32.gmra.mrb[38].mxu1 %v71_v63  ;;  %1284 = vmatprep.mubr.msk.f32.mxu0 %vm1488_vm0, %v1489_v6  ;;  %v140_v63 = vld [vmem:[%s2561_s0 + $0x3f0] sm:$0xff] }
  0x90   :  { %516 = vmatprep.mubr.f32.mxu1 %v75_v1 }
  0x92   :  { %1285 = vmatmul.mubr.msk.f32.gmra.mrb[66].mxu0 %vm204_vm1, %v115_v0  ;;  %v146_v0 = vld [vmem:[%s2561_s0 + $0x420] sm:$0xff] }
  0x93   :  { %517 = vmatmul.mubr.f32.gmra.mrb[40].mxu1 %v74_v3  ;;  %1287 = vmatprep.mubr.msk.f32.mxu0 %vm1488_vm0, %v1489_v6 }
  0x94   :  { %521 = vmatprep.mubr.f32.mxu1 %v78_v4  ;;  %v143_v4 = vld [vmem:[%s2561_s0 + $0x408] sm:$0xff] }
  0x96   :  { %1288 = vmatmul.mubr.msk.f32.gmra.mrb[68].mxu0 %vm204_vm1, %v118_v11 }
  0x97   :  { %522 = vmatmul.mubr.f32.gmra.mrb[42].mxu1 %v77_v7  ;;  %1290 = vmatprep.mubr.msk.f32.mxu0 %vm1488_vm0, %v1489_v6  ;;  %v147_v7 = vld [vmem:[%s2561_s0 + $0x428] sm:$0xff] }
  0x98   :  { %526 = vmatprep.mubr.f32.mxu1 %v81_v8 }
  0x9a   :  { %1291 = vmatmul.mubr.msk.f32.gmra.mrb[70].mxu0 %vm204_vm1, %v121_v14  ;;  %v153_v14 = vld [vmem:[%s2561_s0 + $0x458] sm:$0xff] }
  0x9b   :  { %527 = vmatmul.mubr.f32.gmra.mrb[44].mxu1 %v80_v9  ;;  %1293 = vmatprep.mubr.msk.f32.mxu0 %vm1488_vm0, %v1489_v6 }
  0x9c   :  { %531 = vmatprep.mubr.f32.mxu1 %v84_v10  ;;  %v150_v10 = vld [vmem:[%s2561_s0 + $0x440] sm:$0xff] }
  0x9e   :  { %1294 = vmatmul.mubr.msk.f32.gmra.mrb[72].mxu0 %vm204_vm1, %v124_v17 }
  0x9f   :  { %532 = vmatmul.mubr.f32.gmra.mrb[46].mxu1 %v83_v12  ;;  %1296 = vmatprep.mubr.msk.f32.mxu0 %vm1488_vm0, %v1489_v6  ;;  %v149_v12 = vld [vmem:[%s2561_s0 + $0x438] sm:$0xff] }
  0xa0   :  { %536 = vmatprep.mubr.f32.mxu1 %v87_v13 }
  0xa2   :  { %1297 = vmatmul.mubr.msk.f32.gmra.mrb[74].mxu0 %vm204_vm1, %v127_v20  ;;  %v155_v20 = vld [vmem:[%s2561_s0 + $0x468] sm:$0xff] }
  0xa3   :  { %537 = vmatmul.mubr.f32.gmra.mrb[48].mxu1 %v86_v15  ;;  %1299 = vmatprep.mubr.msk.f32.mxu0 %vm1488_vm0, %v1489_v6 }
  0xa4   :  { %541 = vmatprep.mubr.f32.mxu1 %v90_v16  ;;  %v152_v16 = vld [vmem:[%s2561_s0 + $0x450] sm:$0xff] }
  0xa6   :  { %1300 = vmatmul.mubr.msk.f32.gmra.mrb[76].mxu0 %vm204_vm1, %v130_v23 }
  0xa7   :  { %542 = vmatmul.mubr.f32.gmra.mrb[50].mxu1 %v89_v18  ;;  %1302 = vmatprep.mubr.msk.f32.mxu0 %vm1488_vm0, %v1489_v6  ;;  %v156_v18 = vld [vmem:[%s2561_s0 + $0x470] sm:$0xff] }
  0xa8   :  { %546 = vmatprep.mubr.f32.mxu1 %v93_v19 }
  0xaa   :  { %1303 = vmatmul.mubr.msk.f32.gmra.mrb[78].mxu0 %vm204_vm1, %v133_v26 }
  0xab   :  { %547 = vmatmul.mubr.f32.gmra.mrb[52].mxu1 %v92_v21  ;;  %1305 = vmatprep.mubr.msk.f32.mxu0 %vm1488_vm0, %v1489_v6 }
  0xac   :  { %551 = vmatprep.mubr.f32.mxu1 %v96_v22  ;;  %v159_v22 = vld [vmem:[%s2561_s0 + $0x488] sm:$0xff] }
  0xae   :  { %1306 = vmatmul.mubr.msk.f32.gmra.mrb[80].mxu0 %vm204_vm1, %v136_v29 }
  0xaf   :  { %552 = vmatmul.mubr.f32.gmra.mrb[54].mxu1 %v95_v24  ;;  %1308 = vmatprep.mubr.msk.f32.mxu0 %vm1488_vm0, %v1489_v6  ;;  %v158_v24 = vld [vmem:[%s2561_s0 + $0x480] sm:$0xff] }
  0xb0   :  { %556 = vmatprep.mubr.f32.mxu1 %v99_v25 }
  0xb2   :  { %1309 = vmatmul.mubr.msk.f32.gmra.mrb[82].mxu0 %vm204_vm1, %v139_v32 }
  0xb3   :  { %557 = vmatmul.mubr.f32.gmra.mrb[56].mxu1 %v98_v27  ;;  %1311 = vmatprep.mubr.msk.f32.mxu0 %vm1488_vm0, %v1489_v6 }
  0xb4   :  { %561 = vmatprep.mubr.f32.mxu1 %v102_v28 }
  0xb6   :  { %1312 = vmatmul.mubr.msk.f32.gmra.mrb[84].mxu0 %vm204_vm1, %v142_v35  ;;  %v2241_v35 = vld [vmem:[%s2562_s2] ss:$0 sm:$0xff] }
  0xb7   :  { %562 = vmatmul.mubr.f32.gmra.mrb[58].mxu1 %v101_v30  ;;  %1314 = vmatprep.mubr.msk.f32.mxu0 %vm1488_vm0, %v1489_v6 }
  0xb8   :  { %566 = vmatprep.mubr.f32.mxu1 %v105_v31 }
  0xba   :  { %1315 = vmatmul.mubr.msk.f32.gmra.mrb[86].mxu0 %vm204_vm1, %v145_v38 }
  0xbb   :  { %567 = vmatmul.mubr.f32.gmra.mrb[60].mxu1 %v104_v33  ;;  %1317 = vmatprep.mubr.msk.f32.mxu0 %vm1488_vm0, %v1489_v6 }
  0xbc   :  { %571 = vmatprep.mubr.f32.mxu1 %v108_v34 }
  0xbe   :  { %1318 = vmatmul.mubr.msk.f32.gmra.mrb[88].mxu0 %vm204_vm1, %v148_v41 }
  0xbf   :  { %572 = vmatmul.mubr.f32.gmra.mrb[62].mxu1 %v107_v36  ;;  %1320 = vmatprep.mubr.msk.f32.mxu0 %vm1488_vm0, %v1489_v6 }
  0xc0   :  { %576 = vmatprep.mubr.f32.mxu1 %v111_v37 }
  0xc2   :  { %1321 = vmatmul.mubr.msk.f32.gmra.mrb[90].mxu0 %vm204_vm1, %v151_v44 }
  0xc3   :  { %577 = vmatmul.mubr.f32.gmra.mrb[64].mxu1 %v110_v39  ;;  %1323 = vmatprep.mubr.msk.f32.mxu0 %vm1488_vm0, %v1489_v6 }
  0xc4   :  { %581 = vmatprep.mubr.f32.mxu1 %v114_v40 }
  0xc6   :  { %1324 = vmatmul.mubr.msk.f32.gmra.mrb[92].mxu0 %vm204_vm1, %v154_v47 }
  0xc7   :  { %582 = vmatmul.mubr.f32.gmra.mrb[66].mxu1 %v113_v42  ;;  %1326 = vmatprep.mubr.msk.f32.mxu0 %vm1488_vm0, %v1489_v6 }
  0xc8   :  { %586 = vmatprep.mubr.f32.mxu1 %v117_v43 }
  0xca   :  { %1327 = vmatmul.mubr.msk.f32.gmra.mrb[94].mxu0 %vm204_vm1, %v157_v50 }
  0xcb   :  { %587 = vmatmul.mubr.f32.gmra.mrb[68].mxu1 %v116_v45  ;;  %1329 = vmatprep.mubr.msk.f32.mxu0 %vm1488_vm0, %v1489_v6  ;;  %v128_v6 = vld [vmem:[%s2561_s0 + $0x390] sm:$0xff] }
  0xcc   :  { %591 = vmatprep.mubr.f32.mxu1 %v120_v46 }
  0xce   :  { %1330 = vmatmul.mubr.msk.f32.gmra.mrb[96].mxu0 %vm204_vm1, %v160_v53 }
  0xcf   :  { %592 = vmatmul.mubr.f32.gmra.mrb[70].mxu1 %v119_v48 }
  0xd0   :  { %596 = vmatprep.mubr.f32.mxu1 %v123_v49 }
  0xd3   :  { %597 = vmatmul.mubr.f32.gmra.mrb[72].mxu1 %v122_v51 }
  0xd4   :  { %601 = vmatprep.mubr.f32.mxu1 %v126_v52 }
  0xd7   :  { %602 = vmatmul.mubr.f32.gmra.mrb[74].mxu1 %v125_v54 }
  0xd8   :  { %606 = vmatprep.mubr.f32.mxu1 %v129_v55 }
  0xdb   :  { %607 = vmatmul.mubr.f32.gmra.mrb[76].mxu1 %v128_v6 }
  0xdc   :  { %611 = vmatprep.mubr.f32.mxu1 %v132_v56 }
  0xdf   :  { %612 = vmatmul.mubr.f32.gmra.mrb[78].mxu1 %v131_v57 }
  0xe0   :  { %616 = vmatprep.mubr.f32.mxu1 %v135_v58 }
  0xe1   :  { %v728_v1 = vpop.f32.mrb[0].mxu0 }
  0xe2   :  { %v1187_v3 = vpop.f32.mrb[1].mxu0 }
  0xe3   :  { %617 = vmatmul.mubr.f32.gmra.mrb[80].mxu1 %v134_v59 }
  0xe4   :  { %621 = vmatprep.mubr.f32.mxu1 %v138_v60 }
  0xe5   :  { %v733_v5 = vpop.f32.mrb[2].mxu0 }
  0xe6   :  { %v1190_v8 = vpop.f32.mrb[3].mxu0 }
  0xe7   :  { %622 = vmatmul.mubr.f32.gmra.mrb[82].mxu1 %v137_v61 }
  0xe8   :  { %626 = vmatprep.mubr.f32.mxu1 %v141_v62 }
  0xe9   :  { %v738_v9 = vpop.f32.mrb[4].mxu0 }
  0xea   :  { %v1193_v11 = vpop.f32.mrb[5].mxu0 }
  0xeb   :  { %627 = vmatmul.mubr.f32.gmra.mrb[84].mxu1 %v140_v63 }
  0xec   :  { %631 = vmatprep.mubr.f32.mxu1 %v144_v2 }
  0xed   :  { %v743_v13 = vpop.f32.mrb[6].mxu0 }
  0xee   :  { %v1196_v15 = vpop.f32.mrb[7].mxu0 }
  0xef   :  { %632 = vmatmul.mubr.f32.gmra.mrb[86].mxu1 %v143_v4 }
  0xf0   :  { %636 = vmatprep.mubr.f32.mxu1 %v147_v7 }
  0xf1   :  { %v2212_v17 = vpop.f32.mrb[8].mxu0 }
  0xf2   :  { %v1199_v19 = vpop.f32.mrb[9].mxu0 }
  0xf3   :  { %637 = vmatmul.mubr.f32.gmra.mrb[88].mxu1 %v146_v0 }
  0xf4   :  { %641 = vmatprep.mubr.f32.mxu1 %v150_v10 }
  0xf5   :  { %v2220_v21 = vpop.f32.mrb[10].mxu0 }
  0xf6   :  { %v1202_v23 = vpop.f32.mrb[11].mxu0 }
  0xf7   :  { %642 = vmatmul.mubr.f32.gmra.mrb[90].mxu1 %v149_v12 }
  0xf8   :  { %646 = vmatprep.mubr.f32.mxu1 %v153_v14 }
  0xf9   :  { %v2228_v25 = vpop.f32.mrb[12].mxu0 }
  0xfa   :  { %v1205_v26 = vpop.f32.mrb[13].mxu0 }
  0xfb   :  { %647 = vmatmul.mubr.f32.gmra.mrb[92].mxu1 %v152_v16 }
  0xfc   :  { %651 = vmatprep.mubr.f32.mxu1 %v156_v18 }
  0xfd   :  { %v2230_v27 = vpop.f32.mrb[14].mxu0 }
  0xfe   :  { %v1208_v28 = vpop.f32.mrb[15].mxu0 }
  0xff   :  { %652 = vmatmul.mubr.f32.gmra.mrb[94].mxu1 %v155_v20 }
 0x100   :  { %656 = vmatprep.mubr.f32.mxu1 %v159_v22 }
 0x101   :  { %v2232_v29 = vpop.f32.mrb[16].mxu0 }
 0x102   :  { %v1211_v30 = vpop.f32.mrb[17].mxu0 }
 0x103   :  { %657 = vmatmul.mubr.f32.gmra.mrb[96].mxu1 %v158_v24 }
 0x105   :  { %v2234_v31 = vpop.f32.mrb[18].mxu0 }
 0x106   :  { %v1214_v32 = vpop.f32.mrb[19].mxu0 }
 0x109   :  { %v2236_v33 = vpop.f32.mrb[20].mxu0 }
 0x10a   :  { %v1217_v34 = vpop.f32.mrb[21].mxu0 }
 0x10d   :  { %v2243_v36 = vpop.f32.mrb[22].mxu0 }
 0x10e   :  { %v1220_v37 = vpop.f32.mrb[23].mxu0 }
 0x111   :  { %v2246_v41 = vpop.f32.mrb[24].mxu0 }
 0x112   :  { %v1223_v43 = vpop.f32.mrb[25].mxu0 }
 0x115   :  { %v2249_v48 = vpop.f32.mrb[26].mxu0 }
 0x116   :  { %v418_v38 = vpop.f32.mrb[0].mxu1  ;;  %v1226_v50 = vpop.f32.mrb[27].mxu0 }
 0x117   :  { %v419_v39 = vadd.f32 %v2241_v35, %v418_v38  ;;  %v420_v40 = vpop.f32.mrb[1].mxu1 }
 0x119   :  { %v729_v42 = vadd.f32 %v728_v1, %v419_v39  ;;  %v2255_v55 = vpop.f32.mrb[28].mxu0 }
 0x11a   :  { %v423_v44 = vpop.f32.mrb[2].mxu1  ;;  %v1229_v56 = vpop.f32.mrb[29].mxu0 }
 0x11b   :  { %v972_v45 = vmax.f32 %v729_v42, 0.0  ;;  %v424_v46 = vadd.f32 %v2241_v35, %v423_v44  ;;  %v425_v47 = vpop.f32.mrb[3].mxu1 }
 0x11d   :  { %1021 = vst [vmem:[%s2563_s3] sm:$0xff] %v972_v45  ;;  %v734_v49 = vadd.f32 %v733_v5, %v424_v46  ;;  %v2261_v61 = vpop.f32.mrb[30].mxu0 }
 0x11e   :  { %v428_v51 = vpop.f32.mrb[4].mxu1  ;;  %v1232_v63 = vpop.f32.mrb[31].mxu0 }
 0x11f   :  { %v973_v52 = vmax.f32 %v734_v49, 0.0  ;;  %v429_v53 = vadd.f32 %v2241_v35, %v428_v51  ;;  %v430_v54 = vpop.f32.mrb[5].mxu1 }
 0x121   :  { %1022 = vst [vmem:[%s2563_s3 + $0x8] sm:$0xff] %v973_v52  ;;  %v739_v6 = vadd.f32 %v738_v9, %v429_v53  ;;  %v2267_v5 = vpop.f32.mrb[32].mxu0 }
 0x122   :  { %v433_v57 = vpop.f32.mrb[6].mxu1  ;;  %v1235_v8 = vpop.f32.mrb[33].mxu0 }
 0x123   :  { %v974_v58 = vmax.f32 %v739_v6, 0.0  ;;  %v434_v59 = vadd.f32 %v2241_v35, %v433_v57  ;;  %v435_v60 = vpop.f32.mrb[7].mxu1 }
 0x125   :  { %1023 = vst [vmem:[%s2563_s3 + $0x10] sm:$0xff] %v974_v58  ;;  %v744_v62 = vadd.f32 %v743_v13, %v434_v59  ;;  %v2274_v12 = vpop.f32.mrb[34].mxu0 }
 0x126   :  { %v438_v1 = vpop.f32.mrb[8].mxu1  ;;  %v1238_v14 = vpop.f32.mrb[35].mxu0 }
 0x127   :  { %v975_v2 = vmax.f32 %v744_v62, 0.0  ;;  %v439_v3 = vadd.f32 %v2241_v35, %v438_v1  ;;  %v440_v4 = vpop.f32.mrb[9].mxu1 }
 0x129   :  { %1024 = vst [vmem:[%s2563_s3 + $0x18] sm:$0xff] %v975_v2  ;;  %v749_v7 = vadd.f32 %v2212_v17, %v439_v3  ;;  %v2281_v19 = vpop.f32.mrb[36].mxu0 }
 0x12a   :  { %v443_v0 = vpop.f32.mrb[10].mxu1  ;;  %v1241_v22 = vpop.f32.mrb[37].mxu0 }
 0x12b   :  { %v976_v9 = vmax.f32 %v749_v7, 0.0  ;;  %v444_v10 = vadd.f32 %v2241_v35, %v443_v0  ;;  %v445_v11 = vpop.f32.mrb[11].mxu1 }
 0x12d   :  { %1025 = vst [vmem:[%s2563_s3 + $0x20] sm:$0xff] %v976_v9  ;;  %v754_v13 = vadd.f32 %v2220_v21, %v444_v10  ;;  %v2288_v28 = vpop.f32.mrb[38].mxu0 }
 0x12e   :  { %v448_v15 = vpop.f32.mrb[12].mxu1  ;;  %v1244_v32 = vpop.f32.mrb[39].mxu0 }
 0x12f   :  { %v977_v16 = vmax.f32 %v754_v13, 0.0  ;;  %v449_v18 = vadd.f32 %v2241_v35, %v448_v15  ;;  %v450_v17 = vpop.f32.mrb[13].mxu1 }
 0x131   :  { %1026 = vst [vmem:[%s2563_s3 + $0x28] sm:$0xff] %v977_v16  ;;  %v759_v20 = vadd.f32 %v2228_v25, %v449_v18  ;;  %v2295_v39 = vpop.f32.mrb[40].mxu0 }
 0x132   :  { %v453_v23 = vpop.f32.mrb[14].mxu1  ;;  %v1247_v42 = vpop.f32.mrb[41].mxu0 }
 0x133   :  { %v978_v24 = vmax.f32 %v759_v20, 0.0  ;;  %v454_v26 = vadd.f32 %v2241_v35, %v453_v23  ;;  %v455_v21 = vpop.f32.mrb[15].mxu1 }
 0x135   :  { %1027 = vst [vmem:[%s2563_s3 + $0x30] sm:$0xff] %v978_v24  ;;  %v764_v30 = vadd.f32 %v2230_v27, %v454_v26  ;;  %v2302_v46 = vpop.f32.mrb[42].mxu0 }
 0x136   :  { %v458_v34 = vpop.f32.mrb[16].mxu1  ;;  %v1250_v49 = vpop.f32.mrb[43].mxu0 }
 0x137   :  { %v979_v37 = vmax.f32 %v764_v30, 0.0  ;;  %v459_v38 = vadd.f32 %v2241_v35, %v458_v34  ;;  %v460_v25 = vpop.f32.mrb[17].mxu1 }
 0x139   :  { %1028 = vst [vmem:[%s2563_s3 + $0x38] sm:$0xff] %v979_v37  ;;  %v769_v40 = vadd.f32 %v2232_v29, %v459_v38  ;;  %v2309_v53 = vpop.f32.mrb[44].mxu0 }
 0x13a   :  { %v463_v43 = vpop.f32.mrb[18].mxu1  ;;  %v1253_v6 = vpop.f32.mrb[45].mxu0 }
 0x13b   :  { %v980_v44 = vmax.f32 %v769_v40, 0.0  ;;  %v464_v45 = vadd.f32 %v2241_v35, %v463_v43  ;;  %v465_v27 = vpop.f32.mrb[19].mxu1 }
 0x13d   :  { %1029 = vst [vmem:[%s2563_s3 + $0x40] sm:$0xff] %v980_v44  ;;  %v774_v47 = vadd.f32 %v2234_v31, %v464_v45  ;;  %v2316_v59 = vpop.f32.mrb[46].mxu0 }
 0x13e   :  { %v468_v50 = vpop.f32.mrb[20].mxu1  ;;  %v1256_v62 = vpop.f32.mrb[47].mxu0 }
 0x13f   :  { %v981_v51 = vmax.f32 %v774_v47, 0.0  ;;  %v469_v52 = vadd.f32 %v2241_v35, %v468_v50  ;;  %v470_v29 = vpop.f32.mrb[21].mxu1 }
 0x141   :  { %1030 = vst [vmem:[%s2563_s3 + $0x48] sm:$0xff] %v981_v51  ;;  %v779_v54 = vadd.f32 %v2236_v33, %v469_v52  ;;  %v2323_v3 = vpop.f32.mrb[48].mxu0 }
 0x142   :  { %v473_v56 = vpop.f32.mrb[22].mxu1  ;;  %v1259_v7 = vpop.f32.mrb[49].mxu0 }
 0x143   :  { %v982_v57 = vmax.f32 %v779_v54, 0.0  ;;  %v474_v58 = vadd.f32 %v2241_v35, %v473_v56  ;;  %v475_v31 = vpop.f32.mrb[23].mxu1 }
 0x145   :  { %1031 = vst [vmem:[%s2563_s3 + $0x50] sm:$0xff] %v982_v57  ;;  %v784_v60 = vadd.f32 %v2243_v36, %v474_v58  ;;  %v2330_v10 = vpop.f32.mrb[50].mxu0 }
 0x146   :  { %v478_v63 = vpop.f32.mrb[24].mxu1  ;;  %v1262_v13 = vpop.f32.mrb[51].mxu0 }
 0x147   :  { %v983_v1 = vmax.f32 %v784_v60, 0.0  ;;  %v479_v2 = vadd.f32 %v2241_v35, %v478_v63  ;;  %v480_v33 = vpop.f32.mrb[25].mxu1 }
 0x149   :  { %1032 = vst [vmem:[%s2563_s3 + $0x58] sm:$0xff] %v983_v1  ;;  %v789_v4 = vadd.f32 %v2246_v41, %v479_v2  ;;  %v2337_v18 = vpop.f32.mrb[52].mxu0 }
 0x14a   :  { %v483_v8 = vpop.f32.mrb[26].mxu1  ;;  %v1265_v20 = vpop.f32.mrb[53].mxu0 }
 0x14b   :  { %v984_v0 = vmax.f32 %v789_v4, 0.0  ;;  %v484_v9 = vadd.f32 %v2241_v35, %v483_v8  ;;  %v485_v36 = vpop.f32.mrb[27].mxu1 }
 0x14d   :  { %1033 = vst [vmem:[%s2563_s3 + $0x60] sm:$0xff] %v984_v0  ;;  %v794_v11 = vadd.f32 %v2249_v48, %v484_v9  ;;  %v2344_v26 = vpop.f32.mrb[54].mxu0 }
 0x14e   :  { %v488_v14 = vpop.f32.mrb[28].mxu1  ;;  %v1268_v30 = vpop.f32.mrb[55].mxu0 }
 0x14f   :  { %v985_v15 = vmax.f32 %v794_v11, 0.0  ;;  %v489_v16 = vadd.f32 %v2241_v35, %v488_v14  ;;  %v490_v41 = vpop.f32.mrb[29].mxu1 }
 0x151   :  { %1034 = vst [vmem:[%s2563_s3 + $0x68] sm:$0xff] %v985_v15  ;;  %v799_v17 = vadd.f32 %v2255_v55, %v489_v16  ;;  %v2351_v38 = vpop.f32.mrb[56].mxu0 }
 0x152   :  { %v493_v22 = vpop.f32.mrb[30].mxu1  ;;  %v1271_v40 = vpop.f32.mrb[57].mxu0 }
 0x153   :  { %v986_v23 = vmax.f32 %v799_v17, 0.0  ;;  %v494_v24 = vadd.f32 %v2241_v35, %v493_v22  ;;  %v495_v48 = vpop.f32.mrb[31].mxu1 }
 0x155   :  { %1035 = vst [vmem:[%s2563_s3 + $0x70] sm:$0xff] %v986_v23  ;;  %v804_v21 = vadd.f32 %v2261_v61, %v494_v24  ;;  %v2358_v45 = vpop.f32.mrb[58].mxu0 }
 0x156   :  { %v498_v32 = vpop.f32.mrb[32].mxu1  ;;  %v1274_v47 = vpop.f32.mrb[59].mxu0 }
 0x157   :  { %v987_v34 = vmax.f32 %v804_v21, 0.0  ;;  %v499_v37 = vadd.f32 %v2241_v35, %v498_v32  ;;  %v500_v55 = vpop.f32.mrb[33].mxu1 }
 0x159   :  { %1036 = vst [vmem:[%s2563_s3 + $0x78] sm:$0xff] %v987_v34  ;;  %v809_v25 = vadd.f32 %v2267_v5, %v499_v37  ;;  %v2365_v52 = vpop.f32.mrb[60].mxu0 }
 0x15a   :  { %v503_v42 = vpop.f32.mrb[34].mxu1  ;;  %v1277_v54 = vpop.f32.mrb[61].mxu0 }
 0x15b   :  { %v988_v43 = vmax.f32 %v809_v25, 0.0  ;;  %v504_v44 = vadd.f32 %v2241_v35, %v503_v42  ;;  %v505_v61 = vpop.f32.mrb[35].mxu1 }
 0x15d   :  { %1037 = vst [vmem:[%s2563_s3 + $0x80] sm:$0xff] %v988_v43  ;;  %v814_v27 = vadd.f32 %v2274_v12, %v504_v44  ;;  %v2372_v58 = vpop.f32.mrb[62].mxu0 }
 0x15e   :  { %v508_v49 = vpop.f32.mrb[36].mxu1  ;;  %v1280_v60 = vpop.f32.mrb[63].mxu0 }
 0x15f   :  { %v989_v50 = vmax.f32 %v814_v27, 0.0  ;;  %v509_v51 = vadd.f32 %v2241_v35, %v508_v49  ;;  %v510_v5 = vpop.f32.mrb[37].mxu1 }
 0x161   :  { %1038 = vst [vmem:[%s2563_s3 + $0x88] sm:$0xff] %v989_v50  ;;  %v819_v29 = vadd.f32 %v2281_v19, %v509_v51  ;;  %v2379_v2 = vpop.f32.mrb[64].mxu0 }
 0x162   :  { %v513_v6 = vpop.f32.mrb[38].mxu1  ;;  %v1283_v4 = vpop.f32.mrb[65].mxu0 }
 0x163   :  { %v990_v56 = vmax.f32 %v819_v29, 0.0  ;;  %v514_v57 = vadd.f32 %v2241_v35, %v513_v6  ;;  %v515_v12 = vpop.f32.mrb[39].mxu1 }
 0x165   :  { %1039 = vst [vmem:[%s2563_s3 + $0x90] sm:$0xff] %v990_v56  ;;  %v824_v31 = vadd.f32 %v2288_v28, %v514_v57  ;;  %v2386_v9 = vpop.f32.mrb[66].mxu0 }
 0x166   :  { %v518_v62 = vpop.f32.mrb[40].mxu1  ;;  %v1286_v11 = vpop.f32.mrb[67].mxu0 }
 0x167   :  { %v991_v63 = vmax.f32 %v824_v31, 0.0  ;;  %v519_v1 = vadd.f32 %v2241_v35, %v518_v62  ;;  %v520_v19 = vpop.f32.mrb[41].mxu1 }
 0x169   :  { %1040 = vst [vmem:[%s2563_s3 + $0x98] sm:$0xff] %v991_v63  ;;  %v829_v33 = vadd.f32 %v2295_v39, %v519_v1  ;;  %v2393_v16 = vpop.f32.mrb[68].mxu0 }
 0x16a   :  { %v523_v7 = vpop.f32.mrb[42].mxu1  ;;  %v1289_v17 = vpop.f32.mrb[69].mxu0 }
 0x16b   :  { %v992_v8 = vmax.f32 %v829_v33, 0.0  ;;  %v524_v0 = vadd.f32 %v2241_v35, %v523_v7  ;;  %v525_v28 = vpop.f32.mrb[43].mxu1 }
 0x16d   :  { %1041 = vst [vmem:[%s2563_s3 + $0xa0] sm:$0xff] %v992_v8  ;;  %v834_v36 = vadd.f32 %v2302_v46, %v524_v0  ;;  %v2400_v24 = vpop.f32.mrb[70].mxu0 }
 0x16e   :  { %v528_v13 = vpop.f32.mrb[44].mxu1  ;;  %v1292_v21 = vpop.f32.mrb[71].mxu0 }
 0x16f   :  { %v993_v14 = vmax.f32 %v834_v36, 0.0  ;;  %v529_v15 = vadd.f32 %v2241_v35, %v528_v13  ;;  %v530_v39 = vpop.f32.mrb[45].mxu1 }
 0x171   :  { %1042 = vst [vmem:[%s2563_s3 + $0xa8] sm:$0xff] %v993_v14  ;;  %v839_v41 = vadd.f32 %v2309_v53, %v529_v15  ;;  %v2407_v37 = vpop.f32.mrb[72].mxu0 }
 0x172   :  { %v533_v20 = vpop.f32.mrb[46].mxu1  ;;  %v1295_v25 = vpop.f32.mrb[73].mxu0 }
 0x173   :  { %v994_v22 = vmax.f32 %v839_v41, 0.0  ;;  %v534_v23 = vadd.f32 %v2241_v35, %v533_v20  ;;  %v535_v46 = vpop.f32.mrb[47].mxu1 }
 0x175   :  { %1043 = vst [vmem:[%s2563_s3 + $0xb0] sm:$0xff] %v994_v22  ;;  %v844_v48 = vadd.f32 %v2316_v59, %v534_v23  ;;  %v2414_v44 = vpop.f32.mrb[74].mxu0 }
 0x176   :  { %v538_v30 = vpop.f32.mrb[48].mxu1  ;;  %v1298_v27 = vpop.f32.mrb[75].mxu0 }
 0x177   :  { %v995_v32 = vmax.f32 %v844_v48, 0.0  ;;  %v539_v34 = vadd.f32 %v2241_v35, %v538_v30  ;;  %v540_v53 = vpop.f32.mrb[49].mxu1 }
 0x179   :  { %1044 = vst [vmem:[%s2563_s3 + $0xb8] sm:$0xff] %v995_v32  ;;  %v849_v55 = vadd.f32 %v2323_v3, %v539_v34  ;;  %v2421_v51 = vpop.f32.mrb[76].mxu0 }
 0x17a   :  { %v543_v40 = vpop.f32.mrb[50].mxu1  ;;  %v1301_v29 = vpop.f32.mrb[77].mxu0 }
 0x17b   :  { %v996_v42 = vmax.f32 %v849_v55, 0.0  ;;  %v544_v43 = vadd.f32 %v2241_v35, %v543_v40  ;;  %v545_v59 = vpop.f32.mrb[51].mxu1 }
 0x17d   :  { %1045 = vst [vmem:[%s2563_s3 + $0xc0] sm:$0xff] %v996_v42  ;;  %v854_v61 = vadd.f32 %v2330_v10, %v544_v43  ;;  %v2428_v57 = vpop.f32.mrb[78].mxu0 }
 0x17e   :  { %v548_v47 = vpop.f32.mrb[52].mxu1  ;;  %v1304_v31 = vpop.f32.mrb[79].mxu0 }
 0x17f   :  { %v997_v49 = vmax.f32 %v854_v61, 0.0  ;;  %v549_v50 = vadd.f32 %v2241_v35, %v548_v47  ;;  %v550_v3 = vpop.f32.mrb[53].mxu1 }
 0x181   :  { %1046 = vst [vmem:[%s2563_s3 + $0xc8] sm:$0xff] %v997_v49  ;;  %v859_v5 = vadd.f32 %v2337_v18, %v549_v50  ;;  %v2435_v1 = vpop.f32.mrb[80].mxu0 }
 0x182   :  { %v553_v54 = vpop.f32.mrb[54].mxu1  ;;  %v1307_v33 = vpop.f32.mrb[81].mxu0 }
 0x183   :  { %v998_v6 = vmax.f32 %v859_v5, 0.0  ;;  %v554_v56 = vadd.f32 %v2241_v35, %v553_v54  ;;  %v555_v10 = vpop.f32.mrb[55].mxu1 }
 0x185   :  { %1047 = vst [vmem:[%s2563_s3 + $0xd0] sm:$0xff] %v998_v6  ;;  %v864_v12 = vadd.f32 %v2344_v26, %v554_v56  ;;  %v2442_v0 = vpop.f32.mrb[82].mxu0 }
 0x186   :  { %v558_v60 = vpop.f32.mrb[56].mxu1  ;;  %v1310_v36 = vpop.f32.mrb[83].mxu0 }
 0x187   :  { %v999_v62 = vmax.f32 %v864_v12, 0.0  ;;  %v559_v63 = vadd.f32 %v2241_v35, %v558_v60  ;;  %v560_v18 = vpop.f32.mrb[57].mxu1 }
 0x189   :  { %1048 = vst [vmem:[%s2563_s3 + $0xd8] sm:$0xff] %v999_v62  ;;  %v869_v19 = vadd.f32 %v2351_v38, %v559_v63  ;;  %v2449_v15 = vpop.f32.mrb[84].mxu0 }
 0x18a   :  { %v563_v4 = vpop.f32.mrb[58].mxu1  ;;  %v1313_v41 = vpop.f32.mrb[85].mxu0 }
 0x18b   :  { %v1000_v7 = vmax.f32 %v869_v19, 0.0  ;;  %v564_v8 = vadd.f32 %v2241_v35, %v563_v4  ;;  %v565_v26 = vpop.f32.mrb[59].mxu1 }
 0x18d   :  { %1049 = vst [vmem:[%s2563_s3 + $0xe0] sm:$0xff] %v1000_v7  ;;  %v874_v28 = vadd.f32 %v2358_v45, %v564_v8  ;;  %v2456_v23 = vpop.f32.mrb[86].mxu0 }
 0x18e   :  { %v568_v11 = vpop.f32.mrb[60].mxu1  ;;  %v1316_v48 = vpop.f32.mrb[87].mxu0 }
 0x18f   :  { %v1001_v13 = vmax.f32 %v874_v28, 0.0  ;;  %v569_v14 = vadd.f32 %v2241_v35, %v568_v11  ;;  %v570_v38 = vpop.f32.mrb[61].mxu1 }
 0x191   :  { %1050 = vst [vmem:[%s2563_s3 + $0xe8] sm:$0xff] %v1001_v13  ;;  %v879_v39 = vadd.f32 %v2365_v52, %v569_v14  ;;  %v2463_v34 = vpop.f32.mrb[88].mxu0 }
 0x192   :  { %v573_v17 = vpop.f32.mrb[62].mxu1  ;;  %v1319_v55 = vpop.f32.mrb[89].mxu0 }
 0x193   :  { %v1002_v20 = vmax.f32 %v879_v39, 0.0  ;;  %v574_v22 = vadd.f32 %v2241_v35, %v573_v17  ;;  %v575_v45 = vpop.f32.mrb[63].mxu1 }
 0x195   :  { %1051 = vst [vmem:[%s2563_s3 + $0xf0] sm:$0xff] %v1002_v20  ;;  %v884_v46 = vadd.f32 %v2372_v58, %v574_v22  ;;  %v2470_v43 = vpop.f32.mrb[90].mxu0 }
 0x196   :  { %v578_v21 = vpop.f32.mrb[64].mxu1  ;;  %v1322_v61 = vpop.f32.mrb[91].mxu0 }
 0x197   :  { %v1003_v30 = vmax.f32 %v884_v46, 0.0  ;;  %v579_v32 = vadd.f32 %v2241_v35, %v578_v21  ;;  %v580_v52 = vpop.f32.mrb[65].mxu1 }
 0x199   :  { %1052 = vst [vmem:[%s2563_s3 + $0xf8] sm:$0xff] %v1003_v30  ;;  %v889_v53 = vadd.f32 %v2379_v2, %v579_v32  ;;  %v2477_v50 = vpop.f32.mrb[92].mxu0 }
 0x19a   :  { %v583_v25 = vpop.f32.mrb[66].mxu1  ;;  %v1325_v5 = vpop.f32.mrb[93].mxu0 }
 0x19b   :  { %v1004_v40 = vmax.f32 %v889_v53, 0.0  ;;  %v584_v42 = vadd.f32 %v2241_v35, %v583_v25  ;;  %v585_v58 = vpop.f32.mrb[67].mxu1 }
 0x19d   :  { %1053 = vst [vmem:[%s2563_s3 + $0x100] sm:$0xff] %v1004_v40  ;;  %v894_v59 = vadd.f32 %v2386_v9, %v584_v42  ;;  %v2484_v56 = vpop.f32.mrb[94].mxu0 }
 0x19e   :  { %v588_v27 = vpop.f32.mrb[68].mxu1  ;;  %v1328_v12 = vpop.f32.mrb[95].mxu0 }
 0x19f   :  { %v1005_v47 = vmax.f32 %v894_v59, 0.0  ;;  %v589_v49 = vadd.f32 %v2241_v35, %v588_v27  ;;  %v590_v2 = vpop.f32.mrb[69].mxu1 }
 0x1a1   :  { %1054 = vst [vmem:[%s2563_s3 + $0x108] sm:$0xff] %v1005_v47  ;;  %v899_v3 = vadd.f32 %v2393_v16, %v589_v49  ;;  %v2491_v63 = vpop.f32.mrb[96].mxu0 }
 0x1a2   :  { %v593_v29 = vpop.f32.mrb[70].mxu1  ;;  %v1331_v19 = vpop.f32.mrb[97].mxu0 }
 0x1a3   :  { %v1006_v54 = vmax.f32 %v899_v3, 0.0  ;;  %v594_v6 = vadd.f32 %v2241_v35, %v593_v29  ;;  %v595_v9 = vpop.f32.mrb[71].mxu1 }
 0x1a5   :  { %1055 = vst [vmem:[%s2563_s3 + $0x110] sm:$0xff] %v1006_v54  ;;  %v904_v10 = vadd.f32 %v2400_v24, %v594_v6 }
 0x1a6   :  { %v598_v31 = vpop.f32.mrb[72].mxu1 }
 0x1a7   :  { %v1007_v60 = vmax.f32 %v904_v10, 0.0  ;;  %v599_v62 = vadd.f32 %v2241_v35, %v598_v31  ;;  %v600_v16 = vpop.f32.mrb[73].mxu1 }
 0x1a9   :  { %1056 = vst [vmem:[%s2563_s3 + $0x118] sm:$0xff] %v1007_v60  ;;  %v909_v18 = vadd.f32 %v2407_v37, %v599_v62 }
 0x1aa   :  { %v603_v33 = vpop.f32.mrb[74].mxu1 }
 0x1ab   :  { %v1008_v4 = vmax.f32 %v909_v18, 0.0  ;;  %v604_v7 = vadd.f32 %v2241_v35, %v603_v33  ;;  %v605_v24 = vpop.f32.mrb[75].mxu1 }
 0x1ad   :  { %1057 = vst [vmem:[%s2563_s3 + $0x120] sm:$0xff] %v1008_v4  ;;  %v914_v8 = vadd.f32 %v2414_v44, %v604_v7 }
 0x1ae   :  { %v608_v26 = vpop.f32.mrb[76].mxu1 }
 0x1af   :  { %v1009_v28 = vmax.f32 %v914_v8, 0.0  ;;  %v609_v36 = vadd.f32 %v2241_v35, %v608_v26  ;;  %v610_v11 = vpop.f32.mrb[77].mxu1 }
 0x1b1   :  { %1058 = vst [vmem:[%s2563_s3 + $0x128] sm:$0xff] %v1009_v28  ;;  %v919_v37 = vadd.f32 %v2421_v51, %v609_v36 }
 0x1b2   :  { %v613_v13 = vpop.f32.mrb[78].mxu1 }
 0x1b3   :  { %v1010_v14 = vmax.f32 %v919_v37, 0.0  ;;  %v614_v38 = vadd.f32 %v2241_v35, %v613_v13  ;;  %v615_v39 = vpop.f32.mrb[79].mxu1 }
 0x1b5   :  { %1059 = vst [vmem:[%s2563_s3 + $0x130] sm:$0xff] %v1010_v14  ;;  %v924_v44 = vadd.f32 %v2428_v57, %v614_v38 }
 0x1b6   :  { %v618_v41 = vpop.f32.mrb[80].mxu1 }
 0x1b7   :  { %v1011_v17 = vmax.f32 %v924_v44, 0.0  ;;  %v619_v20 = vadd.f32 %v2241_v35, %v618_v41  ;;  %v620_v22 = vpop.f32.mrb[81].mxu1 }
 0x1b9   :  { %1060 = vst [vmem:[%s2563_s3 + $0x138] sm:$0xff] %v1011_v17  ;;  %v929_v51 = vadd.f32 %v2435_v1, %v619_v20 }
 0x1ba   :  { %v623_v45 = vpop.f32.mrb[82].mxu1 }
 0x1bb   :  { %v1012_v46 = vmax.f32 %v929_v51, 0.0  ;;  %v624_v48 = vadd.f32 %v2241_v35, %v623_v45  ;;  %v625_v21 = vpop.f32.mrb[83].mxu1 }
 0x1bd   :  { %1061 = vst [vmem:[%s2563_s3 + $0x140] sm:$0xff] %v1012_v46  ;;  %v934_v57 = vadd.f32 %v2442_v0, %v624_v48 }
 0x1be   :  { %v628_v30 = vpop.f32.mrb[84].mxu1 }
 0x1bf   :  { %v1013_v32 = vmax.f32 %v934_v57, 0.0  ;;  %v629_v52 = vadd.f32 %v2241_v35, %v628_v30  ;;  %v630_v53 = vpop.f32.mrb[85].mxu1 }
 0x1c1   :  { %1062 = vst [vmem:[%s2563_s3 + $0x148] sm:$0xff] %v1013_v32  ;;  %v939_v1 = vadd.f32 %v2449_v15, %v629_v52 }
 0x1c2   :  { %v633_v55 = vpop.f32.mrb[86].mxu1 }
 0x1c3   :  { %v1014_v25 = vmax.f32 %v939_v1, 0.0  ;;  %v634_v40 = vadd.f32 %v2241_v35, %v633_v55  ;;  %v635_v42 = vpop.f32.mrb[87].mxu1 }
 0x1c5   :  { %1063 = vst [vmem:[%s2563_s3 + $0x150] sm:$0xff] %v1014_v25  ;;  %v944_v0 = vadd.f32 %v2456_v23, %v634_v40 }
 0x1c6   :  { %v638_v58 = vpop.f32.mrb[88].mxu1 }
 0x1c7   :  { %v1015_v59 = vmax.f32 %v944_v0, 0.0  ;;  %v639_v61 = vadd.f32 %v2241_v35, %v638_v58  ;;  %v640_v27 = vpop.f32.mrb[89].mxu1 }
 0x1c9   :  { %1064 = vst [vmem:[%s2563_s3 + $0x158] sm:$0xff] %v1015_v59  ;;  %v949_v15 = vadd.f32 %v2463_v34, %v639_v61 }
 0x1ca   :  { %v643_v47 = vpop.f32.mrb[90].mxu1 }
 0x1cb   :  { %v1016_v49 = vmax.f32 %v949_v15, 0.0  ;;  %v644_v2 = vadd.f32 %v2241_v35, %v643_v47  ;;  %v645_v3 = vpop.f32.mrb[91].mxu1 }
 0x1cd   :  { %1065 = vst [vmem:[%s2563_s3 + $0x160] sm:$0xff] %v1016_v49  ;;  %v954_v23 = vadd.f32 %v2470_v43, %v644_v2 }
 0x1ce   :  { %v648_v5 = vpop.f32.mrb[92].mxu1 }
 0x1cf   :  { %v1017_v29 = vmax.f32 %v954_v23, 0.0  ;;  %v649_v54 = vadd.f32 %v2241_v35, %v648_v5  ;;  %v650_v6 = vpop.f32.mrb[93].mxu1 }
 0x1d1   :  { %1066 = vst [vmem:[%s2563_s3 + $0x168] sm:$0xff] %v1017_v29  ;;  %v959_v34 = vadd.f32 %v2477_v50, %v649_v54 }
 0x1d2   :  { %v653_v9 = vpop.f32.mrb[94].mxu1 }
 0x1d3   :  { %v1018_v10 = vmax.f32 %v959_v34, 0.0  ;;  %v654_v12 = vadd.f32 %v2241_v35, %v653_v9  ;;  %v655_v31 = vpop.f32.mrb[95].mxu1 }
 0x1d5   :  { %1067 = vst [vmem:[%s2563_s3 + $0x170] sm:$0xff] %v1018_v10  ;;  %v964_v43 = vadd.f32 %v2484_v56, %v654_v12 }
 0x1d6   :  { %v658_v60 = vpop.f32.mrb[96].mxu1 }
 0x1d7   :  { %v1019_v62 = vmax.f32 %v964_v43, 0.0  ;;  %v659_v16 = vadd.f32 %v2241_v35, %v658_v60  ;;  %v660_v18 = vpop.f32.mrb[97].mxu1 }
 0x1d9   :  { %1068 = vst [vmem:[%s2563_s3 + $0x178] sm:$0xff] %v1019_v62  ;;  %v969_v50 = vadd.f32 %v2491_v63, %v659_v16 }
 0x1db   :  { %v1020_v19 = vmax.f32 %v969_v50, 0.0 }
 0x1dd   :  { %1069 = vst [vmem:[%s2563_s3 + $0x180] sm:$0xff] %v1020_v19 }

// kernel: nn_prototype_forward.16
= control target key start
LH: loop header
LB: loop body
LE: loop exit
PB: predicated region body
PF: predicated region fallthrough
CT: control target
= control target key end

     0   :  { %s2193_s12 = smov 0   ;;  %s2881_s0 = inlined_call_operand.vmem [shape: f32[1568,288], index: 0, kind: input, shape index: {}]   ;;  %s2882_s1 = inlined_call_operand.vmem [shape: f32[288,128], index: 1, kind: input, shape index: {}]   ;;  %s2883_s2 = inlined_call_operand.vmem [shape: f32[1,128], index: 2, kind: input, shape index: {}]   ;;  %s2884_s3 = inlined_call_operand.vmem [shape: f32[1568,128], index: 3, kind: output, shape index: {}]  }
   0x1 LB: > { %s1534_s13 = sadd.s32 4294967295, %s2168_s12   ;;  %p1538_p0 = scmp.ge.s32.totalorder %s2168_s12, 1  ;;  %s2168_s12 = sphi %s2193_s12, %s13_s12  }
   0x2   : > { %p139_p1 = scmp.lt.s32.totalorder %s2168_s12, 5 }
   0x4   : > { %p140_p2 = pnand %p1538_p0, %p139_p1 }
   0x5   : > { %v324_v0 = vld [vmem:[%s2882_s1] sm:$0xff] (!%p140_p2)  ;;  %v325_v1 = vld [vmem:[%s2882_s1 + $0x8] sm:$0xff] (!%p140_p2)  ;;  %v326_v2 = vld [vmem:[%s2882_s1 + $0x10] sm:$0xff] (!%p140_p2)  ;;  %s164_s20 = smul.u32 (!%p140_p2), 49, %s1534_s13  ;;  %v2170_v3 = vmov (!%p140_p2), 0.0|0.0   ;;  %vm2171_vm0 = vmmov (!%p140_p2), 0  }
   0x6   : > { %143 = sbr.rel (%p140_p2) target bundleno = 508 (0x1fc), region = 32  ;;  %1801 = vmatprep.subr.bf16.mxu1 (!%p140_p2), %v2170_v3  ;;  %v1802_v4 = vpack.c.bf16 (!%p140_p2), %v325_v1, %v324_v0  ;;  %v327_v5 = vld [vmem:[%s2882_s1 + $0x18] sm:$0xff] (!%p140_p2)  ;;  %1849 = vmatprep.subr.bf16.mxu0 (!%p140_p2), %v2170_v3  ;;  %v2172_v6 = vmov (!%p140_p2), 0.0   ;;  %v328_v8 = vld [vmem:[%s2882_s1 + $0x20] sm:$0xff] (!%p140_p2)  ;;  %v329_v9 = vld [vmem:[%s2882_s1 + $0x28] sm:$0xff] (!%p140_p2)  ;;  %vm367_vm1 = vcmask (!%p140_p2), 261120  }
   0x7   : > { %p165_p3 = scmp.lt.s32.totalorder (!%p140_p2), %s164_s20, 195  ;;  %1654 = vmatprep.mubr.msk.f32.mxu0 (!%p140_p2), %vm2171_vm0, %v2172_v6  ;;  %v1805_v7 = vpack.c.bf16 (!%p140_p2), %v327_v5, %v326_v2  ;;  %v1808_v10 = vpack.c.bf16 (!%p140_p2), %v329_v9, %v328_v8  ;;  %v330_v11 = vld [vmem:[%s2882_s1 + $0x30] sm:$0xff] (!%p140_p2)  ;;  %v331_v12 = vld [vmem:[%s2882_s1 + $0x38] sm:$0xff] (!%p140_p2)  ;;  %v356_v13 = vld [vmem:[%s2882_s1 + $0x100] sm:$0xff] (!%p140_p2) }
   0x8   : > { %1803 = vmatpush1.bf16.msra.mxu1 (!%p140_p2), %v1802_v4  ;;  %v357_v14 = vld [vmem:[%s2882_s1 + $0x108] sm:$0xff] (!%p140_p2)  ;;  %v1811_v15 = vpack.c.bf16 (!%p140_p2), %v331_v12, %v330_v11  ;;  %v358_v17 = vld [vmem:[%s2882_s1 + $0x110] sm:$0xff] (!%p140_p2)  ;;  %v359_v18 = vld [vmem:[%s2882_s1 + $0x118] sm:$0xff] (!%p140_p2) }
   0x9   : > { %1804 = vmatprep.subr.bf16.mxu1 (!%p140_p2), %v2170_v3  ;;  %v1850_v16 = vpack.c.bf16 (!%p140_p2), %v357_v14, %v356_v13  ;;  %v332_v19 = vld [vmem:[%s2882_s1 + $0x40] sm:$0xff] (!%p140_p2)  ;;  %v333_v20 = vld [vmem:[%s2882_s1 + $0x48] sm:$0xff] (!%p140_p2)  ;;  %v1853_v22 = vpack.c.bf16 (!%p140_p2), %v359_v18, %v358_v17  ;;  %v334_v24 = vld [vmem:[%s2882_s1 + $0x50] sm:$0xff] (!%p140_p2) }
   0xa   : > { %v1814_v23 = vpack.c.bf16 (!%p140_p2), %v333_v20, %v332_v19  ;;  %v335_v25 = vld [vmem:[%s2882_s1 + $0x58] sm:$0xff] (!%p140_p2)  ;;  %v336_v28 = vld [vmem:[%s2882_s1 + $0x60] sm:$0xff] (!%p140_p2)  ;;  %v337_v29 = vld [vmem:[%s2882_s1 + $0x68] sm:$0xff] (!%p140_p2) }
   0xb   : > { %1851 = vmatpush3.bf16.msra.mxu0 (!%p140_p2), %v1850_v16  ;;  %v1817_v27 = vpack.c.bf16 (!%p140_p2), %v335_v25, %v334_v24  ;;  %v1820_v31 = vpack.c.bf16 (!%p140_p2), %v337_v29, %v336_v28  ;;  %v338_v32 = vld [vmem:[%s2882_s1 + $0x70] sm:$0xff] (!%p140_p2)  ;;  %v339_v33 = vld [vmem:[%s2882_s1 + $0x78] sm:$0xff] (!%p140_p2)  ;;  %v340_v36 = vld [vmem:[%s2882_s1 + $0x80] sm:$0xff] (!%p140_p2) }
   0xc   : > { %1806 = vmatpush1.bf16.msra.mxu1 (!%p140_p2), %v1805_v7  ;;  %1852 = vmatprep.subr.bf16.mxu0 (!%p140_p2), %v2170_v3  ;;  %v1823_v35 = vpack.c.bf16 (!%p140_p2), %v339_v33, %v338_v32  ;;  %v341_v37 = vld [vmem:[%s2882_s1 + $0x88] sm:$0xff] (!%p140_p2)  ;;  %v342_v40 = vld [vmem:[%s2882_s1 + $0x90] sm:$0xff] (!%p140_p2)  ;;  %v343_v41 = vld [vmem:[%s2882_s1 + $0x98] sm:$0xff] (!%p140_p2) }
   0xd   : > { %s2886_s20 = smov (!%p165_p3, %s164_s20), 195  ;;  %1807 = vmatprep.subr.bf16.mxu1 %v2170_v3  ;;  %v1826_v39 = vpack.c.bf16 %v341_v37, %v340_v36  ;;  %v1829_v43 = vpack.c.bf16 %v343_v41, %v342_v40  ;;  %v344_v44 = vld [vmem:[%s2882_s1 + $0xa0] sm:$0xff]  ;;  %v345_v45 = vld [vmem:[%s2882_s1 + $0xa8] sm:$0xff]  ;;  %v346_v48 = vld [vmem:[%s2882_s1 + $0xb0] sm:$0xff] }
   0xe   : > { %s1953_s27 = smul.u32 24, %s2886_s20  ;;  %v1832_v47 = vpack.c.bf16 %v345_v45, %v344_v44  ;;  %v347_v49 = vld [vmem:[%s2882_s1 + $0xb8] sm:$0xff]  ;;  %v348_v52 = vld [vmem:[%s2882_s1 + $0xc0] sm:$0xff]  ;;  %v349_v53 = vld [vmem:[%s2882_s1 + $0xc8] sm:$0xff] }
   0xf   : > { %1854 = vmatpush3.bf16.msra.mxu0 %v1853_v22  ;;  %v1835_v51 = vpack.c.bf16 %v347_v49, %v346_v48  ;;  %v1838_v55 = vpack.c.bf16 %v349_v53, %v348_v52  ;;  %v350_v56 = vld [vmem:[%s2882_s1 + $0xd0] sm:$0xff]  ;;  %v351_v57 = vld [vmem:[%s2882_s1 + $0xd8] sm:$0xff]  ;;  %v352_v60 = vld [vmem:[%s2882_s1 + $0xe0] sm:$0xff] }
  0x10   : > { %s2237_s7 = scalar_lea.vmem %s2881_s0, %s1953_s27  ;;  %1809 = vmatpush1.bf16.msra.mxu1 %v1808_v10  ;;  %v1841_v59 = vpack.c.bf16 %v351_v57, %v350_v56  ;;  %v353_v61 = vld [vmem:[%s2882_s1 + $0xe8] sm:$0xff]  ;;  %v354_v0 = vld [vmem:[%s2882_s1 + $0xf0] sm:$0xff]  ;;  %v355_v1 = vld [vmem:[%s2882_s1 + $0xf8] sm:$0xff] }
  0x11   : > { %1810 = vmatprep.subr.bf16.mxu1 %v2170_v3  ;;  %v178_v21 = vld [vmem:[%s2237_s7 + $0x8] sm:$0xff]  ;;  %v179_v26 = vld [vmem:[%s2237_s7 + $0x10] sm:$0xff]  ;;  %v185_v34 = vld [vmem:[%s2237_s7 + $0x40] sm:$0xff]  ;;  %v1844_v63 = vpack.c.bf16 %v353_v61, %v352_v60  ;;  %v1847_v4 = vpack.c.bf16 %v355_v1, %v354_v0 }
  0x12   : > { %579 = vmatprep.mubr.f32.mxu1 %v178_v21  ;;  %1655 = vmatmul.mubr.msk.f32.vlgmr.msra.gmra.mrb[0].mxu0 %vm367_vm1, %v179_v26  ;;  %v182_v30 = vld [vmem:[%s2237_s7 + $0x28] sm:$0xff]  ;;  %v188_v38 = vld [vmem:[%s2237_s7 + $0x58] sm:$0xff]  ;;  %v191_v42 = vld [vmem:[%s2237_s7 + $0x70] sm:$0xff] }
  0x13   : > { %1657 = vmatprep.mubr.msk.f32.mxu0 %vm2171_vm0, %v2172_v6  ;;  %v194_v46 = vld [vmem:[%s2237_s7 + $0x88] sm:$0xff]  ;;  %v197_v50 = vld [vmem:[%s2237_s7 + $0xa0] sm:$0xff]  ;;  %v200_v54 = vld [vmem:[%s2237_s7 + $0xb8] sm:$0xff] }
  0x14   : > { %1812 = vmatpush1.bf16.msra.mxu1 %v1811_v15  ;;  %v203_v58 = vld [vmem:[%s2237_s7 + $0xd0] sm:$0xff]  ;;  %v206_v62 = vld [vmem:[%s2237_s7 + $0xe8] sm:$0xff]  ;;  %v209_v2 = vld [vmem:[%s2237_s7 + $0x100] sm:$0xff] }
  0x15   : > { %1813 = vmatprep.subr.bf16.mxu1 %v2170_v3  ;;  %v212_v5 = vld [vmem:[%s2237_s7 + $0x118] sm:$0xff]  ;;  %v177_v7 = vld [vmem:[%s2237_s7] sm:$0xff]  ;;  %v215_v9 = vld [vmem:[%s2237_s7 + $0x130] sm:$0xff] }
  0x16   : > { %1658 = vmatmul.mubr.msk.f32.gmra.mrb[2].mxu0 %vm367_vm1, %v182_v30  ;;  %v181_v8 = vld [vmem:[%s2237_s7 + $0x20] sm:$0xff]  ;;  %v184_v10 = vld [vmem:[%s2237_s7 + $0x38] sm:$0xff]  ;;  %v218_v11 = vld [vmem:[%s2237_s7 + $0x148] sm:$0xff] }
  0x17   : > { %1660 = vmatprep.mubr.msk.f32.mxu0 %vm2171_vm0, %v2172_v6  ;;  %v183_v12 = vld [vmem:[%s2237_s7 + $0x30] sm:$0xff]  ;;  %v221_v14 = vld [vmem:[%s2237_s7 + $0x160] sm:$0xff]  ;;  %v186_v15 = vld [vmem:[%s2237_s7 + $0x48] sm:$0xff] }
  0x18   : > { %1815 = vmatpush1.bf16.msra.mxu1 %v1814_v23  ;;  %v187_v13 = vld [vmem:[%s2237_s7 + $0x50] sm:$0xff]  ;;  %v190_v16 = vld [vmem:[%s2237_s7 + $0x68] sm:$0xff]  ;;  %v224_v17 = vld [vmem:[%s2237_s7 + $0x178] sm:$0xff] }
  0x19   : > { %1816 = vmatprep.subr.bf16.mxu1 %v2170_v3  ;;  %v189_v18 = vld [vmem:[%s2237_s7 + $0x60] sm:$0xff]  ;;  %v227_v20 = vld [vmem:[%s2237_s7 + $0x190] sm:$0xff]  ;;  %v192_v21 = vld [vmem:[%s2237_s7 + $0x78] sm:$0xff] }
  0x1a   : > { %1661 = vmatmul.mubr.msk.f32.gmra.mrb[4].mxu0 %vm367_vm1, %v185_v34  ;;  %v193_v19 = vld [vmem:[%s2237_s7 + $0x80] sm:$0xff]  ;;  %v196_v22 = vld [vmem:[%s2237_s7 + $0x98] sm:$0xff]  ;;  %v230_v23 = vld [vmem:[%s2237_s7 + $0x1a8] sm:$0xff] }
  0x1b   : > { %1663 = vmatprep.mubr.msk.f32.mxu0 %vm2171_vm0, %v2172_v6  ;;  %v195_v24 = vld [vmem:[%s2237_s7 + $0x90] sm:$0xff]  ;;  %v233_v26 = vld [vmem:[%s2237_s7 + $0x1c0] sm:$0xff]  ;;  %v202_v28 = vld [vmem:[%s2237_s7 + $0xc8] sm:$0xff] }
  0x1c   : > { %1818 = vmatpush1.bf16.msra.mxu1 %v1817_v27  ;;  %v199_v25 = vld [vmem:[%s2237_s7 + $0xb0] sm:$0xff]  ;;  %v198_v27 = vld [vmem:[%s2237_s7 + $0xa8] sm:$0xff]  ;;  %v236_v29 = vld [vmem:[%s2237_s7 + $0x1d8] sm:$0xff] }
  0x1d   : > { %1819 = vmatprep.subr.bf16.mxu1 %v2170_v3  ;;  %v201_v30 = vld [vmem:[%s2237_s7 + $0xc0] sm:$0xff]  ;;  %v239_v32 = vld [vmem:[%s2237_s7 + $0x1f0] sm:$0xff]  ;;  %v204_v33 = vld [vmem:[%s2237_s7 + $0xd8] sm:$0xff] }
  0x1e   : > { %1664 = vmatmul.mubr.msk.f32.gmra.mrb[6].mxu0 %vm367_vm1, %v188_v38  ;;  %v208_v34 = vld [vmem:[%s2237_s7 + $0xf8] sm:$0xff]  ;;  %v207_v36 = vld [vmem:[%s2237_s7 + $0xf0] sm:$0xff]  ;;  %v245_v38 = vld [vmem:[%s2237_s7 + $0x220] sm:$0xff] }
  0x1f   : > { %1666 = vmatprep.mubr.msk.f32.mxu0 %vm2171_vm0, %v2172_v6  ;;  %v211_v37 = vld [vmem:[%s2237_s7 + $0x110] sm:$0xff]  ;;  %v214_v40 = vld [vmem:[%s2237_s7 + $0x128] sm:$0xff]  ;;  %v248_v41 = vld [vmem:[%s2237_s7 + $0x238] sm:$0xff] }
  0x20   : > { %1821 = vmatpush1.bf16.msra.mxu1 %v1820_v31  ;;  %v205_v31 = vld [vmem:[%s2237_s7 + $0xe0] sm:$0xff]  ;;  %v251_v44 = vld [vmem:[%s2237_s7 + $0x250] sm:$0xff]  ;;  %v216_v45 = vld [vmem:[%s2237_s7 + $0x138] sm:$0xff] }
  0x21   : > { %1822 = vmatprep.subr.bf16.mxu1 %v2170_v3  ;;  %v219_v48 = vld [vmem:[%s2237_s7 + $0x150] sm:$0xff]  ;;  %v226_v52 = vld [vmem:[%s2237_s7 + $0x188] sm:$0xff]  ;;  %v260_v53 = vld [vmem:[%s2237_s7 + $0x298] sm:$0xff] }
  0x22   : > { %1667 = vmatmul.mubr.msk.f32.gmra.mrb[8].mxu0 %vm367_vm1, %v191_v42  ;;  %v213_v42 = vld [vmem:[%s2237_s7 + $0x120] sm:$0xff]  ;;  %v223_v49 = vld [vmem:[%s2237_s7 + $0x170] sm:$0xff]  ;;  %v228_v57 = vld [vmem:[%s2237_s7 + $0x198] sm:$0xff] }
  0x23   : > { %1669 = vmatprep.mubr.msk.f32.mxu0 %vm2171_vm0, %v2172_v6  ;;  %v263_v56 = vld [vmem:[%s2237_s7 + $0x2b0] sm:$0xff]  ;;  %v238_v0 = vld [vmem:[%s2237_s7 + $0x1e8] sm:$0xff]  ;;  %v272_v1 = vld [vmem:[%s2237_s7 + $0x2f8] sm:$0xff] }
  0x24   : > { %1824 = vmatpush1.bf16.msra.mxu1 %v1823_v35  ;;  %v242_v35 = vld [vmem:[%s2237_s7 + $0x208] sm:$0xff]  ;;  %v231_v60 = vld [vmem:[%s2237_s7 + $0x1b0] sm:$0xff] }
  0x25   : > { %1825 = vmatprep.subr.bf16.mxu1 %v2170_v3  ;;  %v235_v61 = vld [vmem:[%s2237_s7 + $0x1d0] sm:$0xff] }
  0x26   : > { %1670 = vmatmul.mubr.msk.f32.gmra.mrb[10].mxu0 %vm367_vm1, %v194_v46  ;;  %v220_v46 = vld [vmem:[%s2237_s7 + $0x158] sm:$0xff] }
  0x27   : > { %1672 = vmatprep.mubr.msk.f32.mxu0 %vm2171_vm0, %v2172_v6 }
  0x28   : > { %1827 = vmatpush1.bf16.msra.mxu1 %v1826_v39  ;;  %v210_v39 = vld [vmem:[%s2237_s7 + $0x108] sm:$0xff] }
  0x29   : > { %1828 = vmatprep.subr.bf16.mxu1 %v2170_v3 }
  0x2a   : > { %1673 = vmatmul.mubr.msk.f32.gmra.mrb[12].mxu0 %vm367_vm1, %v197_v50  ;;  %v257_v50 = vld [vmem:[%s2237_s7 + $0x280] sm:$0xff] }
  0x2b   : > { %1675 = vmatprep.mubr.msk.f32.mxu0 %vm2171_vm0, %v2172_v6 }
  0x2c   : > { %1830 = vmatpush1.bf16.msra.mxu1 %v1829_v43  ;;  %v217_v43 = vld [vmem:[%s2237_s7 + $0x140] sm:$0xff] }
  0x2d   : > { %1831 = vmatprep.subr.bf16.mxu1 %v2170_v3 }
  0x2e   : > { %1676 = vmatmul.mubr.msk.f32.gmra.mrb[14].mxu0 %vm367_vm1, %v200_v54  ;;  %v225_v54 = vld [vmem:[%s2237_s7 + $0x180] sm:$0xff] }
  0x2f   : > { %1678 = vmatprep.mubr.msk.f32.mxu0 %vm2171_vm0, %v2172_v6 }
  0x30   : > { %1833 = vmatpush1.bf16.msra.mxu1 %v1832_v47  ;;  %v254_v47 = vld [vmem:[%s2237_s7 + $0x268] sm:$0xff] }
  0x31   : > { %1834 = vmatprep.subr.bf16.mxu1 %v2170_v3 }
  0x32   : > { %1679 = vmatmul.mubr.msk.f32.gmra.mrb[16].mxu0 %vm367_vm1, %v203_v58  ;;  %v232_v58 = vld [vmem:[%s2237_s7 + $0x1b8] sm:$0xff] }
  0x33   : > { %1681 = vmatprep.mubr.msk.f32.mxu0 %vm2171_vm0, %v2172_v6 }
  0x34   : > { %1836 = vmatpush1.bf16.msra.mxu1 %v1835_v51  ;;  %v222_v51 = vld [vmem:[%s2237_s7 + $0x168] sm:$0xff] }
  0x35   : > { %1837 = vmatprep.subr.bf16.mxu1 %v2170_v3 }
  0x36   : > { %1682 = vmatmul.mubr.msk.f32.gmra.mrb[18].mxu0 %vm367_vm1, %v206_v62  ;;  %v269_v62 = vld [vmem:[%s2237_s7 + $0x2e0] sm:$0xff] }
  0x37   : > { %1684 = vmatprep.mubr.msk.f32.mxu0 %vm2171_vm0, %v2172_v6 }
  0x38   : > { %1839 = vmatpush1.bf16.msra.mxu1 %v1838_v55  ;;  %v229_v55 = vld [vmem:[%s2237_s7 + $0x1a0] sm:$0xff] }
  0x39   : > { %1840 = vmatprep.subr.bf16.mxu1 %v2170_v3 }
  0x3a   : > { %1685 = vmatmul.mubr.msk.f32.gmra.mrb[20].mxu0 %vm367_vm1, %v209_v2  ;;  %v237_v2 = vld [vmem:[%s2237_s7 + $0x1e0] sm:$0xff] }
  0x3b   : > { %1687 = vmatprep.mubr.msk.f32.mxu0 %vm2171_vm0, %v2172_v6 }
  0x3c   : > { %1842 = vmatpush1.bf16.msra.mxu1 %v1841_v59  ;;  %v266_v59 = vld [vmem:[%s2237_s7 + $0x2c8] sm:$0xff] }
  0x3d   : > { %1843 = vmatprep.subr.bf16.mxu1 %v2170_v3 }
  0x3e   : > { %1688 = vmatmul.mubr.msk.f32.gmra.mrb[22].mxu0 %vm367_vm1, %v212_v5  ;;  %v275_v5 = vld [vmem:[%s2237_s7 + $0x310] sm:$0xff] }
  0x3f   : > { %1690 = vmatprep.mubr.msk.f32.mxu0 %vm2171_vm0, %v2172_v6 }
  0x40   : > { %1845 = vmatpush1.bf16.msra.mxu1 %v1844_v63  ;;  %v234_v63 = vld [vmem:[%s2237_s7 + $0x1c8] sm:$0xff] }
  0x41   : > { %1846 = vmatprep.subr.bf16.mxu1 %v2170_v3  ;;  %v180_v3 = vld [vmem:[%s2237_s7 + $0x18] sm:$0xff] }
  0x42   : > { %1691 = vmatmul.mubr.msk.f32.gmra.mrb[24].mxu0 %vm367_vm1, %v215_v9  ;;  %v278_v9 = vld [vmem:[%s2237_s7 + $0x328] sm:$0xff] }
  0x43   : > { %1693 = vmatprep.mubr.msk.f32.mxu0 %vm2171_vm0, %v2172_v6 }
  0x44   : > { %1848 = vmatpush1.bf16.msra.mxu1 %v1847_v4  ;;  %v241_v4 = vld [vmem:[%s2237_s7 + $0x200] sm:$0xff] }
  0x46   : > { %1694 = vmatmul.mubr.msk.f32.gmra.mrb[26].mxu0 %vm367_vm1, %v218_v11  ;;  %v281_v11 = vld [vmem:[%s2237_s7 + $0x340] sm:$0xff] }
  0x47   : > { %580 = vmatmul.mubr.f32.vlgmr.msra.gmra.mrb[0].mxu1 %v177_v7  ;;  %1696 = vmatprep.mubr.msk.f32.mxu0 %vm2171_vm0, %v2172_v6  ;;  %v240_v7 = vld [vmem:[%s2237_s7 + $0x1f8] sm:$0xff] }
  0x48   : > { %584 = vmatprep.mubr.f32.mxu1 %v181_v8  ;;  %v244_v8 = vld [vmem:[%s2237_s7 + $0x218] sm:$0xff] }
  0x4a   : > { %1697 = vmatmul.mubr.msk.f32.gmra.mrb[28].mxu0 %vm367_vm1, %v221_v14  ;;  %v284_v14 = vld [vmem:[%s2237_s7 + $0x358] sm:$0xff] }
  0x4b   : > { %585 = vmatmul.mubr.f32.gmra.mrb[2].mxu1 %v180_v3  ;;  %1699 = vmatprep.mubr.msk.f32.mxu0 %vm2171_vm0, %v2172_v6  ;;  %v243_v3 = vld [vmem:[%s2237_s7 + $0x210] sm:$0xff] }
  0x4c   : > { %589 = vmatprep.mubr.f32.mxu1 %v184_v10  ;;  %v247_v10 = vld [vmem:[%s2237_s7 + $0x230] sm:$0xff] }
  0x4e   : > { %1700 = vmatmul.mubr.msk.f32.gmra.mrb[30].mxu0 %vm367_vm1, %v224_v17  ;;  %v287_v17 = vld [vmem:[%s2237_s7 + $0x370] sm:$0xff] }
  0x4f   : > { %590 = vmatmul.mubr.f32.gmra.mrb[4].mxu1 %v183_v12  ;;  %1702 = vmatprep.mubr.msk.f32.mxu0 %vm2171_vm0, %v2172_v6  ;;  %v246_v12 = vld [vmem:[%s2237_s7 + $0x228] sm:$0xff] }
  0x50   : > { %594 = vmatprep.mubr.f32.mxu1 %v187_v13  ;;  %v250_v13 = vld [vmem:[%s2237_s7 + $0x248] sm:$0xff] }
  0x52   : > { %1703 = vmatmul.mubr.msk.f32.gmra.mrb[32].mxu0 %vm367_vm1, %v227_v20  ;;  %v290_v20 = vld [vmem:[%s2237_s7 + $0x388] sm:$0xff] }
  0x53   : > { %595 = vmatmul.mubr.f32.gmra.mrb[6].mxu1 %v186_v15  ;;  %1705 = vmatprep.mubr.msk.f32.mxu0 %vm2171_vm0, %v2172_v6  ;;  %v249_v15 = vld [vmem:[%s2237_s7 + $0x240] sm:$0xff] }
  0x54   : > { %599 = vmatprep.mubr.f32.mxu1 %v190_v16  ;;  %v253_v16 = vld [vmem:[%s2237_s7 + $0x260] sm:$0xff] }
  0x56   : > { %1706 = vmatmul.mubr.msk.f32.gmra.mrb[34].mxu0 %vm367_vm1, %v230_v23  ;;  %v293_v23 = vld [vmem:[%s2237_s7 + $0x3a0] sm:$0xff] }
  0x57   : > { %600 = vmatmul.mubr.f32.gmra.mrb[8].mxu1 %v189_v18  ;;  %1708 = vmatprep.mubr.msk.f32.mxu0 %vm2171_vm0, %v2172_v6  ;;  %v252_v18 = vld [vmem:[%s2237_s7 + $0x258] sm:$0xff] }
  0x58   : > { %604 = vmatprep.mubr.f32.mxu1 %v193_v19  ;;  %v256_v19 = vld [vmem:[%s2237_s7 + $0x278] sm:$0xff] }
  0x5a   : > { %1709 = vmatmul.mubr.msk.f32.gmra.mrb[36].mxu0 %vm367_vm1, %v233_v26  ;;  %v296_v26 = vld [vmem:[%s2237_s7 + $0x3b8] sm:$0xff] }
  0x5b   : > { %605 = vmatmul.mubr.f32.gmra.mrb[10].mxu1 %v192_v21  ;;  %1711 = vmatprep.mubr.msk.f32.mxu0 %vm2171_vm0, %v2172_v6  ;;  %v255_v21 = vld [vmem:[%s2237_s7 + $0x270] sm:$0xff] }
  0x5c   : > { %609 = vmatprep.mubr.f32.mxu1 %v196_v22  ;;  %v259_v22 = vld [vmem:[%s2237_s7 + $0x290] sm:$0xff] }
  0x5e   : > { %1712 = vmatmul.mubr.msk.f32.gmra.mrb[38].mxu0 %vm367_vm1, %v236_v29  ;;  %v299_v29 = vld [vmem:[%s2237_s7 + $0x3d0] sm:$0xff] }
  0x5f   : > { %610 = vmatmul.mubr.f32.gmra.mrb[12].mxu1 %v195_v24  ;;  %1714 = vmatprep.mubr.msk.f32.mxu0 %vm2171_vm0, %v2172_v6  ;;  %v258_v24 = vld [vmem:[%s2237_s7 + $0x288] sm:$0xff] }
  0x60   : > { %614 = vmatprep.mubr.f32.mxu1 %v199_v25  ;;  %v262_v25 = vld [vmem:[%s2237_s7 + $0x2a8] sm:$0xff] }
  0x62   : > { %1715 = vmatmul.mubr.msk.f32.gmra.mrb[40].mxu0 %vm367_vm1, %v239_v32  ;;  %v302_v32 = vld [vmem:[%s2237_s7 + $0x3e8] sm:$0xff] }
  0x63   : > { %615 = vmatmul.mubr.f32.gmra.mrb[14].mxu1 %v198_v27  ;;  %1717 = vmatprep.mubr.msk.f32.mxu0 %vm2171_vm0, %v2172_v6  ;;  %v261_v27 = vld [vmem:[%s2237_s7 + $0x2a0] sm:$0xff] }
  0x64   : > { %619 = vmatprep.mubr.f32.mxu1 %v202_v28  ;;  %v265_v28 = vld [vmem:[%s2237_s7 + $0x2c0] sm:$0xff] }
  0x66   : > { %1718 = vmatmul.mubr.msk.f32.gmra.mrb[42].mxu0 %vm367_vm1, %v242_v35  ;;  %v305_v35 = vld [vmem:[%s2237_s7 + $0x400] sm:$0xff] }
  0x67   : > { %620 = vmatmul.mubr.f32.gmra.mrb[16].mxu1 %v201_v30  ;;  %1720 = vmatprep.mubr.msk.f32.mxu0 %vm2171_vm0, %v2172_v6  ;;  %v264_v30 = vld [vmem:[%s2237_s7 + $0x2b8] sm:$0xff] }
  0x68   : > { %624 = vmatprep.mubr.f32.mxu1 %v205_v31  ;;  %v268_v31 = vld [vmem:[%s2237_s7 + $0x2d8] sm:$0xff] }
  0x6a   : > { %1721 = vmatmul.mubr.msk.f32.gmra.mrb[44].mxu0 %vm367_vm1, %v245_v38  ;;  %v308_v38 = vld [vmem:[%s2237_s7 + $0x418] sm:$0xff] }
  0x6b   : > { %625 = vmatmul.mubr.f32.gmra.mrb[18].mxu1 %v204_v33  ;;  %1723 = vmatprep.mubr.msk.f32.mxu0 %vm2171_vm0, %v2172_v6  ;;  %v267_v33 = vld [vmem:[%s2237_s7 + $0x2d0] sm:$0xff] }
  0x6c   : > { %629 = vmatprep.mubr.f32.mxu1 %v208_v34  ;;  %v271_v34 = vld [vmem:[%s2237_s7 + $0x2f0] sm:$0xff] }
  0x6e   : > { %1724 = vmatmul.mubr.msk.f32.gmra.mrb[46].mxu0 %vm367_vm1, %v248_v41  ;;  %v311_v41 = vld [vmem:[%s2237_s7 + $0x430] sm:$0xff] }
  0x6f   : > { %630 = vmatmul.mubr.f32.gmra.mrb[20].mxu1 %v207_v36  ;;  %1726 = vmatprep.mubr.msk.f32.mxu0 %vm2171_vm0, %v2172_v6  ;;  %v270_v36 = vld [vmem:[%s2237_s7 + $0x2e8] sm:$0xff] }
  0x70   : > { %634 = vmatprep.mubr.f32.mxu1 %v211_v37  ;;  %v274_v37 = vld [vmem:[%s2237_s7 + $0x308] sm:$0xff] }
  0x72   : > { %1727 = vmatmul.mubr.msk.f32.gmra.mrb[48].mxu0 %vm367_vm1, %v251_v44  ;;  %v314_v44 = vld [vmem:[%s2237_s7 + $0x448] sm:$0xff] }
  0x73   : > { %635 = vmatmul.mubr.f32.gmra.mrb[22].mxu1 %v210_v39  ;;  %1729 = vmatprep.mubr.msk.f32.mxu0 %vm2171_vm0, %v2172_v6  ;;  %v273_v39 = vld [vmem:[%s2237_s7 + $0x300] sm:$0xff] }
  0x74   : > { %639 = vmatprep.mubr.f32.mxu1 %v214_v40  ;;  %v277_v40 = vld [vmem:[%s2237_s7 + $0x320] sm:$0xff] }
  0x76   : > { %1730 = vmatmul.mubr.msk.f32.gmra.mrb[50].mxu0 %vm367_vm1, %v254_v47  ;;  %v317_v47 = vld [vmem:[%s2237_s7 + $0x460] sm:$0xff] }
  0x77   : > { %640 = vmatmul.mubr.f32.gmra.mrb[24].mxu1 %v213_v42  ;;  %1732 = vmatprep.mubr.msk.f32.mxu0 %vm2171_vm0, %v2172_v6  ;;  %v276_v42 = vld [vmem:[%s2237_s7 + $0x318] sm:$0xff] }
  0x78   : > { %644 = vmatprep.mubr.f32.mxu1 %v217_v43  ;;  %v280_v43 = vld [vmem:[%s2237_s7 + $0x338] sm:$0xff] }
  0x7a   : > { %1733 = vmatmul.mubr.msk.f32.gmra.mrb[52].mxu0 %vm367_vm1, %v257_v50  ;;  %v320_v50 = vld [vmem:[%s2237_s7 + $0x478] sm:$0xff] }
  0x7b   : > { %645 = vmatmul.mubr.f32.gmra.mrb[26].mxu1 %v216_v45  ;;  %1735 = vmatprep.mubr.msk.f32.mxu0 %vm2171_vm0, %v2172_v6  ;;  %v279_v45 = vld [vmem:[%s2237_s7 + $0x330] sm:$0xff] }
  0x7c   : > { %649 = vmatprep.mubr.f32.mxu1 %v220_v46  ;;  %v283_v46 = vld [vmem:[%s2237_s7 + $0x350] sm:$0xff] }
  0x7e   : > { %1736 = vmatmul.mubr.msk.f32.gmra.mrb[54].mxu0 %vm367_vm1, %v260_v53  ;;  %v323_v53 = vld [vmem:[%s2237_s7 + $0x490] sm:$0xff] }
  0x7f   : > { %650 = vmatmul.mubr.f32.gmra.mrb[28].mxu1 %v219_v48  ;;  %1738 = vmatprep.mubr.msk.f32.mxu0 %vm2171_vm0, %v2172_v6  ;;  %v282_v48 = vld [vmem:[%s2237_s7 + $0x348] sm:$0xff] }
  0x80   : > { %654 = vmatprep.mubr.f32.mxu1 %v223_v49  ;;  %v286_v49 = vld [vmem:[%s2237_s7 + $0x368] sm:$0xff] }
  0x82   : > { %1739 = vmatmul.mubr.msk.f32.gmra.mrb[56].mxu0 %vm367_vm1, %v263_v56  ;;  %v291_v56 = vld [vmem:[%s2237_s7 + $0x390] sm:$0xff] }
  0x83   : > { %655 = vmatmul.mubr.f32.gmra.mrb[30].mxu1 %v222_v51  ;;  %1741 = vmatprep.mubr.msk.f32.mxu0 %vm2171_vm0, %v2172_v6  ;;  %v285_v51 = vld [vmem:[%s2237_s7 + $0x360] sm:$0xff] }
  0x84   : > { %659 = vmatprep.mubr.f32.mxu1 %v226_v52  ;;  %v289_v52 = vld [vmem:[%s2237_s7 + $0x380] sm:$0xff] }
  0x86   : > { %1742 = vmatmul.mubr.msk.f32.gmra.mrb[58].mxu0 %vm367_vm1, %v266_v59  ;;  %v297_v59 = vld [vmem:[%s2237_s7 + $0x3c0] sm:$0xff] }
  0x87   : > { %660 = vmatmul.mubr.f32.gmra.mrb[32].mxu1 %v225_v54  ;;  %1744 = vmatprep.mubr.msk.f32.mxu0 %vm2171_vm0, %v2172_v6  ;;  %v288_v54 = vld [vmem:[%s2237_s7 + $0x378] sm:$0xff] }
  0x88   : > { %664 = vmatprep.mubr.f32.mxu1 %v229_v55  ;;  %v292_v55 = vld [vmem:[%s2237_s7 + $0x398] sm:$0xff] }
  0x8a   : > { %1745 = vmatmul.mubr.msk.f32.gmra.mrb[60].mxu0 %vm367_vm1, %v269_v62  ;;  %v304_v62 = vld [vmem:[%s2237_s7 + $0x3f8] sm:$0xff] }
  0x8b   : > { %665 = vmatmul.mubr.f32.gmra.mrb[34].mxu1 %v228_v57  ;;  %1747 = vmatprep.mubr.msk.f32.mxu0 %vm2171_vm0, %v2172_v6  ;;  %v295_v57 = vld [vmem:[%s2237_s7 + $0x3b0] sm:$0xff] }
  0x8c   : > { %669 = vmatprep.mubr.f32.mxu1 %v232_v58  ;;  %v298_v58 = vld [vmem:[%s2237_s7 + $0x3c8] sm:$0xff] }
  0x8e   : > { %1748 = vmatmul.mubr.msk.f32.gmra.mrb[62].mxu0 %vm367_vm1, %v272_v1  ;;  %v307_v1 = vld [vmem:[%s2237_s7 + $0x410] sm:$0xff] }
  0x8f   : > { %670 = vmatmul.mubr.f32.gmra.mrb[36].mxu1 %v231_v60  ;;  %1750 = vmatprep.mubr.msk.f32.mxu0 %vm2171_vm0, %v2172_v6  ;;  %v301_v60 = vld [vmem:[%s2237_s7 + $0x3e0] sm:$0xff] }
  0x90   : > { %674 = vmatprep.mubr.f32.mxu1 %v235_v61  ;;  %v300_v61 = vld [vmem:[%s2237_s7 + $0x3d8] sm:$0xff] }
  0x92   : > { %1751 = vmatmul.mubr.msk.f32.gmra.mrb[64].mxu0 %vm367_vm1, %v275_v5 }
  0x93   : > { %675 = vmatmul.mubr.f32.gmra.mrb[38].mxu1 %v234_v63  ;;  %1753 = vmatprep.mubr.msk.f32.mxu0 %vm2171_vm0, %v2172_v6  ;;  %v303_v63 = vld [vmem:[%s2237_s7 + $0x3f0] sm:$0xff] }
  0x94   : > { %679 = vmatprep.mubr.f32.mxu1 %v238_v0 }
  0x96   : > { %1754 = vmatmul.mubr.msk.f32.gmra.mrb[66].mxu0 %vm367_vm1, %v278_v9  ;;  %v309_v9 = vld [vmem:[%s2237_s7 + $0x420] sm:$0xff] }
  0x97   : > { %680 = vmatmul.mubr.f32.gmra.mrb[40].mxu1 %v237_v2  ;;  %1756 = vmatprep.mubr.msk.f32.mxu0 %vm2171_vm0, %v2172_v6 }
  0x98   : > { %684 = vmatprep.mubr.f32.mxu1 %v241_v4  ;;  %v306_v4 = vld [vmem:[%s2237_s7 + $0x408] sm:$0xff] }
  0x9a   : > { %1757 = vmatmul.mubr.msk.f32.gmra.mrb[68].mxu0 %vm367_vm1, %v281_v11 }
  0x9b   : > { %685 = vmatmul.mubr.f32.gmra.mrb[42].mxu1 %v240_v7  ;;  %1759 = vmatprep.mubr.msk.f32.mxu0 %vm2171_vm0, %v2172_v6  ;;  %v310_v7 = vld [vmem:[%s2237_s7 + $0x428] sm:$0xff] }
  0x9c   : > { %689 = vmatprep.mubr.f32.mxu1 %v244_v8 }
  0x9e   : > { %1760 = vmatmul.mubr.msk.f32.gmra.mrb[70].mxu0 %vm367_vm1, %v284_v14  ;;  %v316_v14 = vld [vmem:[%s2237_s7 + $0x458] sm:$0xff] }
  0x9f   : > { %690 = vmatmul.mubr.f32.gmra.mrb[44].mxu1 %v243_v3  ;;  %1762 = vmatprep.mubr.msk.f32.mxu0 %vm2171_vm0, %v2172_v6 }
  0xa0   : > { %694 = vmatprep.mubr.f32.mxu1 %v247_v10  ;;  %v313_v10 = vld [vmem:[%s2237_s7 + $0x440] sm:$0xff] }
  0xa2   : > { %1763 = vmatmul.mubr.msk.f32.gmra.mrb[72].mxu0 %vm367_vm1, %v287_v17 }
  0xa3   : > { %695 = vmatmul.mubr.f32.gmra.mrb[46].mxu1 %v246_v12  ;;  %1765 = vmatprep.mubr.msk.f32.mxu0 %vm2171_vm0, %v2172_v6  ;;  %v312_v12 = vld [vmem:[%s2237_s7 + $0x438] sm:$0xff] }
  0xa4   : > { %699 = vmatprep.mubr.f32.mxu1 %v250_v13 }
  0xa6   : > { %1766 = vmatmul.mubr.msk.f32.gmra.mrb[74].mxu0 %vm367_vm1, %v290_v20  ;;  %v318_v20 = vld [vmem:[%s2237_s7 + $0x468] sm:$0xff] }
  0xa7   : > { %700 = vmatmul.mubr.f32.gmra.mrb[48].mxu1 %v249_v15  ;;  %1768 = vmatprep.mubr.msk.f32.mxu0 %vm2171_vm0, %v2172_v6 }
  0xa8   : > { %704 = vmatprep.mubr.f32.mxu1 %v253_v16  ;;  %v315_v16 = vld [vmem:[%s2237_s7 + $0x450] sm:$0xff] }
  0xaa   : > { %1769 = vmatmul.mubr.msk.f32.gmra.mrb[76].mxu0 %vm367_vm1, %v293_v23 }
  0xab   : > { %705 = vmatmul.mubr.f32.gmra.mrb[50].mxu1 %v252_v18  ;;  %1771 = vmatprep.mubr.msk.f32.mxu0 %vm2171_vm0, %v2172_v6  ;;  %v319_v18 = vld [vmem:[%s2237_s7 + $0x470] sm:$0xff] }
  0xac   : > { %709 = vmatprep.mubr.f32.mxu1 %v256_v19 }
  0xae   : > { %1772 = vmatmul.mubr.msk.f32.gmra.mrb[78].mxu0 %vm367_vm1, %v296_v26 }
  0xaf   : > { %710 = vmatmul.mubr.f32.gmra.mrb[52].mxu1 %v255_v21  ;;  %1774 = vmatprep.mubr.msk.f32.mxu0 %vm2171_vm0, %v2172_v6 }
  0xb0   : > { %714 = vmatprep.mubr.f32.mxu1 %v259_v22  ;;  %v322_v22 = vld [vmem:[%s2237_s7 + $0x488] sm:$0xff] }
  0xb2   : > { %1775 = vmatmul.mubr.msk.f32.gmra.mrb[80].mxu0 %vm367_vm1, %v299_v29 }
  0xb3   : > { %715 = vmatmul.mubr.f32.gmra.mrb[54].mxu1 %v258_v24  ;;  %1777 = vmatprep.mubr.msk.f32.mxu0 %vm2171_vm0, %v2172_v6  ;;  %v321_v24 = vld [vmem:[%s2237_s7 + $0x480] sm:$0xff] }
  0xb4   : > { %719 = vmatprep.mubr.f32.mxu1 %v262_v25 }
  0xb6   : > { %1778 = vmatmul.mubr.msk.f32.gmra.mrb[82].mxu0 %vm367_vm1, %v302_v32 }
  0xb7   : > { %720 = vmatmul.mubr.f32.gmra.mrb[56].mxu1 %v261_v27  ;;  %1780 = vmatprep.mubr.msk.f32.mxu0 %vm2171_vm0, %v2172_v6 }
  0xb8   : > { %724 = vmatprep.mubr.f32.mxu1 %v265_v28 }
  0xba   : > { %1781 = vmatmul.mubr.msk.f32.gmra.mrb[84].mxu0 %vm367_vm1, %v305_v35  ;;  %v2646_v35 = vld [vmem:[%s2883_s2] ss:$0 sm:$0xff] }
  0xbb   : > { %725 = vmatmul.mubr.f32.gmra.mrb[58].mxu1 %v264_v30  ;;  %1783 = vmatprep.mubr.msk.f32.mxu0 %vm2171_vm0, %v2172_v6 }
  0xbc   : > { %729 = vmatprep.mubr.f32.mxu1 %v268_v31 }
  0xbe   : > { %1784 = vmatmul.mubr.msk.f32.gmra.mrb[86].mxu0 %vm367_vm1, %v308_v38 }
  0xbf   : > { %730 = vmatmul.mubr.f32.gmra.mrb[60].mxu1 %v267_v33  ;;  %1786 = vmatprep.mubr.msk.f32.mxu0 %vm2171_vm0, %v2172_v6 }
  0xc0   : > { %734 = vmatprep.mubr.f32.mxu1 %v271_v34 }
  0xc2   : > { %1787 = vmatmul.mubr.msk.f32.gmra.mrb[88].mxu0 %vm367_vm1, %v311_v41 }
  0xc3   : > { %735 = vmatmul.mubr.f32.gmra.mrb[62].mxu1 %v270_v36  ;;  %1789 = vmatprep.mubr.msk.f32.mxu0 %vm2171_vm0, %v2172_v6 }
  0xc4   : > { %739 = vmatprep.mubr.f32.mxu1 %v274_v37 }
  0xc6   : > { %1790 = vmatmul.mubr.msk.f32.gmra.mrb[90].mxu0 %vm367_vm1, %v314_v44 }
  0xc7   : > { %740 = vmatmul.mubr.f32.gmra.mrb[64].mxu1 %v273_v39  ;;  %1792 = vmatprep.mubr.msk.f32.mxu0 %vm2171_vm0, %v2172_v6 }
  0xc8   : > { %744 = vmatprep.mubr.f32.mxu1 %v277_v40 }
  0xca   : > { %1793 = vmatmul.mubr.msk.f32.gmra.mrb[92].mxu0 %vm367_vm1, %v317_v47 }
  0xcb   : > { %745 = vmatmul.mubr.f32.gmra.mrb[66].mxu1 %v276_v42  ;;  %1795 = vmatprep.mubr.msk.f32.mxu0 %vm2171_vm0, %v2172_v6 }
  0xcc   : > { %749 = vmatprep.mubr.f32.mxu1 %v280_v43 }
  0xce   : > { %1796 = vmatmul.mubr.msk.f32.gmra.mrb[94].mxu0 %vm367_vm1, %v320_v50 }
  0xcf   : > { %750 = vmatmul.mubr.f32.gmra.mrb[68].mxu1 %v279_v45  ;;  %1798 = vmatprep.mubr.msk.f32.mxu0 %vm2171_vm0, %v2172_v6  ;;  %v294_v6 = vld [vmem:[%s2237_s7 + $0x3a8] sm:$0xff]  ;;  %s1540_s7 = sshll.u32 %s2886_s20, 3 }
  0xd0   : > { %754 = vmatprep.mubr.f32.mxu1 %v283_v46  ;;  %s2679_s22 = scalar_lea.vmem %s2884_s3, %s1540_s7 }
  0xd2   : > { %1799 = vmatmul.mubr.msk.f32.gmra.mrb[96].mxu0 %vm367_vm1, %v323_v53 }
  0xd3   : > { %755 = vmatmul.mubr.f32.gmra.mrb[70].mxu1 %v282_v48 }
  0xd4   : > { %759 = vmatprep.mubr.f32.mxu1 %v286_v49 }
  0xd7   : > { %760 = vmatmul.mubr.f32.gmra.mrb[72].mxu1 %v285_v51 }
  0xd8   : > { %764 = vmatprep.mubr.f32.mxu1 %v289_v52 }
  0xdb   : > { %765 = vmatmul.mubr.f32.gmra.mrb[74].mxu1 %v288_v54 }
  0xdc   : > { %769 = vmatprep.mubr.f32.mxu1 %v292_v55 }
  0xdf   : > { %770 = vmatmul.mubr.f32.gmra.mrb[76].mxu1 %v291_v56 }
  0xe0   : > { %774 = vmatprep.mubr.f32.mxu1 %v295_v57 }
  0xe3   : > { %775 = vmatmul.mubr.f32.gmra.mrb[78].mxu1 %v294_v6 }
  0xe4   : > { %779 = vmatprep.mubr.f32.mxu1 %v298_v58 }
  0xe5   : > { %v891_v0 = vpop.f32.mrb[0].mxu0 }
  0xe6   : > { %v1656_v2 = vpop.f32.mrb[1].mxu0 }
  0xe7   : > { %780 = vmatmul.mubr.f32.gmra.mrb[80].mxu1 %v297_v59 }
  0xe8   : > { %784 = vmatprep.mubr.f32.mxu1 %v301_v60 }
  0xe9   : > { %v896_v5 = vpop.f32.mrb[2].mxu0 }
  0xea   : > { %v1659_v8 = vpop.f32.mrb[3].mxu0 }
  0xeb   : > { %785 = vmatmul.mubr.f32.gmra.mrb[82].mxu1 %v300_v61 }
  0xec   : > { %789 = vmatprep.mubr.f32.mxu1 %v304_v62 }
  0xed   : > { %v901_v3 = vpop.f32.mrb[4].mxu0 }
  0xee   : > { %v1662_v11 = vpop.f32.mrb[5].mxu0 }
  0xef   : > { %790 = vmatmul.mubr.f32.gmra.mrb[84].mxu1 %v303_v63 }
  0xf0   : > { %794 = vmatprep.mubr.f32.mxu1 %v307_v1 }
  0xf1   : > { %v906_v13 = vpop.f32.mrb[6].mxu0 }
  0xf2   : > { %v1665_v15 = vpop.f32.mrb[7].mxu0 }
  0xf3   : > { %795 = vmatmul.mubr.f32.gmra.mrb[86].mxu1 %v306_v4 }
  0xf4   : > { %799 = vmatprep.mubr.f32.mxu1 %v310_v7 }
  0xf5   : > { %v2625_v17 = vpop.f32.mrb[8].mxu0 }
  0xf6   : > { %v1668_v19 = vpop.f32.mrb[9].mxu0 }
  0xf7   : > { %800 = vmatmul.mubr.f32.gmra.mrb[88].mxu1 %v309_v9 }
  0xf8   : > { %804 = vmatprep.mubr.f32.mxu1 %v313_v10 }
  0xf9   : > { %v2629_v21 = vpop.f32.mrb[10].mxu0 }
  0xfa   : > { %v1671_v23 = vpop.f32.mrb[11].mxu0 }
  0xfb   : > { %805 = vmatmul.mubr.f32.gmra.mrb[90].mxu1 %v312_v12 }
  0xfc   : > { %809 = vmatprep.mubr.f32.mxu1 %v316_v14 }
  0xfd   : > { %v2633_v25 = vpop.f32.mrb[12].mxu0 }
  0xfe   : > { %v1674_v26 = vpop.f32.mrb[13].mxu0 }
  0xff   : > { %810 = vmatmul.mubr.f32.gmra.mrb[92].mxu1 %v315_v16 }
 0x100   : > { %814 = vmatprep.mubr.f32.mxu1 %v319_v18 }
 0x101   : > { %v2635_v27 = vpop.f32.mrb[14].mxu0 }
 0x102   : > { %v1677_v28 = vpop.f32.mrb[15].mxu0 }
 0x103   : > { %815 = vmatmul.mubr.f32.gmra.mrb[94].mxu1 %v318_v20 }
 0x104   : > { %819 = vmatprep.mubr.f32.mxu1 %v322_v22 }
 0x105   : > { %v2637_v29 = vpop.f32.mrb[16].mxu0 }
 0x106   : > { %v1680_v30 = vpop.f32.mrb[17].mxu0 }
 0x107   : > { %820 = vmatmul.mubr.f32.gmra.mrb[96].mxu1 %v321_v24 }
 0x109   : > { %v2639_v31 = vpop.f32.mrb[18].mxu0 }
 0x10a   : > { %v1683_v32 = vpop.f32.mrb[19].mxu0 }
 0x10d   : > { %v2641_v33 = vpop.f32.mrb[20].mxu0 }
 0x10e   : > { %v1686_v34 = vpop.f32.mrb[21].mxu0 }
 0x111   : > { %v2648_v36 = vpop.f32.mrb[22].mxu0 }
 0x112   : > { %v1689_v37 = vpop.f32.mrb[23].mxu0 }
 0x115   : > { %v2651_v41 = vpop.f32.mrb[24].mxu0 }
 0x116   : > { %v1692_v43 = vpop.f32.mrb[25].mxu0 }
 0x119   : > { %v2654_v48 = vpop.f32.mrb[26].mxu0 }
 0x11a   : > { %v581_v38 = vpop.f32.mrb[0].mxu1  ;;  %v1695_v51 = vpop.f32.mrb[27].mxu0 }
 0x11b   : > { %v582_v39 = vadd.f32 %v2646_v35, %v581_v38  ;;  %v583_v40 = vpop.f32.mrb[1].mxu1 }
 0x11d   : > { %v892_v42 = vadd.f32 %v891_v0, %v582_v39  ;;  %v2657_v56 = vpop.f32.mrb[28].mxu0 }
 0x11e   : > { %v586_v44 = vpop.f32.mrb[2].mxu1  ;;  %v1698_v58 = vpop.f32.mrb[29].mxu0 }
 0x11f   : > { %v1135_v45 = vsub.f32 0.0, %v892_v42  ;;  %v587_v46 = vadd.f32 %v2646_v35, %v586_v44  ;;  %v588_v47 = vpop.f32.mrb[3].mxu1 }
 0x121   : > { %v1184_v49 = vmul.f32 1.442695, %v1135_v45  ;;  %v897_v50 = vadd.f32 %v896_v5, %v587_v46  ;;  %v2660_v63 = vpop.f32.mrb[30].mxu0 }
 0x122   : > { %v591_v52 = vpop.f32.mrb[4].mxu1  ;;  %v1701_v2 = vpop.f32.mrb[31].mxu0 }
 0x123   : > { %1965 = vpow2.f32 %v1184_v49  ;;  %v1136_v53 = vsub.f32 0.0, %v897_v50  ;;  %v592_v54 = vadd.f32 %v2646_v35, %v591_v52  ;;  %v593_v55 = vpop.f32.mrb[5].mxu1 }
 0x125   : > { %v1186_v57 = vmul.f32 1.442695, %v1136_v53  ;;  %v902_v6 = vadd.f32 %v901_v3, %v592_v54  ;;  %v2663_v9 = vpop.f32.mrb[32].mxu0 }
 0x126   : > { %v596_v59 = vpop.f32.mrb[6].mxu1  ;;  %v1704_v12 = vpop.f32.mrb[33].mxu0 }
 0x127   : > { %1967 = vpow2.f32 %v1186_v57  ;;  %v1137_v60 = vsub.f32 0.0, %v902_v6  ;;  %v597_v61 = vadd.f32 %v2646_v35, %v596_v59  ;;  %v598_v62 = vpop.f32.mrb[7].mxu1 }
 0x129   : > { %v1188_v0 = vmul.f32 1.442695, %v1137_v60  ;;  %v907_v1 = vadd.f32 %v906_v13, %v597_v61  ;;  %v2667_v19 = vpop.f32.mrb[34].mxu0 }
 0x12a   : > { %v601_v4 = vpop.f32.mrb[8].mxu1  ;;  %v1707_v24 = vpop.f32.mrb[35].mxu0 }
 0x12b   : > { %1969 = vpow2.f32 %v1188_v0  ;;  %v1138_v5 = vsub.f32 0.0, %v907_v1  ;;  %v602_v7 = vadd.f32 %v2646_v35, %v601_v4  ;;  %v603_v8 = vpop.f32.mrb[9].mxu1 }
 0x12d   : > { %v1966_v3 = vpop.eup %1965  ;;  %v1190_v10 = vmul.f32 1.442695, %v1138_v5  ;;  %v912_v11 = vadd.f32 %v2625_v17, %v602_v7  ;;  %v2671_v34 = vpop.f32.mrb[36].mxu0 }
 0x12e   : > { %v1282_v14 = vadd.f32 1.0, %v1966_v3  ;;  %v606_v15 = vpop.f32.mrb[10].mxu1  ;;  %v1710_v40 = vpop.f32.mrb[37].mxu0 }
 0x12f   : > { %1971 = vpow2.f32 %v1190_v10  ;;  %v1139_v16 = vsub.f32 0.0, %v912_v11  ;;  %v607_v13 = vadd.f32 %v2646_v35, %v606_v15  ;;  %v608_v18 = vpop.f32.mrb[11].mxu1 }
 0x130   : > { %1973 = vrcp.f32 %v1282_v14 }
 0x131   : > { %v1968_v20 = vpop.eup %1967  ;;  %v1192_v22 = vmul.f32 1.442695, %v1139_v16  ;;  %v917_v23 = vadd.f32 %v2629_v21, %v607_v13  ;;  %v2681_v46 = vpop.f32.mrb[38].mxu0 }
 0x132   : > { %v1283_v26 = vadd.f32 1.0, %v1968_v20  ;;  %v611_v28 = vpop.f32.mrb[12].mxu1  ;;  %v1713_v50 = vpop.f32.mrb[39].mxu0 }
 0x133   : > { %1975 = vpow2.f32 %v1192_v22  ;;  %v1140_v17 = vsub.f32 0.0, %v917_v23  ;;  %v612_v30 = vadd.f32 %v2646_v35, %v611_v28  ;;  %v613_v32 = vpop.f32.mrb[13].mxu1 }
 0x134   : > { %1977 = vrcp.f32 %v1283_v26 }
 0x135   : > { %v1970_v37 = vpop.eup %1969  ;;  %v1194_v38 = vmul.f32 1.442695, %v1140_v17  ;;  %v922_v39 = vadd.f32 %v2633_v25, %v612_v30  ;;  %v2686_v6 = vpop.f32.mrb[40].mxu0 }
 0x136   : > { %v1284_v42 = vadd.f32 1.0, %v1970_v37  ;;  %v616_v43 = vpop.f32.mrb[14].mxu1  ;;  %v1716_v61 = vpop.f32.mrb[41].mxu0 }
 0x137   : > { %1979 = vpow2.f32 %v1194_v38  ;;  %v1141_v21 = vsub.f32 0.0, %v922_v39  ;;  %v617_v44 = vadd.f32 %v2646_v35, %v616_v43  ;;  %v618_v45 = vpop.f32.mrb[15].mxu1 }
 0x138   : > { %1981 = vrcp.f32 %v1284_v42 }
 0x139   : > { %v1972_v47 = vpop.eup %1971  ;;  %v1196_v49 = vmul.f32 1.442695, %v1141_v21  ;;  %v927_v25 = vadd.f32 %v2635_v27, %v617_v44  ;;  %v2691_v5 = vpop.f32.mrb[42].mxu0 }
 0x13a   : > { %v1974_v51 = vpop.eup %1973  ;;  %v1285_v52 = vadd.f32 1.0, %v1972_v47  ;;  %v621_v53 = vpop.f32.mrb[16].mxu1 }
 0x13b   : > { %1429 = vst [vmem:[%s2679_s22] sm:$0xff] %v1974_v51  ;;  %1983 = vpow2.f32 %v1196_v49  ;;  %v1142_v54 = vsub.f32 0.0, %v927_v25  ;;  %v622_v55 = vadd.f32 %v2646_v35, %v621_v53  ;;  %v623_v57 = vpop.f32.mrb[17].mxu1  ;;  %v1719_v10 = vpop.f32.mrb[43].mxu0 }
 0x13c   : > { %1985 = vrcp.f32 %v1285_v52 }
 0x13d   : > { %v1976_v58 = vpop.eup %1975  ;;  %v1198_v59 = vmul.f32 1.442695, %v1142_v54  ;;  %v932_v60 = vadd.f32 %v2637_v29, %v622_v55  ;;  %v2696_v13 = vpop.f32.mrb[44].mxu0 }
 0x13e   : > { %v1978_v27 = vpop.eup %1977  ;;  %v1286_v62 = vadd.f32 1.0, %v1976_v58  ;;  %v626_v0 = vpop.f32.mrb[18].mxu1 }
 0x13f   : > { %1430 = vst [vmem:[%s2679_s22 + $0x8] sm:$0xff] %v1978_v27  ;;  %1987 = vpow2.f32 %v1198_v59  ;;  %v1143_v1 = vsub.f32 0.0, %v932_v60  ;;  %v627_v2 = vadd.f32 %v2646_v35, %v626_v0  ;;  %v628_v4 = vpop.f32.mrb[19].mxu1  ;;  %v1722_v23 = vpop.f32.mrb[45].mxu0 }
 0x140   : > { %1989 = vrcp.f32 %v1286_v62 }
 0x141   : > { %v1980_v7 = vpop.eup %1979  ;;  %v1200_v8 = vmul.f32 1.442695, %v1143_v1  ;;  %v937_v3 = vadd.f32 %v2639_v31, %v627_v2  ;;  %v2701_v32 = vpop.f32.mrb[46].mxu0 }
 0x142   : > { %v1982_v29 = vpop.eup %1981  ;;  %v1287_v11 = vadd.f32 1.0, %v1980_v7  ;;  %v631_v12 = vpop.f32.mrb[20].mxu1 }
 0x143   : > { %1431 = vst [vmem:[%s2679_s22 + $0x10] sm:$0xff] %v1982_v29  ;;  %1991 = vpow2.f32 %v1200_v8  ;;  %v1144_v14 = vsub.f32 0.0, %v937_v3  ;;  %v632_v15 = vadd.f32 %v2646_v35, %v631_v12  ;;  %v633_v16 = vpop.f32.mrb[21].mxu1  ;;  %v1725_v40 = vpop.f32.mrb[47].mxu0 }
 0x144   : > { %1993 = vrcp.f32 %v1287_v11 }
 0x145   : > { %v1984_v18 = vpop.eup %1983  ;;  %v1202_v20 = vmul.f32 1.442695, %v1144_v14  ;;  %v942_v22 = vadd.f32 %v2641_v33, %v632_v15  ;;  %v2706_v47 = vpop.f32.mrb[48].mxu0 }
 0x146   : > { %v1986_v31 = vpop.eup %1985  ;;  %v1288_v24 = vadd.f32 1.0, %v1984_v18  ;;  %v636_v26 = vpop.f32.mrb[22].mxu1 }
 0x147   : > { %1432 = vst [vmem:[%s2679_s22 + $0x18] sm:$0xff] %v1986_v31  ;;  %1995 = vpow2.f32 %v1202_v20  ;;  %v1145_v28 = vsub.f32 0.0, %v942_v22  ;;  %v637_v17 = vadd.f32 %v2646_v35, %v636_v26  ;;  %v638_v30 = vpop.f32.mrb[23].mxu1  ;;  %v1728_v51 = vpop.f32.mrb[49].mxu0 }
 0x148   : > { %1997 = vrcp.f32 %v1288_v24 }
 0x149   : > { %v1988_v37 = vpop.eup %1987  ;;  %v1204_v38 = vmul.f32 1.442695, %v1145_v28  ;;  %v947_v39 = vadd.f32 %v2648_v36, %v637_v17  ;;  %v2711_v58 = vpop.f32.mrb[50].mxu0 }
 0x14a   : > { %v1990_v33 = vpop.eup %1989  ;;  %v1289_v42 = vadd.f32 1.0, %v1988_v37  ;;  %v641_v43 = vpop.f32.mrb[24].mxu1 }
 0x14b   : > { %1433 = vst [vmem:[%s2679_s22 + $0x20] sm:$0xff] %v1990_v33  ;;  %1999 = vpow2.f32 %v1204_v38  ;;  %v1146_v21 = vsub.f32 0.0, %v947_v39  ;;  %v642_v44 = vadd.f32 %v2646_v35, %v641_v43  ;;  %v643_v45 = vpop.f32.mrb[25].mxu1  ;;  %v1731_v27 = vpop.f32.mrb[51].mxu0 }
 0x14c   : > { %2001 = vrcp.f32 %v1289_v42 }
 0x14d   : > { %v1992_v49 = vpop.eup %1991  ;;  %v1206_v25 = vmul.f32 1.442695, %v1146_v21  ;;  %v952_v50 = vadd.f32 %v2651_v41, %v642_v44  ;;  %v2716_v7 = vpop.f32.mrb[52].mxu0 }
 0x14e   : > { %v1994_v36 = vpop.eup %1993  ;;  %v1290_v52 = vadd.f32 1.0, %v1992_v49  ;;  %v646_v53 = vpop.f32.mrb[26].mxu1 }
 0x14f   : > { %1434 = vst [vmem:[%s2679_s22 + $0x28] sm:$0xff] %v1994_v36  ;;  %2003 = vpow2.f32 %v1206_v25  ;;  %v1147_v54 = vsub.f32 0.0, %v952_v50  ;;  %v647_v55 = vadd.f32 %v2646_v35, %v646_v53  ;;  %v648_v57 = vpop.f32.mrb[27].mxu1  ;;  %v1734_v29 = vpop.f32.mrb[53].mxu0 }
 0x150   : > { %2005 = vrcp.f32 %v1290_v52 }
 0x151   : > { %v1996_v59 = vpop.eup %1995  ;;  %v1208_v60 = vmul.f32 1.442695, %v1147_v54  ;;  %v957_v61 = vadd.f32 %v2654_v48, %v647_v55  ;;  %v2721_v18 = vpop.f32.mrb[54].mxu0 }
 0x152   : > { %v1998_v41 = vpop.eup %1997  ;;  %v1291_v62 = vadd.f32 1.0, %v1996_v59  ;;  %v651_v0 = vpop.f32.mrb[28].mxu1 }
 0x153   : > { %1435 = vst [vmem:[%s2679_s22 + $0x30] sm:$0xff] %v1998_v41  ;;  %2007 = vpow2.f32 %v1208_v60  ;;  %v1148_v1 = vsub.f32 0.0, %v957_v61  ;;  %v652_v2 = vadd.f32 %v2646_v35, %v651_v0  ;;  %v653_v4 = vpop.f32.mrb[29].mxu1  ;;  %v1737_v31 = vpop.f32.mrb[55].mxu0 }
 0x154   : > { %2009 = vrcp.f32 %v1291_v62 }
 0x155   : > { %v2000_v8 = vpop.eup %1999  ;;  %v1210_v3 = vmul.f32 1.442695, %v1148_v1  ;;  %v962_v10 = vadd.f32 %v2657_v56, %v652_v2  ;;  %v2726_v37 = vpop.f32.mrb[56].mxu0 }
 0x156   : > { %v2002_v48 = vpop.eup %2001  ;;  %v1292_v11 = vadd.f32 1.0, %v2000_v8  ;;  %v656_v12 = vpop.f32.mrb[30].mxu1 }
 0x157   : > { %1436 = vst [vmem:[%s2679_s22 + $0x38] sm:$0xff] %v2002_v48  ;;  %2011 = vpow2.f32 %v1210_v3  ;;  %v1149_v14 = vsub.f32 0.0, %v962_v10  ;;  %v657_v15 = vadd.f32 %v2646_v35, %v656_v12  ;;  %v658_v16 = vpop.f32.mrb[31].mxu1  ;;  %v1740_v33 = vpop.f32.mrb[57].mxu0 }
 0x158   : > { %2013 = vrcp.f32 %v1292_v11 }
 0x159   : > { %v2004_v20 = vpop.eup %2003  ;;  %v1212_v22 = vmul.f32 1.442695, %v1149_v14  ;;  %v967_v23 = vadd.f32 %v2660_v63, %v657_v15  ;;  %v2731_v49 = vpop.f32.mrb[58].mxu0 }
 0x15a   : > { %v2006_v56 = vpop.eup %2005  ;;  %v1293_v24 = vadd.f32 1.0, %v2004_v20  ;;  %v661_v26 = vpop.f32.mrb[32].mxu1 }
 0x15b   : > { %1437 = vst [vmem:[%s2679_s22 + $0x40] sm:$0xff] %v2006_v56  ;;  %2015 = vpow2.f32 %v1212_v22  ;;  %v1150_v28 = vsub.f32 0.0, %v967_v23  ;;  %v662_v17 = vadd.f32 %v2646_v35, %v661_v26  ;;  %v663_v30 = vpop.f32.mrb[33].mxu1  ;;  %v1743_v36 = vpop.f32.mrb[59].mxu0 }
 0x15c   : > { %2017 = vrcp.f32 %v1293_v24 }
 0x15d   : > { %v2008_v38 = vpop.eup %2007  ;;  %v1214_v39 = vmul.f32 1.442695, %v1150_v28  ;;  %v972_v40 = vadd.f32 %v2663_v9, %v662_v17  ;;  %v2736_v59 = vpop.f32.mrb[60].mxu0 }
 0x15e   : > { %v2010_v63 = vpop.eup %2009  ;;  %v1294_v42 = vadd.f32 1.0, %v2008_v38  ;;  %v666_v43 = vpop.f32.mrb[34].mxu1 }
 0x15f   : > { %1438 = vst [vmem:[%s2679_s22 + $0x48] sm:$0xff] %v2010_v63  ;;  %2019 = vpow2.f32 %v1214_v39  ;;  %v1151_v21 = vsub.f32 0.0, %v972_v40  ;;  %v667_v44 = vadd.f32 %v2646_v35, %v666_v43  ;;  %v668_v45 = vpop.f32.mrb[35].mxu1  ;;  %v1746_v41 = vpop.f32.mrb[61].mxu0 }
 0x160   : > { %2021 = vrcp.f32 %v1294_v42 }
 0x161   : > { %v2012_v25 = vpop.eup %2011  ;;  %v1216_v50 = vmul.f32 1.442695, %v1151_v21  ;;  %v977_v51 = vadd.f32 %v2667_v19, %v667_v44  ;;  %v2741_v8 = vpop.f32.mrb[62].mxu0 }
 0x162   : > { %v2014_v9 = vpop.eup %2013  ;;  %v1295_v52 = vadd.f32 1.0, %v2012_v25  ;;  %v671_v53 = vpop.f32.mrb[36].mxu1 }
 0x163   : > { %1439 = vst [vmem:[%s2679_s22 + $0x50] sm:$0xff] %v2014_v9  ;;  %2023 = vpow2.f32 %v1216_v50  ;;  %v1152_v54 = vsub.f32 0.0, %v977_v51  ;;  %v672_v55 = vadd.f32 %v2646_v35, %v671_v53  ;;  %v673_v57 = vpop.f32.mrb[37].mxu1  ;;  %v1749_v48 = vpop.f32.mrb[63].mxu0 }
 0x164   : > { %2025 = vrcp.f32 %v1295_v52 }
 0x165   : > { %v2016_v60 = vpop.eup %2015  ;;  %v1218_v61 = vmul.f32 1.442695, %v1152_v54  ;;  %v982_v27 = vadd.f32 %v2671_v34, %v672_v55  ;;  %v2746_v20 = vpop.f32.mrb[64].mxu0 }
 0x166   : > { %v2018_v19 = vpop.eup %2017  ;;  %v1296_v62 = vadd.f32 1.0, %v2016_v60  ;;  %v676_v0 = vpop.f32.mrb[38].mxu1 }
 0x167   : > { %1440 = vst [vmem:[%s2679_s22 + $0x58] sm:$0xff] %v2018_v19  ;;  %2027 = vpow2.f32 %v1218_v61  ;;  %v1153_v1 = vsub.f32 0.0, %v982_v27  ;;  %v677_v2 = vadd.f32 %v2646_v35, %v676_v0  ;;  %v678_v4 = vpop.f32.mrb[39].mxu1  ;;  %v1752_v56 = vpop.f32.mrb[65].mxu0 }
 0x168   : > { %2029 = vrcp.f32 %v1296_v62 }
 0x169   : > { %v2020_v3 = vpop.eup %2019  ;;  %v1220_v10 = vmul.f32 1.442695, %v1153_v1  ;;  %v987_v29 = vadd.f32 %v2681_v46, %v677_v2  ;;  %v2751_v38 = vpop.f32.mrb[66].mxu0 }
 0x16a   : > { %v2022_v34 = vpop.eup %2021  ;;  %v1297_v11 = vadd.f32 1.0, %v2020_v3  ;;  %v681_v12 = vpop.f32.mrb[40].mxu1 }
 0x16b   : > { %1441 = vst [vmem:[%s2679_s22 + $0x60] sm:$0xff] %v2022_v34  ;;  %2031 = vpow2.f32 %v1220_v10  ;;  %v1154_v14 = vsub.f32 0.0, %v987_v29  ;;  %v682_v15 = vadd.f32 %v2646_v35, %v681_v12  ;;  %v683_v16 = vpop.f32.mrb[41].mxu1  ;;  %v1755_v63 = vpop.f32.mrb[67].mxu0 }
 0x16c   : > { %2033 = vrcp.f32 %v1297_v11 }
 0x16d   : > { %v2024_v22 = vpop.eup %2023  ;;  %v1222_v23 = vmul.f32 1.442695, %v1154_v14  ;;  %v992_v31 = vadd.f32 %v2686_v6, %v682_v15  ;;  %v2756_v25 = vpop.f32.mrb[68].mxu0 }
 0x16e   : > { %v2026_v46 = vpop.eup %2025  ;;  %v1298_v24 = vadd.f32 1.0, %v2024_v22  ;;  %v686_v26 = vpop.f32.mrb[42].mxu1 }
 0x16f   : > { %1442 = vst [vmem:[%s2679_s22 + $0x68] sm:$0xff] %v2026_v46  ;;  %2035 = vpow2.f32 %v1222_v23  ;;  %v1155_v28 = vsub.f32 0.0, %v992_v31  ;;  %v687_v17 = vadd.f32 %v2646_v35, %v686_v26  ;;  %v688_v30 = vpop.f32.mrb[43].mxu1  ;;  %v1758_v9 = vpop.f32.mrb[69].mxu0 }
 0x170   : > { %2037 = vrcp.f32 %v1298_v24 }
 0x171   : > { %v2028_v39 = vpop.eup %2027  ;;  %v1224_v40 = vmul.f32 1.442695, %v1155_v28  ;;  %v997_v33 = vadd.f32 %v2691_v5, %v687_v17  ;;  %v2761_v60 = vpop.f32.mrb[70].mxu0 }
 0x172   : > { %v2030_v6 = vpop.eup %2029  ;;  %v1299_v42 = vadd.f32 1.0, %v2028_v39  ;;  %v691_v43 = vpop.f32.mrb[44].mxu1 }
 0x173   : > { %1443 = vst [vmem:[%s2679_s22 + $0x70] sm:$0xff] %v2030_v6  ;;  %2039 = vpow2.f32 %v1224_v40  ;;  %v1156_v21 = vsub.f32 0.0, %v997_v33  ;;  %v692_v44 = vadd.f32 %v2646_v35, %v691_v43  ;;  %v693_v45 = vpop.f32.mrb[45].mxu1  ;;  %v1761_v19 = vpop.f32.mrb[71].mxu0 }
 0x174   : > { %2041 = vrcp.f32 %v1299_v42 }
 0x175   : > { %v2032_v50 = vpop.eup %2031  ;;  %v1226_v51 = vmul.f32 1.442695, %v1156_v21  ;;  %v1002_v36 = vadd.f32 %v2696_v13, %v692_v44  ;;  %v2766_v3 = vpop.f32.mrb[72].mxu0 }
 0x176   : > { %v2034_v5 = vpop.eup %2033  ;;  %v1300_v52 = vadd.f32 1.0, %v2032_v50  ;;  %v696_v53 = vpop.f32.mrb[46].mxu1 }
 0x177   : > { %1444 = vst [vmem:[%s2679_s22 + $0x78] sm:$0xff] %v2034_v5  ;;  %2043 = vpow2.f32 %v1226_v51  ;;  %v1157_v54 = vsub.f32 0.0, %v1002_v36  ;;  %v697_v55 = vadd.f32 %v2646_v35, %v696_v53  ;;  %v698_v57 = vpop.f32.mrb[47].mxu1  ;;  %v1764_v34 = vpop.f32.mrb[73].mxu0 }
 0x178   : > { %2045 = vrcp.f32 %v1300_v52 }
 0x179   : > { %v2036_v61 = vpop.eup %2035  ;;  %v1228_v27 = vmul.f32 1.442695, %v1157_v54  ;;  %v1007_v41 = vadd.f32 %v2701_v32, %v697_v55  ;;  %v2771_v22 = vpop.f32.mrb[74].mxu0 }
 0x17a   : > { %v2038_v13 = vpop.eup %2037  ;;  %v1301_v62 = vadd.f32 1.0, %v2036_v61  ;;  %v701_v0 = vpop.f32.mrb[48].mxu1 }
 0x17b   : > { %1445 = vst [vmem:[%s2679_s22 + $0x80] sm:$0xff] %v2038_v13  ;;  %2047 = vpow2.f32 %v1228_v27  ;;  %v1158_v1 = vsub.f32 0.0, %v1007_v41  ;;  %v702_v2 = vadd.f32 %v2646_v35, %v701_v0  ;;  %v703_v4 = vpop.f32.mrb[49].mxu1  ;;  %v1767_v46 = vpop.f32.mrb[75].mxu0 }
 0x17c   : > { %2049 = vrcp.f32 %v1301_v62 }
 0x17d   : > { %v2040_v10 = vpop.eup %2039  ;;  %v1230_v29 = vmul.f32 1.442695, %v1158_v1  ;;  %v1012_v48 = vadd.f32 %v2706_v47, %v702_v2  ;;  %v2776_v39 = vpop.f32.mrb[76].mxu0 }
 0x17e   : > { %v2042_v32 = vpop.eup %2041  ;;  %v1302_v11 = vadd.f32 1.0, %v2040_v10  ;;  %v706_v12 = vpop.f32.mrb[50].mxu1 }
 0x17f   : > { %1446 = vst [vmem:[%s2679_s22 + $0x88] sm:$0xff] %v2042_v32  ;;  %2051 = vpow2.f32 %v1230_v29  ;;  %v1159_v14 = vsub.f32 0.0, %v1012_v48  ;;  %v707_v15 = vadd.f32 %v2646_v35, %v706_v12  ;;  %v708_v16 = vpop.f32.mrb[51].mxu1  ;;  %v1770_v6 = vpop.f32.mrb[77].mxu0 }
 0x180   : > { %2053 = vrcp.f32 %v1302_v11 }
 0x181   : > { %v2044_v23 = vpop.eup %2043  ;;  %v1232_v31 = vmul.f32 1.442695, %v1159_v14  ;;  %v1017_v56 = vadd.f32 %v2711_v58, %v707_v15  ;;  %v2781_v50 = vpop.f32.mrb[78].mxu0 }
 0x182   : > { %v2046_v47 = vpop.eup %2045  ;;  %v1303_v24 = vadd.f32 1.0, %v2044_v23  ;;  %v711_v26 = vpop.f32.mrb[52].mxu1 }
 0x183   : > { %1447 = vst [vmem:[%s2679_s22 + $0x90] sm:$0xff] %v2046_v47  ;;  %2055 = vpow2.f32 %v1232_v31  ;;  %v1160_v28 = vsub.f32 0.0, %v1017_v56  ;;  %v712_v17 = vadd.f32 %v2646_v35, %v711_v26  ;;  %v713_v30 = vpop.f32.mrb[53].mxu1  ;;  %v1773_v5 = vpop.f32.mrb[79].mxu0 }
 0x184   : > { %2057 = vrcp.f32 %v1303_v24 }
 0x185   : > { %v2048_v40 = vpop.eup %2047  ;;  %v1234_v33 = vmul.f32 1.442695, %v1160_v28  ;;  %v1022_v63 = vadd.f32 %v2716_v7, %v712_v17  ;;  %v2786_v61 = vpop.f32.mrb[80].mxu0 }
 0x186   : > { %v2050_v58 = vpop.eup %2049  ;;  %v1304_v42 = vadd.f32 1.0, %v2048_v40  ;;  %v716_v43 = vpop.f32.mrb[54].mxu1 }
 0x187   : > { %1448 = vst [vmem:[%s2679_s22 + $0x98] sm:$0xff] %v2050_v58  ;;  %2059 = vpow2.f32 %v1234_v33  ;;  %v1161_v21 = vsub.f32 0.0, %v1022_v63  ;;  %v717_v44 = vadd.f32 %v2646_v35, %v716_v43  ;;  %v718_v45 = vpop.f32.mrb[55].mxu1  ;;  %v1776_v13 = vpop.f32.mrb[81].mxu0 }
 0x188   : > { %2061 = vrcp.f32 %v1304_v42 }
 0x189   : > { %v2052_v51 = vpop.eup %2051  ;;  %v1236_v36 = vmul.f32 1.442695, %v1161_v21  ;;  %v1027_v9 = vadd.f32 %v2721_v18, %v717_v44  ;;  %v2791_v10 = vpop.f32.mrb[82].mxu0 }
 0x18a   : > { %v2054_v7 = vpop.eup %2053  ;;  %v1305_v52 = vadd.f32 1.0, %v2052_v51  ;;  %v721_v53 = vpop.f32.mrb[56].mxu1 }
 0x18b   : > { %1449 = vst [vmem:[%s2679_s22 + $0xa0] sm:$0xff] %v2054_v7  ;;  %2063 = vpow2.f32 %v1236_v36  ;;  %v1162_v54 = vsub.f32 0.0, %v1027_v9  ;;  %v722_v55 = vadd.f32 %v2646_v35, %v721_v53  ;;  %v723_v57 = vpop.f32.mrb[57].mxu1  ;;  %v1779_v32 = vpop.f32.mrb[83].mxu0 }
 0x18c   : > { %2065 = vrcp.f32 %v1305_v52 }
 0x18d   : > { %v2056_v27 = vpop.eup %2055  ;;  %v1238_v41 = vmul.f32 1.442695, %v1162_v54  ;;  %v1032_v19 = vadd.f32 %v2726_v37, %v722_v55  ;;  %v2796_v23 = vpop.f32.mrb[84].mxu0 }
 0x18e   : > { %v2058_v18 = vpop.eup %2057  ;;  %v1306_v62 = vadd.f32 1.0, %v2056_v27  ;;  %v726_v0 = vpop.f32.mrb[58].mxu1 }
 0x18f   : > { %1450 = vst [vmem:[%s2679_s22 + $0xa8] sm:$0xff] %v2058_v18  ;;  %2067 = vpow2.f32 %v1238_v41  ;;  %v1163_v1 = vsub.f32 0.0, %v1032_v19  ;;  %v727_v2 = vadd.f32 %v2646_v35, %v726_v0  ;;  %v728_v4 = vpop.f32.mrb[59].mxu1  ;;  %v1782_v47 = vpop.f32.mrb[85].mxu0 }
 0x190   : > { %2069 = vrcp.f32 %v1306_v62 }
 0x191   : > { %v2060_v29 = vpop.eup %2059  ;;  %v1240_v48 = vmul.f32 1.442695, %v1163_v1  ;;  %v1037_v34 = vadd.f32 %v2731_v49, %v727_v2  ;;  %v2801_v40 = vpop.f32.mrb[86].mxu0 }
 0x192   : > { %v2062_v37 = vpop.eup %2061  ;;  %v1307_v11 = vadd.f32 1.0, %v2060_v29  ;;  %v731_v12 = vpop.f32.mrb[60].mxu1 }
 0x193   : > { %1451 = vst [vmem:[%s2679_s22 + $0xb0] sm:$0xff] %v2062_v37  ;;  %2071 = vpow2.f32 %v1240_v48  ;;  %v1164_v14 = vsub.f32 0.0, %v1037_v34  ;;  %v732_v15 = vadd.f32 %v2646_v35, %v731_v12  ;;  %v733_v16 = vpop.f32.mrb[61].mxu1  ;;  %v1785_v58 = vpop.f32.mrb[87].mxu0 }
 0x194   : > { %2073 = vrcp.f32 %v1307_v11 }
 0x195   : > { %v2064_v31 = vpop.eup %2063  ;;  %v1242_v56 = vmul.f32 1.442695, %v1164_v14  ;;  %v1042_v46 = vadd.f32 %v2736_v59, %v732_v15  ;;  %v2806_v51 = vpop.f32.mrb[88].mxu0 }
 0x196   : > { %v2066_v49 = vpop.eup %2065  ;;  %v1308_v24 = vadd.f32 1.0, %v2064_v31  ;;  %v736_v26 = vpop.f32.mrb[62].mxu1 }
 0x197   : > { %1452 = vst [vmem:[%s2679_s22 + $0xb8] sm:$0xff] %v2066_v49  ;;  %2075 = vpow2.f32 %v1242_v56  ;;  %v1165_v28 = vsub.f32 0.0, %v1042_v46  ;;  %v737_v17 = vadd.f32 %v2646_v35, %v736_v26  ;;  %v738_v30 = vpop.f32.mrb[63].mxu1  ;;  %v1788_v7 = vpop.f32.mrb[89].mxu0 }
 0x198   : > { %2077 = vrcp.f32 %v1308_v24 }
 0x199   : > { %v2068_v33 = vpop.eup %2067  ;;  %v1244_v63 = vmul.f32 1.442695, %v1165_v28  ;;  %v1047_v6 = vadd.f32 %v2741_v8, %v737_v17  ;;  %v2811_v27 = vpop.f32.mrb[90].mxu0 }
 0x19a   : > { %v2070_v59 = vpop.eup %2069  ;;  %v1309_v42 = vadd.f32 1.0, %v2068_v33  ;;  %v741_v43 = vpop.f32.mrb[64].mxu1 }
 0x19b   : > { %1453 = vst [vmem:[%s2679_s22 + $0xc0] sm:$0xff] %v2070_v59  ;;  %2079 = vpow2.f32 %v1244_v63  ;;  %v1166_v21 = vsub.f32 0.0, %v1047_v6  ;;  %v742_v44 = vadd.f32 %v2646_v35, %v741_v43  ;;  %v743_v45 = vpop.f32.mrb[65].mxu1  ;;  %v1791_v18 = vpop.f32.mrb[91].mxu0 }
 0x19c   : > { %2081 = vrcp.f32 %v1309_v42 }
 0x19d   : > { %v2072_v36 = vpop.eup %2071  ;;  %v1246_v9 = vmul.f32 1.442695, %v1166_v21  ;;  %v1052_v5 = vadd.f32 %v2746_v20, %v742_v44  ;;  %v2816_v29 = vpop.f32.mrb[92].mxu0 }
 0x19e   : > { %v2074_v8 = vpop.eup %2073  ;;  %v1310_v52 = vadd.f32 1.0, %v2072_v36  ;;  %v746_v53 = vpop.f32.mrb[66].mxu1 }
 0x19f   : > { %1454 = vst [vmem:[%s2679_s22 + $0xc8] sm:$0xff] %v2074_v8  ;;  %2083 = vpow2.f32 %v1246_v9  ;;  %v1167_v54 = vsub.f32 0.0, %v1052_v5  ;;  %v747_v55 = vadd.f32 %v2646_v35, %v746_v53  ;;  %v748_v57 = vpop.f32.mrb[67].mxu1  ;;  %v1794_v37 = vpop.f32.mrb[93].mxu0 }
 0x1a0   : > { %2085 = vrcp.f32 %v1310_v52 }
 0x1a1   : > { %v2076_v41 = vpop.eup %2075  ;;  %v1248_v19 = vmul.f32 1.442695, %v1167_v54  ;;  %v1057_v13 = vadd.f32 %v2751_v38, %v747_v55  ;;  %v2821_v31 = vpop.f32.mrb[94].mxu0 }
 0x1a2   : > { %v2078_v20 = vpop.eup %2077  ;;  %v1311_v62 = vadd.f32 1.0, %v2076_v41  ;;  %v751_v0 = vpop.f32.mrb[68].mxu1 }
 0x1a3   : > { %1455 = vst [vmem:[%s2679_s22 + $0xd0] sm:$0xff] %v2078_v20  ;;  %2087 = vpow2.f32 %v1248_v19  ;;  %v1168_v1 = vsub.f32 0.0, %v1057_v13  ;;  %v752_v2 = vadd.f32 %v2646_v35, %v751_v0  ;;  %v753_v4 = vpop.f32.mrb[69].mxu1  ;;  %v1797_v49 = vpop.f32.mrb[95].mxu0  ;;  %v2839_v20 = vld [vmem:[%s2883_s2] ss:$0 sm:$0xff] }
 0x1a4   : > { %2089 = vrcp.f32 %v1311_v62 }
 0x1a5   : > { %v2080_v48 = vpop.eup %2079  ;;  %v1250_v34 = vmul.f32 1.442695, %v1168_v1  ;;  %v1062_v32 = vadd.f32 %v2756_v25, %v752_v2  ;;  %v2826_v33 = vpop.f32.mrb[96].mxu0 }
 0x1a6   : > { %v2082_v38 = vpop.eup %2081  ;;  %v1312_v11 = vadd.f32 1.0, %v2080_v48  ;;  %v756_v12 = vpop.f32.mrb[70].mxu1 }
 0x1a7   : > { %1456 = vst [vmem:[%s2679_s22 + $0xd8] sm:$0xff] %v2082_v38  ;;  %2091 = vpow2.f32 %v1250_v34  ;;  %v1169_v14 = vsub.f32 0.0, %v1062_v32  ;;  %v757_v15 = vadd.f32 %v2646_v35, %v756_v12  ;;  %v758_v16 = vpop.f32.mrb[71].mxu1  ;;  %v1800_v59 = vpop.f32.mrb[97].mxu0 }
 0x1a8   : > { %2093 = vrcp.f32 %v1312_v11 }
 0x1a9   : > { %v2084_v56 = vpop.eup %2083  ;;  %v1252_v46 = vmul.f32 1.442695, %v1169_v14  ;;  %v1067_v47 = vadd.f32 %v2761_v60, %v757_v15 }
 0x1aa   : > { %v2086_v25 = vpop.eup %2085  ;;  %v1313_v24 = vadd.f32 1.0, %v2084_v56  ;;  %v761_v26 = vpop.f32.mrb[72].mxu1 }
 0x1ab   : > { %1457 = vst [vmem:[%s2679_s22 + $0xe0] sm:$0xff] %v2086_v25  ;;  %2095 = vpow2.f32 %v1252_v46  ;;  %v1170_v28 = vsub.f32 0.0, %v1067_v47  ;;  %v762_v17 = vadd.f32 %v2646_v35, %v761_v26  ;;  %v763_v30 = vpop.f32.mrb[73].mxu1 }
 0x1ac   : > { %2097 = vrcp.f32 %v1313_v24 }
 0x1ad   : > { %v2088_v63 = vpop.eup %2087  ;;  %v1254_v6 = vmul.f32 1.442695, %v1170_v28  ;;  %v1072_v58 = vadd.f32 %v2766_v3, %v762_v17 }
 0x1ae   : > { %v2090_v60 = vpop.eup %2089  ;;  %v1314_v42 = vadd.f32 1.0, %v2088_v63  ;;  %v766_v43 = vpop.f32.mrb[74].mxu1 }
 0x1af   : > { %1458 = vst [vmem:[%s2679_s22 + $0xe8] sm:$0xff] %v2090_v60  ;;  %2099 = vpow2.f32 %v1254_v6  ;;  %v1171_v21 = vsub.f32 0.0, %v1072_v58  ;;  %v767_v44 = vadd.f32 %v2646_v35, %v766_v43  ;;  %v768_v45 = vpop.f32.mrb[75].mxu1 }
 0x1b0   : > { %2101 = vrcp.f32 %v1314_v42 }
 0x1b1   : > { %v2092_v36 = vpop.eup %2091  ;;  %v1256_v9 = vmul.f32 1.442695, %v1171_v21  ;;  %v1077_v5 = vadd.f32 %v2771_v22, %v767_v44 }
 0x1b2   : > { %v2094_v7 = vpop.eup %2093  ;;  %v1315_v8 = vadd.f32 1.0, %v2092_v36  ;;  %v771_v3 = vpop.f32.mrb[76].mxu1 }
 0x1b3   : > { %1459 = vst [vmem:[%s2679_s22 + $0xf0] sm:$0xff] %v2094_v7  ;;  %2103 = vpow2.f32 %v1256_v9  ;;  %v1172_v52 = vsub.f32 0.0, %v1077_v5  ;;  %v772_v53 = vadd.f32 %v2646_v35, %v771_v3  ;;  %v773_v54 = vpop.f32.mrb[77].mxu1 }
 0x1b4   : > { %2105 = vrcp.f32 %v1315_v8 }
 0x1b5   : > { %v2096_v55 = vpop.eup %2095  ;;  %v1258_v57 = vmul.f32 1.442695, %v1172_v52  ;;  %v1082_v41 = vadd.f32 %v2776_v39, %v772_v53 }
 0x1b6   : > { %v2098_v19 = vpop.eup %2097  ;;  %v1316_v13 = vadd.f32 1.0, %v2096_v55  ;;  %v776_v18 = vpop.f32.mrb[78].mxu1 }
 0x1b7   : > { %1460 = vst [vmem:[%s2679_s22 + $0xf8] sm:$0xff] %v2098_v19  ;;  %2107 = vpow2.f32 %v1258_v57  ;;  %v1173_v22 = vsub.f32 0.0, %v1082_v41  ;;  %v777_v35 = vadd.f32 %v2839_v20, %v776_v18  ;;  %v778_v62 = vpop.f32.mrb[79].mxu1 }
 0x1b8   : > { %2109 = vrcp.f32 %v1316_v13 }
 0x1b9   : > { %v2100_v0 = vpop.eup %2099  ;;  %v1260_v1 = vmul.f32 1.442695, %v1173_v22  ;;  %v1087_v39 = vadd.f32 %v2781_v50, %v777_v35 }
 0x1ba   : > { %v2102_v2 = vpop.eup %2101  ;;  %v1317_v4 = vadd.f32 1.0, %v2100_v0  ;;  %v781_v48 = vpop.f32.mrb[80].mxu1 }
 0x1bb   : > { %1461 = vst [vmem:[%s2679_s22 + $0x100] sm:$0xff] %v2102_v2  ;;  %2111 = vpow2.f32 %v1260_v1  ;;  %v1174_v34 = vsub.f32 0.0, %v1087_v39  ;;  %v782_v32 = vadd.f32 %v2839_v20, %v781_v48  ;;  %v783_v37 = vpop.f32.mrb[81].mxu1 }
 0x1bc   : > { %2113 = vrcp.f32 %v1317_v4 }
 0x1bd   : > { %v2104_v38 = vpop.eup %2103  ;;  %v1262_v11 = vmul.f32 1.442695, %v1174_v34  ;;  %v1092_v12 = vadd.f32 %v2786_v61, %v782_v32 }
 0x1be   : > { %v2106_v14 = vpop.eup %2105  ;;  %v1318_v15 = vadd.f32 1.0, %v2104_v38  ;;  %v786_v16 = vpop.f32.mrb[82].mxu1 }
 0x1bf   : > { %1462 = vst [vmem:[%s2679_s22 + $0x108] sm:$0xff] %v2106_v14  ;;  %2115 = vpow2.f32 %v1262_v11  ;;  %v1175_v50 = vsub.f32 0.0, %v1092_v12  ;;  %v787_v56 = vadd.f32 %v2839_v20, %v786_v16  ;;  %v788_v46 = vpop.f32.mrb[83].mxu1 }
 0x1c0   : > { %2117 = vrcp.f32 %v1318_v15 }
 0x1c1   : > { %v2108_v47 = vpop.eup %2107  ;;  %v1264_v49 = vmul.f32 1.442695, %v1175_v50  ;;  %v1097_v25 = vadd.f32 %v2791_v10, %v787_v56 }
 0x1c2   : > { %v2110_v24 = vpop.eup %2109  ;;  %v1319_v26 = vadd.f32 1.0, %v2108_v47  ;;  %v791_v28 = vpop.f32.mrb[84].mxu1 }
 0x1c3   : > { %1463 = vst [vmem:[%s2679_s22 + $0x110] sm:$0xff] %v2110_v24  ;;  %2119 = vpow2.f32 %v1264_v49  ;;  %v1176_v61 = vsub.f32 0.0, %v1097_v25  ;;  %v792_v17 = vadd.f32 %v2839_v20, %v791_v28  ;;  %v793_v30 = vpop.f32.mrb[85].mxu1 }
 0x1c4   : > { %2121 = vrcp.f32 %v1319_v26 }
 0x1c5   : > { %v2112_v63 = vpop.eup %2111  ;;  %v1266_v6 = vmul.f32 1.442695, %v1176_v61  ;;  %v1102_v58 = vadd.f32 %v2796_v23, %v792_v17 }
 0x1c6   : > { %v2114_v59 = vpop.eup %2113  ;;  %v1320_v60 = vadd.f32 1.0, %v2112_v63  ;;  %v796_v42 = vpop.f32.mrb[86].mxu1 }
 0x1c7   : > { %1464 = vst [vmem:[%s2679_s22 + $0x118] sm:$0xff] %v2114_v59  ;;  %2123 = vpow2.f32 %v1266_v6  ;;  %v1177_v10 = vsub.f32 0.0, %v1102_v58  ;;  %v797_v43 = vadd.f32 %v2839_v20, %v796_v42  ;;  %v798_v21 = vpop.f32.mrb[87].mxu1 }
 0x1c8   : > { %2125 = vrcp.f32 %v1320_v60 }
 0x1c9   : > { %v2116_v44 = vpop.eup %2115  ;;  %v1268_v45 = vmul.f32 1.442695, %v1177_v10  ;;  %v1107_v36 = vadd.f32 %v2801_v40, %v797_v43 }
 0x1ca   : > { %v2118_v9 = vpop.eup %2117  ;;  %v1321_v5 = vadd.f32 1.0, %v2116_v44  ;;  %v801_v7 = vpop.f32.mrb[88].mxu1 }
 0x1cb   : > { %1465 = vst [vmem:[%s2679_s22 + $0x120] sm:$0xff] %v2118_v9  ;;  %2127 = vpow2.f32 %v1268_v45  ;;  %v1178_v23 = vsub.f32 0.0, %v1107_v36  ;;  %v802_v8 = vadd.f32 %v2839_v20, %v801_v7  ;;  %v803_v3 = vpop.f32.mrb[89].mxu1 }
 0x1cc   : > { %2129 = vrcp.f32 %v1321_v5 }
 0x1cd   : > { %v2120_v52 = vpop.eup %2119  ;;  %v1270_v53 = vmul.f32 1.442695, %v1178_v23  ;;  %v1112_v54 = vadd.f32 %v2806_v51, %v802_v8 }
 0x1ce   : > { %v2122_v55 = vpop.eup %2121  ;;  %v1322_v57 = vadd.f32 1.0, %v2120_v52  ;;  %v806_v41 = vpop.f32.mrb[90].mxu1 }
 0x1cf   : > { %1466 = vst [vmem:[%s2679_s22 + $0x128] sm:$0xff] %v2122_v55  ;;  %2131 = vpow2.f32 %v1270_v53  ;;  %v1179_v40 = vsub.f32 0.0, %v1112_v54  ;;  %v807_v19 = vadd.f32 %v2839_v20, %v806_v41  ;;  %v808_v13 = vpop.f32.mrb[91].mxu1 }
 0x1d0   : > { %2133 = vrcp.f32 %v1322_v57 }
 0x1d1   : > { %v2124_v18 = vpop.eup %2123  ;;  %v1272_v22 = vmul.f32 1.442695, %v1179_v40  ;;  %v1117_v35 = vadd.f32 %v2811_v27, %v807_v19 }
 0x1d2   : > { %v2126_v62 = vpop.eup %2125  ;;  %v1323_v0 = vadd.f32 1.0, %v2124_v18  ;;  %v811_v1 = vpop.f32.mrb[92].mxu1 }
 0x1d3   : > { %1467 = vst [vmem:[%s2679_s22 + $0x130] sm:$0xff] %v2126_v62  ;;  %2135 = vpow2.f32 %v1272_v22  ;;  %v1180_v51 = vsub.f32 0.0, %v1117_v35  ;;  %v812_v39 = vadd.f32 %v2839_v20, %v811_v1  ;;  %v813_v2 = vpop.f32.mrb[93].mxu1 }
 0x1d4   : > { %2137 = vrcp.f32 %v1323_v0 }
 0x1d5   : > { %v2128_v4 = vpop.eup %2127  ;;  %v1274_v48 = vmul.f32 1.442695, %v1180_v51  ;;  %v1122_v34 = vadd.f32 %v2816_v29, %v812_v39 }
 0x1d6   : > { %v2130_v32 = vpop.eup %2129  ;;  %v1324_v37 = vadd.f32 1.0, %v2128_v4  ;;  %v816_v38 = vpop.f32.mrb[94].mxu1 }
 0x1d7   : > { %1468 = vst [vmem:[%s2679_s22 + $0x138] sm:$0xff] %v2130_v32  ;;  %2139 = vpow2.f32 %v1274_v48  ;;  %v1181_v27 = vsub.f32 0.0, %v1122_v34  ;;  %v817_v11 = vadd.f32 %v2839_v20, %v816_v38  ;;  %v818_v12 = vpop.f32.mrb[95].mxu1 }
 0x1d8   : > { %2141 = vrcp.f32 %v1324_v37 }
 0x1d9   : > { %v2132_v14 = vpop.eup %2131  ;;  %v1276_v15 = vmul.f32 1.442695, %v1181_v27  ;;  %v1127_v16 = vadd.f32 %v2821_v31, %v817_v11 }
 0x1da   : > { %v2134_v50 = vpop.eup %2133  ;;  %v1325_v56 = vadd.f32 1.0, %v2132_v14  ;;  %v821_v46 = vpop.f32.mrb[96].mxu1 }
 0x1db   : > { %1469 = vst [vmem:[%s2679_s22 + $0x140] sm:$0xff] %v2134_v50  ;;  %2143 = vpow2.f32 %v1276_v15  ;;  %v1182_v29 = vsub.f32 0.0, %v1127_v16  ;;  %v822_v47 = vadd.f32 %v2839_v20, %v821_v46  ;;  %v823_v49 = vpop.f32.mrb[97].mxu1 }
 0x1dc   : > { %2145 = vrcp.f32 %v1325_v56 }
 0x1dd   : > { %v2136_v25 = vpop.eup %2135  ;;  %v1278_v24 = vmul.f32 1.442695, %v1182_v29  ;;  %v1132_v26 = vadd.f32 %v2826_v33, %v822_v47 }
 0x1de   : > { %v2138_v28 = vpop.eup %2137  ;;  %v1326_v61 = vadd.f32 1.0, %v2136_v25 }
 0x1df   : > { %1470 = vst [vmem:[%s2679_s22 + $0x148] sm:$0xff] %v2138_v28  ;;  %2147 = vpow2.f32 %v1278_v24  ;;  %v1183_v31 = vsub.f32 0.0, %v1132_v26 }
 0x1e0   : > { %2149 = vrcp.f32 %v1326_v61 }
 0x1e1   : > { %v2140_v17 = vpop.eup %2139  ;;  %v1280_v30 = vmul.f32 1.442695, %v1183_v31 }
 0x1e2   : > { %v2142_v63 = vpop.eup %2141  ;;  %v1327_v6 = vadd.f32 1.0, %v2140_v17 }
 0x1e3   : > { %1471 = vst [vmem:[%s2679_s22 + $0x150] sm:$0xff] %v2142_v63  ;;  %2151 = vpow2.f32 %v1280_v30 }
 0x1e4   : > { %2153 = vrcp.f32 %v1327_v6 }
 0x1e5   : > { %v2144_v20 = vpop.eup %2143 }
 0x1e6   : > { %v2146_v58 = vpop.eup %2145  ;;  %v1328_v33 = vadd.f32 1.0, %v2144_v20 }
 0x1e7   : > { %1472 = vst [vmem:[%s2679_s22 + $0x158] sm:$0xff] %v2146_v58 }
 0x1e8   : > { %2155 = vrcp.f32 %v1328_v33 }
 0x1e9   : > { %v2148_v59 = vpop.eup %2147 }
 0x1ea   : > { %v2150_v60 = vpop.eup %2149  ;;  %v1329_v42 = vadd.f32 1.0, %v2148_v59 }
 0x1eb   : > { %1473 = vst [vmem:[%s2679_s22 + $0x160] sm:$0xff] %v2150_v60 }
 0x1ec   : > { %2157 = vrcp.f32 %v1329_v42 }
 0x1ed   : > { %v2152_v10 = vpop.eup %2151 }
 0x1ee   : > { %v2154_v43 = vpop.eup %2153  ;;  %v1330_v21 = vadd.f32 1.0, %v2152_v10 }
 0x1ef   : > { %1474 = vst [vmem:[%s2679_s22 + $0x168] sm:$0xff] %v2154_v43 }
 0x1f0   : > { %2159 = vrcp.f32 %v1330_v21 }
 0x1f2   : > { %v2156_v44 = vpop.eup %2155 }
 0x1f3   : > { %1475 = vst [vmem:[%s2679_s22 + $0x170] sm:$0xff] %v2156_v44 }
 0x1f6   : > { %v2158_v45 = vpop.eup %2157 }
 0x1f7   : > { %1476 = vst [vmem:[%s2679_s22 + $0x178] sm:$0xff] %v2158_v45 }
 0x1fa   : > { %v2160_v36 = vpop.eup %2159 }
 0x1fb   : > { %1477 = vst [vmem:[%s2679_s22 + $0x180] sm:$0xff] %v2160_v36 }
 0x1fc PF: > { %s13_s12 = sadd.s32 1, %s2168_s12  }
 0x1fd   : > { %p10_p4 = scmp.ge.s32.totalorder %s13_s12, 6  }
 0x1ff   :  { %12 = sbr.rel (!%p10_p4) target bundleno = 1 (0x1), region = 62 }

// kernel: nn_prototype_forward.17
= control target key start
LH: loop header
LB: loop body
LE: loop exit
PB: predicated region body
PF: predicated region fallthrough
CT: control target
= control target key end

     0   :  { %v384_v0 = vmov 0.0|0.0   ;;  %vm385_vm0 = vmmov 0   ;;  %v386_v4 = vmov 0.0   ;;  %vm27_vm1 = vcmask 326656   ;;  %s573_s1 = inlined_call_operand.vmem [shape: f32[40,128], index: 1, kind: input, shape index: {}]   ;;  %s574_s0 = inlined_call_operand.vmem [shape: f32[8,40], index: 0, kind: input, shape index: {}]   ;;  %s575_s2 = inlined_call_operand.vmem [shape: f32[128,128], index: 2, kind: input, shape index: {}]   ;;  %s576_s4 = inlined_call_operand.vmem [shape: f32[8,128], index: 4, kind: output, shape index: {0}]   ;;  %s577_s5 = inlined_call_operand.vmem [shape: f32[128,8], index: 5, kind: output, shape index: {1}]   ;;  %s578_s3 = inlined_call_operand.vmem [shape: f32[1,128], index: 3, kind: input, shape index: {}]   ;;  %s579_s6 = inlined_call_operand.vmem [shape: f32[8,128], index: 6, kind: output, shape index: {2}]  }
   0x1   :  { %351 = vmatprep.subr.bf16.mxu0 %v384_v0  ;;  %v21_v1 = vld [vmem:[%s573_s1] sm:$0xff]  ;;  %v22_v2 = vld [vmem:[%s573_s1 + $0x8] sm:$0xff]  ;;  %v23_v3 = vld [vmem:[%s573_s1 + $0x10] sm:$0xff]  ;;  %313 = vmatprep.mubr.msk.f32.mxu0 %vm385_vm0, %v386_v4  ;;  %vm155_vm2 = vcmask 64512  }
   0x2   :  { %v31_v5 = vmul.f32 %v21_v1, %v21_v1  ;;  %v32_v6 = vmul.f32 %v22_v2, %v22_v2  ;;  %v352_v7 = vpack.c.bf16 %v22_v2, %v21_v1  ;;  %v24_v8 = vld [vmem:[%s573_s1 + $0x18] sm:$0xff]  ;;  %v33_v9 = vmul.f32 %v23_v3, %v23_v3  ;;  %v20_v10 = vld [vmem:[%s574_s0] sm:$0xff]  ;;  %357 = vmatprep.subr.bf16.mxu1 %v384_v0  ;;  %v173_v13 = vld [vmem:[%s575_s2 + $0x8] sm:$0xff] }
   0x3   :  { %v26_v11 = vmul.f32 %v20_v10, %v20_v10  ;;  %v172_v12 = vld [vmem:[%s575_s2] sm:$0xff]  ;;  %v174_v14 = vld [vmem:[%s575_s2 + $0x10] sm:$0xff]  ;;  %348 = vmatprep.mubr.msk.f32.mxu1 %vm385_vm0, %v386_v4  ;;  %v34_v16 = vmul.f32 %v24_v8, %v24_v8  ;;  %v355_v17 = vpack.c.bf16 %v24_v8, %v23_v3  ;;  %v175_v19 = vld [vmem:[%s575_s2 + $0x18] sm:$0xff] }
   0x4   :  { %v36_v15 = vadd.f32 %v32_v6, %v31_v5  ;;  %353 = vmatpush3.bf16.msra.mxu0 %v352_v7  ;;  %v358_v18 = vpack.c.bf16 %v173_v13, %v172_v12  ;;  %v25_v20 = vld [vmem:[%s573_s1 + $0x20] sm:$0xff]  ;;  %v361_v24 = vpack.c.bf16 %v175_v19, %v174_v14  ;;  %v177_v26 = vld [vmem:[%s575_s2 + $0x28] sm:$0xff]  ;;  %v178_v30 = vld [vmem:[%s575_s2 + $0x30] sm:$0xff] }
   0x5   :  { %354 = vmatprep.subr.bf16.mxu0 %v384_v0  ;;  %v28_v21 = vsel %vm27_vm1, %v26_v11, 0.0  ;;  %v35_v23 = vmul.f32 %v25_v20, %v25_v20  ;;  %v176_v25 = vld [vmem:[%s575_s2 + $0x20] sm:$0xff]  ;;  %v179_v31 = vld [vmem:[%s575_s2 + $0x38] sm:$0xff]  ;;  %v181_v34 = vld [vmem:[%s575_s2 + $0x48] sm:$0xff] }
   0x6   :  { %v37_v22 = vadd.f32 %v36_v15, %v33_v9  ;;  %29 = vadd.xlane.f32.xlu0 %v28_v21  ;;  %359 = vmatpush3.bf16.msra.mxu1 %v358_v18  ;;  %v364_v29 = vpack.c.bf16 %v177_v26, %v176_v25  ;;  %v367_v32 = vpack.c.bf16 %v179_v31, %v178_v30  ;;  %v180_v33 = vld [vmem:[%s575_s2 + $0x40] sm:$0xff]  ;;  %v182_v36 = vld [vmem:[%s575_s2 + $0x50] sm:$0xff]  ;;  %v183_v37 = vld [vmem:[%s575_s2 + $0x58] sm:$0xff] }
   0x7   :  { %360 = vmatprep.subr.bf16.mxu1 %v384_v0  ;;  %v370_v35 = vpack.c.bf16 %v181_v34, %v180_v33  ;;  %v373_v38 = vpack.c.bf16 %v183_v37, %v182_v36  ;;  %v184_v39 = vld [vmem:[%s575_s2 + $0x60] sm:$0xff]  ;;  %v185_v40 = vld [vmem:[%s575_s2 + $0x68] sm:$0xff]  ;;  %v186_v42 = vld [vmem:[%s575_s2 + $0x70] sm:$0xff] }
   0x8   :  { %356 = vmatpush3.bf16.msra.mxu0 %v355_v17  ;;  %v38_v27 = vadd.f32 %v37_v22, %v34_v16  ;;  %v376_v41 = vpack.c.bf16 %v185_v40, %v184_v39  ;;  %v187_v43 = vld [vmem:[%s575_s2 + $0x78] sm:$0xff]  ;;  %v279_v9 = vld [vmem:[%s578_s3] ss:$0 sm:$0xff] }
   0x9   :  { %311 = vmatprep.subr.mxu0 %v386_v4  ;;  %v379_v44 = vpack.c.bf16 %v187_v43, %v186_v42 }
   0xa   :  { %v39_v28 = vadd.f32 %v38_v27, %v35_v23  ;;  %362 = vmatpush3.bf16.msra.mxu1 %v361_v24 }
   0xb   :  { %363 = vmatprep.subr.bf16.mxu1 %v384_v0 }
   0xc   :  { %312 = vmatpush3.msra.mxu0 %v25_v20  ;;  %v40_v45 = vrot.slane %v39_v28, 4 }
   0xd   :  { %314 = vmatmul.mubr.msk.f32.vlgmr.msra.gmra.mrb[0].mxu0 %vm27_vm1, %v20_v10 }
   0xe   :  { %365 = vmatpush3.bf16.msra.mxu1 %v364_v29  ;;  %v41_v46 = vadd.f32 %v40_v45, %v39_v28 }
   0xf   :  { %366 = vmatprep.subr.bf16.mxu1 %v384_v0 }
  0x10   :  { %v42_v47 = vrot.slane %v41_v46, 2 }
  0x12   :  { %368 = vmatpush3.bf16.msra.mxu1 %v367_v32  ;;  %v43_v48 = vadd.f32 %v42_v47, %v41_v46 }
  0x13   :  { %369 = vmatprep.subr.bf16.mxu1 %v384_v0 }
  0x14   :  { %v44_v49 = vrot.slane %v43_v48, 1 }
  0x16   :  { %371 = vmatpush3.bf16.msra.mxu1 %v370_v35  ;;  %v45_v50 = vadd.f32 %v44_v49, %v43_v48 }
  0x17   :  { %372 = vmatprep.subr.bf16.mxu1 %v384_v0 }
  0x1a   :  { %374 = vmatpush3.bf16.msra.mxu1 %v373_v38 }
  0x1b   :  { %375 = vmatprep.subr.bf16.mxu1 %v384_v0 }
  0x1e   :  { %377 = vmatpush3.bf16.msra.mxu1 %v376_v41 }
  0x1f   :  { %378 = vmatprep.subr.bf16.mxu1 %v384_v0 }
  0x22   :  { %380 = vmatpush3.bf16.msra.mxu1 %v379_v44 }
  0x93   :  { %v30_v51 = vpop.xlane.xlu0 %29 }
  0x94   :  { %v46_v52 = vadd.f32 %v45_v50, %v30_v51 }
  0xe0   :  { %v116_v53 = vpop.f32.mrb[0].mxu0 }
  0xe1   :  { %v120_v54 = vmul.f32 2.0, %v116_v53  ;;  %v315_v55 = vpop.f32.mrb[1].mxu0 }
  0xe3   :  { %v121_v56 = vsub.f32 %v46_v52, %v120_v54 }
  0xe5   :  { %122 = vst [vmem:[%s576_s4] sm:$0xff] %v121_v56  ;;  %123 = vxpose.xlu0.b32.start.end [1/1] (short) %v121_v56, 128  ;;  %349 = vmatmul.mubr.f32.vlgmr.msra.gmra.mrb[0].mxu1 %v121_v56 }
 0x165   :  { %v139_v57 = vpop.trf.xlu0 }
 0x166   :  { %156 = vst.msk [vmem:[%s577_s5] sm:$0xff] %vm155_vm2, %v139_v57 }
 0x169   :  { %v140_v58 = vpop.trf.xlu0 }
 0x16a   :  { %157 = vst.msk [vmem:[%s577_s5 + $0x8] sm:$0xff] %vm155_vm2, %v140_v58 }
 0x16d   :  { %v141_v59 = vpop.trf.xlu0 }
 0x16e   :  { %158 = vst.msk [vmem:[%s577_s5 + $0x10] sm:$0xff] %vm155_vm2, %v141_v59 }
 0x171   :  { %v142_v60 = vpop.trf.xlu0 }
 0x172   :  { %159 = vst.msk [vmem:[%s577_s5 + $0x18] sm:$0xff] %vm155_vm2, %v142_v60 }
 0x175   :  { %v143_v61 = vpop.trf.xlu0 }
 0x176   :  { %160 = vst.msk [vmem:[%s577_s5 + $0x20] sm:$0xff] %vm155_vm2, %v143_v61 }
 0x179   :  { %v144_v62 = vpop.trf.xlu0 }
 0x17a   :  { %161 = vst.msk [vmem:[%s577_s5 + $0x28] sm:$0xff] %vm155_vm2, %v144_v62 }
 0x17d   :  { %v145_v63 = vpop.trf.xlu0 }
 0x17e   :  { %162 = vst.msk [vmem:[%s577_s5 + $0x30] sm:$0xff] %vm155_vm2, %v145_v63 }
 0x181   :  { %v146_v0 = vpop.trf.xlu0 }
 0x182   :  { %163 = vst.msk [vmem:[%s577_s5 + $0x38] sm:$0xff] %vm155_vm2, %v146_v0 }
 0x185   :  { %v147_v1 = vpop.trf.xlu0 }
 0x186   :  { %164 = vst.msk [vmem:[%s577_s5 + $0x40] sm:$0xff] %vm155_vm2, %v147_v1 }
 0x189   :  { %v148_v2 = vpop.trf.xlu0 }
 0x18a   :  { %165 = vst.msk [vmem:[%s577_s5 + $0x48] sm:$0xff] %vm155_vm2, %v148_v2 }
 0x18d   :  { %v149_v3 = vpop.trf.xlu0 }
 0x18e   :  { %166 = vst.msk [vmem:[%s577_s5 + $0x50] sm:$0xff] %vm155_vm2, %v149_v3 }
 0x191   :  { %v150_v4 = vpop.trf.xlu0 }
 0x192   :  { %167 = vst.msk [vmem:[%s577_s5 + $0x58] sm:$0xff] %vm155_vm2, %v150_v4 }
 0x195   :  { %v151_v5 = vpop.trf.xlu0 }
 0x196   :  { %168 = vst.msk [vmem:[%s577_s5 + $0x60] sm:$0xff] %vm155_vm2, %v151_v5 }
 0x199   :  { %v152_v6 = vpop.trf.xlu0 }
 0x19a   :  { %169 = vst.msk [vmem:[%s577_s5 + $0x68] sm:$0xff] %vm155_vm2, %v152_v6 }
 0x19d   :  { %v153_v7 = vpop.trf.xlu0 }
 0x19e   :  { %170 = vst.msk [vmem:[%s577_s5 + $0x70] sm:$0xff] %vm155_vm2, %v153_v7 }
 0x1a1   :  { %v154_v8 = vpop.trf.xlu0 }
 0x1a2   :  { %171 = vst.msk [vmem:[%s577_s5 + $0x78] sm:$0xff] %vm155_vm2, %v154_v8 }
 0x1b8   :  { %v261_v10 = vpop.f32.mrb[0].mxu1 }
 0x1b9   :  { %v262_v11 = vadd.f32 %v279_v9, %v261_v10  ;;  %v350_v12 = vpop.f32.mrb[1].mxu1 }
 0x1bb   :  { %265 = vst [vmem:[%s579_s6] sm:$0xff] %v262_v11 }

</bundles_post_ra>
